<compile_context>
chip_gen: v6e
topology: v6e:2x2x1
jax: 0.10.0
libtpu: 0.0.40
codegen_flags: <defaults>
</compile_context>

<pallas_src>
import functools

import jax
import jax.numpy as jnp
from jax.experimental import pallas as pl
from jax.experimental.pallas import tpu as pltpu

PAD_ID = 0   # model.config.pad_token_id
BOS_ID = 2
UNK_ID = 3   # UNKID in the reference script

STATS_LANES = 128       # lane-dense stats slab: lane 0 = nll, lane 1 = argmax
VMEM_LIMIT = 64 * 1024 * 1024   # safe on v5e/v6e (128 MiB phys) and v7x (64 MiB phys)
LN_EPS = 1e-5


def _pick_tile(dim, prefs):
    for p in prefs:
        if dim % p == 0:
            return p
    return dim          # fallback: full dimension (caller keeps dims lane-friendly)


def _cparams(sems):
    return pltpu.CompilerParams(dimension_semantics=sems,
                                vmem_limit_bytes=VMEM_LIMIT)


# ----------------------------------------------------------------------------
# Fused linear: tiled matmul + bias (+GELU) (+residual) (+LayerNorm) epilogue
# ----------------------------------------------------------------------------

def _linear_kernel(x_ref, w_ref, b_ref, *rest, activation, has_residual, has_ln):
    n_extra = int(has_residual) + 2 * int(has_ln)
    extra = rest[:n_extra]
    o_ref, acc_ref = rest[n_extra], rest[n_extra + 1]

    @pl.when(pl.program_id(2) == 0)
    def _():
        acc_ref[...] = jnp.zeros_like(acc_ref)

    acc_ref[...] += jnp.dot(x_ref[...].astype(jnp.bfloat16),
                            w_ref[...].astype(jnp.bfloat16),
                            preferred_element_type=jnp.float32)

    @pl.when(pl.program_id(2) == pl.num_programs(2) - 1)
    def _():
        y = acc_ref[...] + b_ref[...]
        if activation == "gelu":
            y = jax.nn.gelu(y)
        idx = 0
        if has_residual:
            y = y + extra[idx][...].astype(jnp.float32)
            idx += 1
        if has_ln:
            g = extra[idx][...]
            beta = extra[idx + 1][...]
            mu = jnp.mean(y, axis=-1, keepdims=True)
            var = jnp.mean(jnp.square(y - mu), axis=-1, keepdims=True)
            y = (y - mu) * jax.lax.rsqrt(var + LN_EPS) * g + beta
        o_ref[...] = y.astype(o_ref.dtype)


def fused_linear(x, w, b, activation=None, residual=None, ln=None,
                 out_dtype=jnp.bfloat16):
    """y = [LN](act(x @ w + b) [+ residual]).

    x: [M,K] (f32 or bf16), w: [K,N] bf16-resident, b: [1,N] f32.  MXU runs in bf16,
    accumulation + epilogue in f32, output emitted in `out_dtype` (bf16 by default so
    downstream Pallas consumers never need a cast).  LN (over the full row) requires
    the full N in one tile and is used for the FFN w2 + residual + LayerNorm fusion."""
    M, K = x.shape
    K2, N = w.shape
    assert K == K2
    tm = M if M <= 256 else _pick_tile(M, (256, 128, 8))
    if ln is not None:
        tn = N                              # LN needs the whole row resident
    else:
        tn = N if N <= 512 else _pick_tile(N, (512, 256, 128))
    tk = K if K <= 1024 else _pick_tile(K, (1024, 512, 256, 128))
    grid = (M // tm, N // tn, K // tk)

    in_specs = [
        pl.BlockSpec((tm, tk), lambda i, j, k: (i, k)),
        pl.BlockSpec((tk, tn), lambda i, j, k: (k, j)),
        pl.BlockSpec((1, tn), lambda i, j, k: (0, j)),
    ]
    args = [x, w, b]
    if residual is not None:
        in_specs.append(pl.BlockSpec((tm, tn), lambda i, j, k: (i, j)))
        args.append(residual)
    if ln is not None:
        g, beta = ln
        in_specs.append(pl.BlockSpec((1, tn), lambda i, j, k: (0, j)))
        in_specs.append(pl.BlockSpec((1, tn), lambda i, j, k: (0, j)))
        args.extend([g, beta])

    kern = functools.partial(_linear_kernel, activation=activation,
                             has_residual=residual is not None,
                             has_ln=ln is not None)
    return pl.pallas_call(
        kern,
        out_shape=jax.ShapeDtypeStruct((M, N), out_dtype),
        grid=grid,
        in_specs=in_specs,
        out_specs=pl.BlockSpec((tm, tn), lambda i, j, k: (i, j)),
        scratch_shapes=[pltpu.VMEM((tm, tn), jnp.float32)],
        compiler_params=_cparams(("parallel", "parallel", "arbitrary")),
    )(*args)


# ----------------------------------------------------------------------------
# Fused attention: scores + mask + softmax + PV + Wo/bo + residual + LayerNorm
# ----------------------------------------------------------------------------

def _attention_kernel(q_ref, k_ref, v_ref, kmask_ref, wo_ref, bo_ref, res_ref,
                      g_ref, beta_ref, o_ref, *, scale, causal, tq):
    q = q_ref[...].astype(jnp.bfloat16)          # [tq, D]
    k = k_ref[...].astype(jnp.bfloat16)          # [Tk, D]
    v = v_ref[...].astype(jnp.bfloat16)          # [Tk, D]

    s = jax.lax.dot_general(q, k, (((1,), (1,)), ((), ())),
                            preferred_element_type=jnp.float32) * scale   # [tq, Tk]
    Tq, Tk = s.shape

    allowed = kmask_ref[...] != 0                # [1, Tk], built in-kernel (no f32 bias)
    if causal:
        row = jax.lax.broadcasted_iota(jnp.int32, (Tq, Tk), 0) + pl.program_id(1) * tq
        col = jax.lax.broadcasted_iota(jnp.int32, (Tq, Tk), 1)
        allowed = allowed & (row >= col)
    s = jnp.where(allowed, s, -1e9)

    m = jnp.max(s, axis=-1, keepdims=True)
    e = jnp.exp(s - m)                           # f32 exp (v5e-safe)
    l = jnp.sum(e, axis=-1, keepdims=True)

    # deferred softmax normalization: PV matmul on un-normalized weights, then one
    # EUP reciprocal broadcast over D (separate VLIW slot -> effectively free)
    ctx = jnp.dot(e.astype(jnp.bfloat16), v, preferred_element_type=jnp.float32)
    ctx = ctx * pl.reciprocal(l, approx=True)    # [tq, D] f32

    out = jnp.dot(ctx.astype(jnp.bfloat16), wo_ref[...],
                  preferred_element_type=jnp.float32)
    out = out + bo_ref[...] + res_ref[...].astype(jnp.float32)   # fused residual

    # fused LayerNorm epilogue
    mu = jnp.mean(out, axis=-1, keepdims=True)
    var = jnp.mean(jnp.square(out - mu), axis=-1, keepdims=True)
    out = (out - mu) * jax.lax.rsqrt(var + LN_EPS) * g_ref[...] + beta_ref[...]

    o_ref[...] = out.astype(o_ref.dtype)


def fused_attention(q_src, kv_src, key_mask, residual, wo, bo, ln_g, ln_b, *,
                    causal, q_col, k_col, v_col):
    """LayerNorm(residual + Wo(softmax(QK^T/sqrt(D) + mask) V) + bo).

    q_src:  [B, Tq, Cq*D]  - Q lives in column block `q_col` (no JAX slicing).
    kv_src: [B, Tk, Ck*D]  - K/V live in column blocks `k_col` / `v_col`.
    For self-attention pass the fused [B,T,3D] QKV projection for BOTH, cols (0,1,2);
    for cross-attention pass q=[B,Tq,D] and kv=[B,Tk,2D], cols (0,0,1).
    key_mask: [B, 1, Tk] int32 (1 = attend); causal mask is built in-kernel.
    residual: [B, Tq, D] (f32 or bf16).  Output: [B, Tq, D] bf16."""
    B, Tq, _ = q_src.shape
    Tk = kv_src.shape[1]
    D = wo.shape[0]
    tq = Tq if Tq <= 256 else _pick_tile(Tq, (256, 128, 8))
    grid = (B, Tq // tq)

    kern = functools.partial(_attention_kernel, scale=1.0 / (D ** 0.5),
                             causal=causal, tq=tq)
    return pl.pallas_call(
        kern,
        out_shape=jax.ShapeDtypeStruct((B, Tq, D), jnp.bfloat16),
        grid=grid,
        in_specs=[
            pl.BlockSpec((None, tq, D), lambda b, i, c=q_col: (b, i, c)),
            pl.BlockSpec((None, Tk, D), lambda b, i, c=k_col: (b, 0, c)),
            pl.BlockSpec((None, Tk, D), lambda b, i, c=v_col: (b, 0, c)),
            pl.BlockSpec((None, 1, Tk), lambda b, i: (b, 0, 0)),
            pl.BlockSpec((D, D), lambda b, i: (0, 0)),
            pl.BlockSpec((1, D), lambda b, i: (0, 0)),
            pl.BlockSpec((None, tq, D), lambda b, i: (b, i, 0)),
            pl.BlockSpec((1, D), lambda b, i: (0, 0)),
            pl.BlockSpec((1, D), lambda b, i: (0, 0)),
        ],
        out_specs=pl.BlockSpec((None, tq, D), lambda b, i: (b, i, 0)),
        compiler_params=_cparams(("parallel", "parallel")),
    )(q_src, kv_src, kv_src, key_mask, wo, bo, residual, ln_g, ln_b)


# ----------------------------------------------------------------------------
# Fused LM head + per-token metrics (online softmax / argmax over vocab tiles)
# ----------------------------------------------------------------------------

def _head_metrics_kernel(h_ref, w_ref, b_ref, gold_ref,
                         logits_ref, stats_ref,
                         m_run, l_run, g_run, amax_i):
    j = pl.program_id(1)

    @pl.when(j == 0)
    def _():
        m_run[...] = jnp.full_like(m_run, -jnp.inf)
        l_run[...] = jnp.zeros_like(l_run)
        g_run[...] = jnp.zeros_like(g_run)
        amax_i[...] = jnp.zeros_like(amax_i)

    logits = jnp.dot(h_ref[...].astype(jnp.bfloat16),
                     w_ref[...].astype(jnp.bfloat16),
                     preferred_element_type=jnp.float32) + b_ref[...]
    logits_ref[...] = logits                              # lane-dense [tm, tn] store

    tm, tn = logits.shape
    col = jax.lax.broadcasted_iota(jnp.int32, (tm, tn), 1) + j * tn   # global columns
    gold = gold_ref[...]                                              # [tm, 1] int32

    # single sweep: tile max + tile argmax (first index of max)
    tile_max = jnp.max(logits, axis=-1, keepdims=True)
    tile_arg = jnp.min(jnp.where(logits >= tile_max, col, jnp.int32(2 ** 30)),
                       axis=-1, keepdims=True)

    # online log-sum-exp (m_run doubles as the running argmax value -> no amax_v)
    m_prev = m_run[...]
    m_new = jnp.maximum(m_prev, tile_max)
    l_run[...] = (l_run[...] * jnp.exp(m_prev - m_new)
                  + jnp.sum(jnp.exp(logits - m_new), axis=-1, keepdims=True))
    m_run[...] = m_new

    # online gold-logit gather
    g_run[...] += jnp.sum(jnp.where(col == gold, logits, 0.0),
                          axis=-1, keepdims=True)

    # online argmax (ties resolve to the lowest index)
    amax_i[...] = jnp.where(tile_max > m_prev, tile_arg, amax_i[...])

    @pl.when(j == pl.num_programs(1) - 1)
    def _():
        nll = m_run[...] + jnp.log(l_run[...]) - g_run[...]          # [tm, 1]
        lane = jax.lax.broadcasted_iota(jnp.int32, stats_ref.shape, 1)
        # NOTE: argmax is round-tripped through f32 -> exact only for vocab < 2**24.
        stats_ref[...] = jnp.where(
            lane == 0, nll,
            jnp.where(lane == 1, amax_i[...].astype(jnp.float32), 0.0))


def head_and_metrics(h2d, w_out, b_out, gold2d):
    """Fused outlin + per-token NLL + argmax.  Returns (logits [N,V] f32, nll [N], pred [N])."""
    N, D = h2d.shape
    V = w_out.shape[1]
    tm = N if N <= 256 else _pick_tile(N, (256, 128, 8))
    tn = V if V <= 512 else _pick_tile(V, (512, 256, 128))
    grid = (N // tm, V // tn)

    logits, stats = pl.pallas_call(
        _head_metrics_kernel,
        out_shape=(
            jax.ShapeDtypeStruct((N, V), jnp.float32),     # ret[0]: keep f32 (torch parity)
            jax.ShapeDtypeStruct((N, STATS_LANES), jnp.float32),
        ),
        grid=grid,
        in_specs=[
            pl.BlockSpec((tm, D), lambda i, j: (i, 0)),
            pl.BlockSpec((D, tn), lambda i, j: (0, j)),
            pl.BlockSpec((1, tn), lambda i, j: (0, j)),
            pl.BlockSpec((tm, 1), lambda i, j: (i, 0)),
        ],
        out_specs=(
            pl.BlockSpec((tm, tn), lambda i, j: (i, j)),
            pl.BlockSpec((tm, STATS_LANES), lambda i, j: (i, 0)),
        ),
        scratch_shapes=[
            pltpu.VMEM((tm, 1), jnp.float32),   # running max (also the argmax value)
            pltpu.VMEM((tm, 1), jnp.float32),   # running exp-sum
            pltpu.VMEM((tm, 1), jnp.float32),   # running gold logit
            pltpu.VMEM((tm, 1), jnp.int32),     # running argmax index
        ],
        compiler_params=_cparams(("parallel", "arbitrary")),
    )(h2d, w_out, b_out, gold2d.astype(jnp.int32))

    nll = stats[:, 0]
    pred = stats[:, 1].astype(jnp.int32)
    return logits, nll, pred


# ----------------------------------------------------------------------------
# Tiny BartGenerator-like model (1 enc layer, 1 dec layer, single head)
# ----------------------------------------------------------------------------

def encode(params, input_ids, key_mask):
    B, T = input_ids.shape
    D = params["tok_emb"].shape[1]
    x0 = params["tok_emb"][input_ids] + params["pos_emb"][:T][None]      # f32 [B,T,D]
    pe = params["enc"]
    a = pe["attn"]
    qkv = fused_linear(x0.reshape(B * T, D), a["wqkv"], a["bqkv"]).reshape(B, T, 3 * D)
    x1 = fused_attention(qkv, qkv, key_mask, x0, a["wo"], a["bo"],
                         pe["ln1_g"], pe["ln1_b"],
                         causal=False, q_col=0, k_col=1, v_col=2)        # bf16 [B,T,D]
    f = pe["ffn"]
    h = fused_linear(x1.reshape(B * T, D), f["w1"], f["b1"], activation="gelu")
    x2 = fused_linear(h, f["w2"], f["b2"], residual=x1.reshape(B * T, D),
                      ln=(pe["ln2_g"], pe["ln2_b"]))
    return x2.reshape(B, T, D)                                           # bf16


def decode(params, dec_ids, enc_out, enc_key_mask, dec_key_mask):
    B, T = dec_ids.shape
    D = params["tok_emb"].shape[1]
    y0 = params["tok_emb"][dec_ids] + params["pos_emb"][:T][None]        # f32 [B,T,D]
    pd = params["dec"]

    sa = pd["self_attn"]
    qkv = fused_linear(y0.reshape(B * T, D), sa["wqkv"], sa["bqkv"]).reshape(B, T, 3 * D)
    y1 = fused_attention(qkv, qkv, dec_key_mask, y0, sa["wo"], sa["bo"],
                         pd["ln1_g"], pd["ln1_b"],
                         causal=True, q_col=0, k_col=1, v_col=2)

    ca = pd["cross_attn"]
    Te = enc_out.shape[1]
    q = fused_linear(y1.reshape(B * T, D), ca["wq"], ca["bq"]).reshape(B, T, D)
    kv = fused_linear(enc_out.reshape(B * Te, D), ca["wkv"], ca["bkv"]).reshape(B, Te, 2 * D)
    y2 = fused_attention(q, kv, enc_key_mask, y1, ca["wo"], ca["bo"],
                         pd["ln2_g"], pd["ln2_b"],
                         causal=False, q_col=0, k_col=0, v_col=1)

    f = pd["ffn"]
    h = fused_linear(y2.reshape(B * T, D), f["w1"], f["b1"], activation="gelu")
    y3 = fused_linear(h, f["w2"], f["b2"], residual=y2.reshape(B * T, D),
                      ln=(pd["ln3_g"], pd["ln3_b"]))
    return y3.reshape(B, T, D)                                           # bf16


# ----------------------------------------------------------------------------
# AdversaryTrain.forward
# ----------------------------------------------------------------------------

def adversary_train_forward(params, input_ids, output_ids, adv_output_ids):
    del output_ids  # not used by the reference forward
    B, Te = input_ids.shape
    Td = adv_output_ids.shape[1]

    enc_key_mask = (input_ids != PAD_ID).astype(jnp.int32).reshape(B, 1, Te)
    dec_key_mask = (adv_output_ids != PAD_ID).astype(jnp.int32).reshape(B, 1, Td)

    enc_out = encode(params, input_ids, enc_key_mask)
    dec_out = decode(params, adv_output_ids, enc_out, enc_key_mask, dec_key_mask)

    D = dec_out.shape[-1]
    V = params["outlin_w"].shape[1]

    # gold = adv_output_ids[:, 1:]; pad an extra column so gold aligns with probs[:, :Td]
    gold = adv_output_ids[:, 1:]
    gold_full = jnp.concatenate(
        [gold, jnp.full((B, 1), PAD_ID, dtype=adv_output_ids.dtype)], axis=1)  # [B, Td]

    logits_flat, nll_flat, pred_flat = head_and_metrics(
        dec_out.reshape(B * Td, D),
        params["outlin_w"], params["outlin_b"],
        gold_full.reshape(B * Td, 1))

    probs = logits_flat.reshape(B, Td, V)          # ret[0] (lm_logits)
    predactions = pred_flat.reshape(B, Td)         # probs.max(-1) indices
    nll = nll_flat.reshape(B, Td)

    # ---- CELoss(ignore_index=pad, smoothing=0) ----
    token_mask = (gold_full != PAD_ID).astype(jnp.float32)
    denom = jnp.maximum(jnp.sum(token_mask), 1.0)
    ce = jnp.sum(nll * token_mask) / denom

    # ---- SeqAccuracies (padid=PAD_ID, unkid=UNK_ID; unk gold counted wrong) ----
    same = (predactions == gold_full) & (gold_full != UNK_ID)
    same_f = same.astype(jnp.float32)
    elem_acc = jnp.sum(same_f * token_mask) / denom
    seq_ok = jnp.all(same | (gold_full == PAD_ID), axis=1).astype(jnp.float32)
    seq_acc = jnp.mean(seq_ok)

    # TODO(synk): TreeAccuracy (tensor2tree / orderless tree comparison) has no Pallas
    #             equivalent (pure Python string/tree post-processing) -> omitted.
    outputs = {
        "adv_loss": ce,
        "adv_ce": ce,
        "adv_elem_acc": elem_acc,
        "adv_seq_acc": seq_acc,
    }
    ret = (probs,)
    return outputs, ret


# ----------------------------------------------------------------------------
# Deterministic parameter init (matmul weights bf16-resident; biases/LN f32)
# ----------------------------------------------------------------------------

def init_params(key, vocab, d_model, d_ff, max_pos):
    ks = iter(jax.random.split(key, 32))

    def nrm(shape, dtype=jnp.float32):
        return (0.02 * jax.random.normal(next(ks), shape)).astype(dtype)

    def self_attn_p():
        return {"wqkv": nrm((d_model, 3 * d_model), jnp.bfloat16),
                "bqkv": jnp.zeros((1, 3 * d_model), jnp.float32),
                "wo": nrm((d_model, d_model), jnp.bfloat16),
                "bo": jnp.zeros((1, d_model), jnp.float32)}

    def cross_attn_p():
        return {"wq": nrm((d_model, d_model), jnp.bfloat16),
                "bq": jnp.zeros((1, d_model), jnp.float32),
                "wkv": nrm((d_model, 2 * d_model), jnp.bfloat16),
                "bkv": jnp.zeros((1, 2 * d_model), jnp.float32),
                "wo": nrm((d_model, d_model), jnp.bfloat16),
                "bo": jnp.zeros((1, d_model), jnp.float32)}

    def ffn_p():
        return {"w1": nrm((d_model, d_ff), jnp.bfloat16),
                "b1": jnp.zeros((1, d_ff), jnp.float32),
                "w2": nrm((d_ff, d_model), jnp.bfloat16),
                "b2": jnp.zeros((1, d_model), jnp.float32)}

    ones = jnp.ones((1, d_model), jnp.float32)
    zeros = jnp.zeros((1, d_model), jnp.float32)
    return {
        "tok_emb": nrm((vocab, d_model)),      # f32: embeddings double as f32 residual
        "pos_emb": nrm((max_pos, d_model)),
        "enc": {"attn": self_attn_p(), "ffn": ffn_p(),
                "ln1_g": ones, "ln1_b": zeros, "ln2_g": ones, "ln2_b": zeros},
        "dec": {"self_attn": self_attn_p(), "cross_attn": cross_attn_p(), "ffn": ffn_p(),
                "ln1_g": ones, "ln1_b": zeros, "ln2_g": ones, "ln2_b": zeros,
                "ln3_g": ones, "ln3_b": zeros},
        "outlin_w": nrm((d_model, vocab), jnp.bfloat16),
        "outlin_b": jnp.zeros((1, vocab), jnp.float32),
    }


# ----------------------------------------------------------------------------
# Main
# ----------------------------------------------------------------------------

if __name__ == "__main__":
    B, T_ENC, T_DEC = 2, 8, 8
    # lane-dense model dims (multiples of 128) so every matmul/store is unmasked
    D_MODEL, D_FF, VOCAB, MAX_POS = 128, 256, 256, 16

    key = jax.random.PRNGKey(0)
    kp, k1, k2 = jax.random.split(key, 3)
    params = init_params(kp, VOCAB, D_MODEL, D_FF, MAX_POS)

    # deterministic synthetic token ids (pad at the tail, BOS at decoder start)
    input_ids = jax.random.randint(k1, (B, T_ENC), 4, VOCAB, dtype=jnp.int32)
    input_ids = input_ids.at[:, -2:].set(PAD_ID)

    adv_output_ids = jax.random.randint(k2, (B, T_DEC), 4, VOCAB, dtype=jnp.int32)
    adv_output_ids = adv_output_ids.at[:, 0].set(BOS_ID)
    adv_output_ids = adv_output_ids.at[:, -2:].set(PAD_ID)
    adv_output_ids = adv_output_ids.at[0, 3].set(UNK_ID)   # exercise unkid handling
    output_ids = adv_output_ids  # unused by forward, mirrors the torch signature

    fwd = jax.jit(adversary_train_forward)
    outputs, ret = fwd(params, input_ids, output_ids, adv_output_ids)
    jax.block_until_ready((outputs, ret))

    print("KERNEL_OK")
</pallas_src>

<mosaic_0001>
module attributes {stable_mosaic.version = 11 : i64} {
  func.func @_attention_kernel(%arg0: i32, %arg1: i32, %arg2: memref<1x8x128xbf16, #tpu.memory_space<vmem>>, %arg3: memref<1x8x128xbf16, #tpu.memory_space<vmem>>, %arg4: memref<1x8x128xbf16, #tpu.memory_space<vmem>>, %arg5: memref<1x1x8xi32, #tpu.memory_space<vmem>>, %arg6: memref<128x128xbf16, #tpu.memory_space<vmem>>, %arg7: memref<1x128xf32, #tpu.memory_space<vmem>>, %arg8: memref<1x8x128xf32, #tpu.memory_space<vmem>>, %arg9: memref<1x128xf32, #tpu.memory_space<vmem>>, %arg10: memref<1x128xf32, #tpu.memory_space<vmem>>, %arg11: memref<1x8x128xbf16, #tpu.memory_space<vmem>>) attributes {dimension_semantics = [#tpu.dimension_semantics<parallel>, #tpu.dimension_semantics<parallel>], iteration_bounds = array<i64: 2, 1>, scalar_prefetch = 0 : i64, scratch_operands = 0 : i64, tpu.core_type = #tpu.core_type<tc>, window_params = [{transform_indices = @transform_0, window_bounds = array<i64: 1, 8, 128>}, {transform_indices = @transform_1, window_bounds = array<i64: 1, 8, 128>}, {transform_indices = @transform_2, window_bounds = array<i64: 1, 8, 128>}, {transform_indices = @transform_3, window_bounds = array<i64: 1, 1, 8>}, {pipeline_mode = #tpu.pipeline_mode<synchronous>, transform_indices = @transform_4, window_bounds = array<i64: 128, 128>}, {pipeline_mode = #tpu.pipeline_mode<synchronous>, transform_indices = @transform_5, window_bounds = array<i64: 1, 128>}, {transform_indices = @transform_6, window_bounds = array<i64: 1, 8, 128>}, {pipeline_mode = #tpu.pipeline_mode<synchronous>, transform_indices = @transform_7, window_bounds = array<i64: 1, 128>}, {pipeline_mode = #tpu.pipeline_mode<synchronous>, transform_indices = @transform_8, window_bounds = array<i64: 1, 128>}, {transform_indices = @transform_9, window_bounds = array<i64: 1, 8, 128>}]} {
    %c0 = arith.constant 0 : index
    %c0_0 = arith.constant 0 : index
    %c0_1 = arith.constant 0 : index
    %0 = vector.load %arg2[%c0, %c0_0, %c0_1] : memref<1x8x128xbf16, #tpu.memory_space<vmem>>, vector<1x8x128xbf16>
    %1 = vector.shape_cast %0 : vector<1x8x128xbf16> to vector<8x128xbf16>
    %c0_2 = arith.constant 0 : index
    %c0_3 = arith.constant 0 : index
    %c0_4 = arith.constant 0 : index
    %2 = vector.load %arg3[%c0_2, %c0_3, %c0_4] : memref<1x8x128xbf16, #tpu.memory_space<vmem>>, vector<1x8x128xbf16>
    %3 = vector.shape_cast %2 : vector<1x8x128xbf16> to vector<8x128xbf16>
    %c0_5 = arith.constant 0 : index
    %c0_6 = arith.constant 0 : index
    %c0_7 = arith.constant 0 : index
    %4 = vector.load %arg4[%c0_5, %c0_6, %c0_7] : memref<1x8x128xbf16, #tpu.memory_space<vmem>>, vector<1x8x128xbf16>
    %5 = vector.shape_cast %4 : vector<1x8x128xbf16> to vector<8x128xbf16>
    %cst = arith.constant dense<0.000000e+00> : vector<8x8xf32>
    %6 = tpu.matmul %1, %3, %cst {dimension_numbers = #tpu.dot_dimension_numbers<[1], [1], [0], [0], [0, 0, 1, 0], [], []>} : vector<8x128xbf16>, vector<8x128xbf16>, vector<8x8xf32> -> vector<8x8xf32>
    %cst_8 = arith.constant 0.0883883461 : f32
    %7 = vector.broadcast %cst_8 : f32 to vector<8x8xf32>
    %8 = arith.mulf %6, %7 : vector<8x8xf32>
    %c0_9 = arith.constant 0 : index
    %c0_10 = arith.constant 0 : index
    %c0_11 = arith.constant 0 : index
    %9 = vector.load %arg5[%c0_9, %c0_10, %c0_11] : memref<1x1x8xi32, #tpu.memory_space<vmem>>, vector<1x1x8xi32>
    %10 = vector.shape_cast %9 : vector<1x1x8xi32> to vector<1x8xi32>
    %c0_i32 = arith.constant 0 : i32
    %11 = vector.broadcast %c0_i32 : i32 to vector<1x8xi32>
    %12 = arith.cmpi ne, %10, %11 : vector<1x8xi32>
    %cst_12 = arith.constant -1.000000e+09 : f32
    %13 = vector.shape_cast %12 : vector<1x8xi1> to vector<1x8xi1>
    %14 = vector.broadcast %13 : vector<1x8xi1> to vector<8x8xi1>
    %15 = vector.broadcast %cst_12 : f32 to vector<8x8xf32>
    %16 = arith.select %14, %8, %15 : vector<8x8xi1>, vector<8x8xf32>
    %cst_13 = arith.constant dense<0xFF800000> : vector<8xf32>
    %17 = vector.multi_reduction <maximumf>, %16, %cst_13 [1] : vector<8x8xf32> to vector<8xf32>
    %18 = vector.shape_cast %17 : vector<8xf32> to vector<8x1xf32>
    %19 = vector.broadcast %18 : vector<8x1xf32> to vector<8x8xf32>
    %20 = arith.subf %16, %19 : vector<8x8xf32>
    %21 = math.exp %20 : vector<8x8xf32>
    %cst_14 = arith.constant dense<0.000000e+00> : vector<8xf32>
    %22 = vector.multi_reduction <add>, %21, %cst_14 [1] : vector<8x8xf32> to vector<8xf32>
    %23 = vector.shape_cast %22 : vector<8xf32> to vector<8x1xf32>
    %24 = arith.truncf %21 : vector<8x8xf32> to vector<8x8xbf16>
    %cst_15 = arith.constant dense<0.000000e+00> : vector<8x128xf32>
    %25 = tpu.matmul %24, %5, %cst_15 {dimension_numbers = #tpu.dot_dimension_numbers<[1], [0], [0], [1], [0, 0, 1, 1], [], []>} : vector<8x8xbf16>, vector<8x128xbf16>, vector<8x128xf32> -> vector<8x128xf32>
    %26 = tpu.reciprocal %23 {approx = true} : vector<8x1xf32> -> vector<8x1xf32>
    %27 = vector.broadcast %26 : vector<8x1xf32> to vector<8x128xf32>
    %28 = arith.mulf %25, %27 : vector<8x128xf32>
    %29 = arith.truncf %28 : vector<8x128xf32> to vector<8x128xbf16>
    %c0_16 = arith.constant 0 : index
    %c0_17 = arith.constant 0 : index
    %30 = vector.load %arg6[%c0_16, %c0_17] : memref<128x128xbf16, #tpu.memory_space<vmem>>, vector<128x128xbf16>
    %cst_18 = arith.constant dense<0.000000e+00> : vector<8x128xf32>
    %31 = tpu.matmul %29, %30, %cst_18 {dimension_numbers = #tpu.dot_dimension_numbers<[1], [0], [0], [1], [0, 0, 1, 1], [], []>} : vector<8x128xbf16>, vector<128x128xbf16>, vector<8x128xf32> -> vector<8x128xf32>
    %c0_19 = arith.constant 0 : index
    %c0_20 = arith.constant 0 : index
    %32 = vector.load %arg7[%c0_19, %c0_20] : memref<1x128xf32, #tpu.memory_space<vmem>>, vector<1x128xf32>
    %33 = vector.broadcast %32 : vector<1x128xf32> to vector<8x128xf32>
    %34 = arith.addf %31, %33 : vector<8x128xf32>
    %c0_21 = arith.constant 0 : index
    %c0_22 = arith.constant 0 : index
    %c0_23 = arith.constant 0 : index
    %35 = vector.load %arg8[%c0_21, %c0_22, %c0_23] : memref<1x8x128xf32, #tpu.memory_space<vmem>>, vector<1x8x128xf32>
    %36 = vector.shape_cast %35 : vector<1x8x128xf32> to vector<8x128xf32>
    %37 = arith.addf %34, %36 : vector<8x128xf32>
    %cst_24 = arith.constant dense<0.000000e+00> : vector<8xf32>
    %38 = vector.multi_reduction <add>, %37, %cst_24 [1] : vector<8x128xf32> to vector<8xf32>
    %39 = vector.shape_cast %38 : vector<8xf32> to vector<8x1xf32>
    %cst_25 = arith.constant 1.280000e+02 : f32
    %40 = vector.broadcast %cst_25 : f32 to vector<8x1xf32>
    %41 = arith.divf %39, %40 : vector<8x1xf32>
    %42 = vector.broadcast %41 : vector<8x1xf32> to vector<8x128xf32>
    %43 = arith.subf %37, %42 : vector<8x128xf32>
    %44 = arith.mulf %43, %43 : vector<8x128xf32>
    %cst_26 = arith.constant dense<0.000000e+00> : vector<8xf32>
    %45 = vector.multi_reduction <add>, %44, %cst_26 [1] : vector<8x128xf32> to vector<8xf32>
    %46 = vector.shape_cast %45 : vector<8xf32> to vector<8x1xf32>
    %cst_27 = arith.constant 1.280000e+02 : f32
    %47 = vector.broadcast %cst_27 : f32 to vector<8x1xf32>
    %48 = arith.divf %46, %47 : vector<8x1xf32>
    %49 = vector.broadcast %41 : vector<8x1xf32> to vector<8x128xf32>
    %50 = arith.subf %37, %49 : vector<8x128xf32>
    %cst_28 = arith.constant 9.99999974E-6 : f32
    %51 = vector.broadcast %cst_28 : f32 to vector<8x1xf32>
    %52 = arith.addf %48, %51 : vector<8x1xf32>
    %53 = math.rsqrt %52 : vector<8x1xf32>
    %54 = vector.broadcast %53 : vector<8x1xf32> to vector<8x128xf32>
    %55 = arith.mulf %50, %54 : vector<8x128xf32>
    %c0_29 = arith.constant 0 : index
    %c0_30 = arith.constant 0 : index
    %56 = vector.load %arg9[%c0_29, %c0_30] : memref<1x128xf32, #tpu.memory_space<vmem>>, vector<1x128xf32>
    %57 = vector.broadcast %56 : vector<1x128xf32> to vector<8x128xf32>
    %58 = arith.mulf %55, %57 : vector<8x128xf32>
    %c0_31 = arith.constant 0 : index
    %c0_32 = arith.constant 0 : index
    %59 = vector.load %arg10[%c0_31, %c0_32] : memref<1x128xf32, #tpu.memory_space<vmem>>, vector<1x128xf32>
    %60 = vector.broadcast %59 : vector<1x128xf32> to vector<8x128xf32>
    %61 = arith.addf %58, %60 : vector<8x128xf32>
    %62 = arith.truncf %61 : vector<8x128xf32> to vector<8x128xbf16>
    %c0_33 = arith.constant 0 : index
    %c0_34 = arith.constant 0 : index
    %c0_35 = arith.constant 0 : index
    %63 = vector.load %arg11[%c0_33, %c0_34, %c0_35] : memref<1x8x128xbf16, #tpu.memory_space<vmem>>, vector<1x8x128xbf16>
    %64 = vector.shape_cast %63 : vector<1x8x128xbf16> to vector<8x128xbf16>
    %65 = vector.shape_cast %62 : vector<8x128xbf16> to vector<1x8x128xbf16>
    tpu.vector_store %arg11[%c0_33, %c0_34, %c0_35], %65 {strides = array<i32>} : memref<1x8x128xbf16, #tpu.memory_space<vmem>>, vector<1x8x128xbf16>,
    return
  }
  func.func @transform_0(%arg0: i32, %arg1: i32) -> (i32, i32, i32) {
    %c0_i32 = arith.constant 0 : i32
    %c0_i32_0 = arith.constant 0 : i32
    return %arg0, %arg1, %c0_i32 : i32, i32, i32
  }
  func.func @transform_1(%arg0: i32, %arg1: i32) -> (i32, i32, i32) {
    %c0_i32 = arith.constant 0 : i32
    %c1_i32 = arith.constant 1 : i32
    %c0_i32_0 = arith.constant 0 : i32
    return %arg0, %c0_i32, %c1_i32 : i32, i32, i32
  }
  func.func @transform_2(%arg0: i32, %arg1: i32) -> (i32, i32, i32) {
    %c0_i32 = arith.constant 0 : i32
    %c2_i32 = arith.constant 2 : i32
    %c0_i32_0 = arith.constant 0 : i32
    return %arg0, %c0_i32, %c2_i32 : i32, i32, i32
  }
  func.func @transform_3(%arg0: i32, %arg1: i32) -> (i32, i32, i32) {
    %c0_i32 = arith.constant 0 : i32
    %c0_i32_0 = arith.constant 0 : i32
    %c0_i32_1 = arith.constant 0 : i32
    return %arg0, %c0_i32, %c0_i32_0 : i32, i32, i32
  }
  func.func @transform_4(%arg0: i32, %arg1: i32) -> (i32, i32) {
    %c0_i32 = arith.constant 0 : i32
    %c0_i32_0 = arith.constant 0 : i32
    %c0_i32_1 = arith.constant 0 : i32
    return %c0_i32, %c0_i32_0 : i32, i32
  }
  func.func @transform_5(%arg0: i32, %arg1: i32) -> (i32, i32) {
    %c0_i32 = arith.constant 0 : i32
    %c0_i32_0 = arith.constant 0 : i32
    %c0_i32_1 = arith.constant 0 : i32
    return %c0_i32, %c0_i32_0 : i32, i32
  }
  func.func @transform_6(%arg0: i32, %arg1: i32) -> (i32, i32, i32) {
    %c0_i32 = arith.constant 0 : i32
    %c0_i32_0 = arith.constant 0 : i32
    return %arg0, %arg1, %c0_i32 : i32, i32, i32
  }
  func.func @transform_7(%arg0: i32, %arg1: i32) -> (i32, i32) {
    %c0_i32 = arith.constant 0 : i32
    %c0_i32_0 = arith.constant 0 : i32
    %c0_i32_1 = arith.constant 0 : i32
    return %c0_i32, %c0_i32_0 : i32, i32
  }
  func.func @transform_8(%arg0: i32, %arg1: i32) -> (i32, i32) {
    %c0_i32 = arith.constant 0 : i32
    %c0_i32_0 = arith.constant 0 : i32
    %c0_i32_1 = arith.constant 0 : i32
    return %c0_i32, %c0_i32_0 : i32, i32
  }
  func.func @transform_9(%arg0: i32, %arg1: i32) -> (i32, i32, i32) {
    %c0_i32 = arith.constant 0 : i32
    %c0_i32_0 = arith.constant 0 : i32
    return %arg0, %arg1, %c0_i32 : i32, i32, i32
  }
}

module attributes {stable_mosaic.version = 11 : i64} {
  func.func @_linear_kernel(%arg0: i32, %arg1: i32, %arg2: i32, %arg3: memref<16x128xf32, #tpu.memory_space<vmem>>, %arg4: memref<128x384xbf16, #tpu.memory_space<vmem>>, %arg5: memref<1x384xf32, #tpu.memory_space<vmem>>, %arg6: memref<16x384xbf16, #tpu.memory_space<vmem>>, %arg7: memref<16x384xf32, #tpu.memory_space<vmem>>) attributes {dimension_semantics = [#tpu.dimension_semantics<parallel>, #tpu.dimension_semantics<parallel>, #tpu.dimension_semantics<arbitrary>], iteration_bounds = array<i64: 1, 1, 1>, scalar_prefetch = 0 : i64, scratch_operands = 1 : i64, tpu.core_type = #tpu.core_type<tc>, window_params = [{transform_indices = @transform_0, window_bounds = array<i64: 16, 128>}, {transform_indices = @transform_1, window_bounds = array<i64: 128, 384>}, {transform_indices = @transform_2, window_bounds = array<i64: 1, 384>}, {transform_indices = @transform_3, window_bounds = array<i64: 16, 384>}]} {
    %c0_i32 = arith.constant 0 : i32
    %0 = arith.cmpi eq, %arg2, %c0_i32 : i32
    %1 = arith.extui %0 : i1 to i32
    %c0_i32_0 = arith.constant 0 : i32
    %2 = arith.cmpi ne, %1, %c0_i32_0 : i32
    scf.if %2 {
      %cst_10 = arith.constant 0.000000e+00 : f32
      %13 = vector.broadcast %cst_10 : f32 to vector<16x384xf32>
      %c0_11 = arith.constant 0 : index
      %c0_12 = arith.constant 0 : index
      %14 = vector.load %arg7[%c0_11, %c0_12] : memref<16x384xf32, #tpu.memory_space<vmem>>, vector<16x384xf32>
      tpu.vector_store %arg7[%c0_11, %c0_12], %13 {strides = array<i32>} : memref<16x384xf32, #tpu.memory_space<vmem>>, vector<16x384xf32>,
    } else {
    }
    %c0 = arith.constant 0 : index
    %c0_1 = arith.constant 0 : index
    %3 = vector.load %arg7[%c0, %c0_1] : memref<16x384xf32, #tpu.memory_space<vmem>>, vector<16x384xf32>
    %c0_2 = arith.constant 0 : index
    %c0_3 = arith.constant 0 : index
    %4 = vector.load %arg3[%c0_2, %c0_3] : memref<16x128xf32, #tpu.memory_space<vmem>>, vector<16x128xf32>
    %5 = arith.truncf %4 : vector<16x128xf32> to vector<16x128xbf16>
    %c0_4 = arith.constant 0 : index
    %c0_5 = arith.constant 0 : index
    %6 = vector.load %arg4[%c0_4, %c0_5] : memref<128x384xbf16, #tpu.memory_space<vmem>>, vector<128x384xbf16>
    %cst = arith.constant dense<0.000000e+00> : vector<16x384xf32>
    %7 = tpu.matmul %5, %6, %cst {dimension_numbers = #tpu.dot_dimension_numbers<[1], [0], [0], [1], [0, 0, 1, 1], [], []>} : vector<16x128xbf16>, vector<128x384xbf16>, vector<16x384xf32> -> vector<16x384xf32>
    %8 = arith.addf %3, %7 : vector<16x384xf32>
    %c0_6 = arith.constant 0 : index
    %c0_7 = arith.constant 0 : index
    %9 = vector.load %arg7[%c0_6, %c0_7] : memref<16x384xf32, #tpu.memory_space<vmem>>, vector<16x384xf32>
    tpu.vector_store %arg7[%c0_6, %c0_7], %8 {strides = array<i32>} : memref<16x384xf32, #tpu.memory_space<vmem>>, vector<16x384xf32>,
    %c0_i32_8 = arith.constant 0 : i32
    %10 = arith.cmpi eq, %arg2, %c0_i32_8 : i32
    %11 = arith.extui %10 : i1 to i32
    %c0_i32_9 = arith.constant 0 : i32
    %12 = arith.cmpi ne, %11, %c0_i32_9 : i32
    scf.if %12 {
      %c0_10 = arith.constant 0 : index
      %c0_11 = arith.constant 0 : index
      %13 = vector.load %arg7[%c0_10, %c0_11] : memref<16x384xf32, #tpu.memory_space<vmem>>, vector<16x384xf32>
      %c0_12 = arith.constant 0 : index
      %c0_13 = arith.constant 0 : index
      %14 = vector.load %arg5[%c0_12, %c0_13] : memref<1x384xf32, #tpu.memory_space<vmem>>, vector<1x384xf32>
      %15 = vector.broadcast %14 : vector<1x384xf32> to vector<16x384xf32>
      %16 = arith.addf %13, %15 : vector<16x384xf32>
      %17 = arith.truncf %16 : vector<16x384xf32> to vector<16x384xbf16>
      %c0_14 = arith.constant 0 : index
      %c0_15 = arith.constant 0 : index
      %18 = vector.load %arg6[%c0_14, %c0_15] : memref<16x384xbf16, #tpu.memory_space<vmem>>, vector<16x384xbf16>
      tpu.vector_store %arg6[%c0_14, %c0_15], %17 {strides = array<i32>} : memref<16x384xbf16, #tpu.memory_space<vmem>>, vector<16x384xbf16>,
    } else {
    }
    return
  }
  func.func @transform_0(%arg0: i32, %arg1: i32, %arg2: i32) -> (i32, i32) {
    %c0_i32 = arith.constant 0 : i32
    return %arg0, %arg2 : i32, i32
  }
  func.func @transform_1(%arg0: i32, %arg1: i32, %arg2: i32) -> (i32, i32) {
    %c0_i32 = arith.constant 0 : i32
    return %arg2, %arg1 : i32, i32
  }
  func.func @transform_2(%arg0: i32, %arg1: i32, %arg2: i32) -> (i32, i32) {
    %c0_i32 = arith.constant 0 : i32
    %c0_i32_0 = arith.constant 0 : i32
    return %c0_i32, %arg1 : i32, i32
  }
  func.func @transform_3(%arg0: i32, %arg1: i32, %arg2: i32) -> (i32, i32) {
    %c0_i32 = arith.constant 0 : i32
    return %arg0, %arg1 : i32, i32
  }
}

module attributes {stable_mosaic.version = 11 : i64} {
  func.func @_linear_kernel(%arg0: i32, %arg1: i32, %arg2: i32, %arg3: memref<16x128xbf16, #tpu.memory_space<vmem>>, %arg4: memref<128x256xbf16, #tpu.memory_space<vmem>>, %arg5: memref<1x256xf32, #tpu.memory_space<vmem>>, %arg6: memref<16x256xbf16, #tpu.memory_space<vmem>>, %arg7: memref<16x256xf32, #tpu.memory_space<vmem>>) attributes {dimension_semantics = [#tpu.dimension_semantics<parallel>, #tpu.dimension_semantics<parallel>, #tpu.dimension_semantics<arbitrary>], iteration_bounds = array<i64: 1, 1, 1>, scalar_prefetch = 0 : i64, scratch_operands = 1 : i64, tpu.core_type = #tpu.core_type<tc>, window_params = [{transform_indices = @transform_0, window_bounds = array<i64: 16, 128>}, {transform_indices = @transform_1, window_bounds = array<i64: 128, 256>}, {transform_indices = @transform_2, window_bounds = array<i64: 1, 256>}, {transform_indices = @transform_3, window_bounds = array<i64: 16, 256>}]} {
    %c0_i32 = arith.constant 0 : i32
    %0 = arith.cmpi eq, %arg2, %c0_i32 : i32
    %1 = arith.extui %0 : i1 to i32
    %c0_i32_0 = arith.constant 0 : i32
    %2 = arith.cmpi ne, %1, %c0_i32_0 : i32
    scf.if %2 {
      %cst_10 = arith.constant 0.000000e+00 : f32
      %12 = vector.broadcast %cst_10 : f32 to vector<16x256xf32>
      %c0_11 = arith.constant 0 : index
      %c0_12 = arith.constant 0 : index
      %13 = vector.load %arg7[%c0_11, %c0_12] : memref<16x256xf32, #tpu.memory_space<vmem>>, vector<16x256xf32>
      tpu.vector_store %arg7[%c0_11, %c0_12], %12 {strides = array<i32>} : memref<16x256xf32, #tpu.memory_space<vmem>>, vector<16x256xf32>,
    } else {
    }
    %c0 = arith.constant 0 : index
    %c0_1 = arith.constant 0 : index
    %3 = vector.load %arg7[%c0, %c0_1] : memref<16x256xf32, #tpu.memory_space<vmem>>, vector<16x256xf32>
    %c0_2 = arith.constant 0 : index
    %c0_3 = arith.constant 0 : index
    %4 = vector.load %arg3[%c0_2, %c0_3] : memref<16x128xbf16, #tpu.memory_space<vmem>>, vector<16x128xbf16>
    %c0_4 = arith.constant 0 : index
    %c0_5 = arith.constant 0 : index
    %5 = vector.load %arg4[%c0_4, %c0_5] : memref<128x256xbf16, #tpu.memory_space<vmem>>, vector<128x256xbf16>
    %cst = arith.constant dense<0.000000e+00> : vector<16x256xf32>
    %6 = tpu.matmul %4, %5, %cst {dimension_numbers = #tpu.dot_dimension_numbers<[1], [0], [0], [1], [0, 0, 1, 1], [], []>} : vector<16x128xbf16>, vector<128x256xbf16>, vector<16x256xf32> -> vector<16x256xf32>
    %7 = arith.addf %3, %6 : vector<16x256xf32>
    %c0_6 = arith.constant 0 : index
    %c0_7 = arith.constant 0 : index
    %8 = vector.load %arg7[%c0_6, %c0_7] : memref<16x256xf32, #tpu.memory_space<vmem>>, vector<16x256xf32>
    tpu.vector_store %arg7[%c0_6, %c0_7], %7 {strides = array<i32>} : memref<16x256xf32, #tpu.memory_space<vmem>>, vector<16x256xf32>,
    %c0_i32_8 = arith.constant 0 : i32
    %9 = arith.cmpi eq, %arg2, %c0_i32_8 : i32
    %10 = arith.extui %9 : i1 to i32
    %c0_i32_9 = arith.constant 0 : i32
    %11 = arith.cmpi ne, %10, %c0_i32_9 : i32
    scf.if %11 {
      %c0_10 = arith.constant 0 : index
      %c0_11 = arith.constant 0 : index
      %12 = vector.load %arg7[%c0_10, %c0_11] : memref<16x256xf32, #tpu.memory_space<vmem>>, vector<16x256xf32>
      %c0_12 = arith.constant 0 : index
      %c0_13 = arith.constant 0 : index
      %13 = vector.load %arg5[%c0_12, %c0_13] : memref<1x256xf32, #tpu.memory_space<vmem>>, vector<1x256xf32>
      %14 = vector.broadcast %13 : vector<1x256xf32> to vector<16x256xf32>
      %15 = arith.addf %12, %14 : vector<16x256xf32>
      %16 = arith.mulf %15, %15 : vector<16x256xf32>
      %17 = arith.mulf %15, %16 : vector<16x256xf32>
      %cst_14 = arith.constant 4.471500e-02 : f32
      %18 = vector.broadcast %cst_14 : f32 to vector<16x256xf32>
      %19 = arith.mulf %18, %17 : vector<16x256xf32>
      %20 = arith.addf %15, %19 : vector<16x256xf32>
      %cst_15 = arith.constant 0.797884583 : f32
      %21 = vector.broadcast %cst_15 : f32 to vector<16x256xf32>
      %22 = arith.mulf %21, %20 : vector<16x256xf32>
      %23 = math.tanh %22 : vector<16x256xf32>
      %cst_16 = arith.constant 1.000000e+00 : f32
      %24 = vector.broadcast %cst_16 : f32 to vector<16x256xf32>
      %25 = arith.addf %24, %23 : vector<16x256xf32>
      %cst_17 = arith.constant 5.000000e-01 : f32
      %26 = vector.broadcast %cst_17 : f32 to vector<16x256xf32>
      %27 = arith.mulf %26, %25 : vector<16x256xf32>
      %28 = arith.mulf %15, %27 : vector<16x256xf32>
      %29 = arith.truncf %28 : vector<16x256xf32> to vector<16x256xbf16>
      %c0_18 = arith.constant 0 : index
      %c0_19 = arith.constant 0 : index
      %30 = vector.load %arg6[%c0_18, %c0_19] : memref<16x256xbf16, #tpu.memory_space<vmem>>, vector<16x256xbf16>
      tpu.vector_store %arg6[%c0_18, %c0_19], %29 {strides = array<i32>} : memref<16x256xbf16, #tpu.memory_space<vmem>>, vector<16x256xbf16>,
    } else {
    }
    return
  }
  func.func @transform_0(%arg0: i32, %arg1: i32, %arg2: i32) -> (i32, i32) {
    %c0_i32 = arith.constant 0 : i32
    return %arg0, %arg2 : i32, i32
  }
  func.func @transform_1(%arg0: i32, %arg1: i32, %arg2: i32) -> (i32, i32) {
    %c0_i32 = arith.constant 0 : i32
    return %arg2, %arg1 : i32, i32
  }
  func.func @transform_2(%arg0: i32, %arg1: i32, %arg2: i32) -> (i32, i32) {
    %c0_i32 = arith.constant 0 : i32
    %c0_i32_0 = arith.constant 0 : i32
    return %c0_i32, %arg1 : i32, i32
  }
  func.func @transform_3(%arg0: i32, %arg1: i32, %arg2: i32) -> (i32, i32) {
    %c0_i32 = arith.constant 0 : i32
    return %arg0, %arg1 : i32, i32
  }
}

module attributes {stable_mosaic.version = 11 : i64} {
  func.func @_linear_kernel(%arg0: i32, %arg1: i32, %arg2: i32, %arg3: memref<16x256xbf16, #tpu.memory_space<vmem>>, %arg4: memref<256x128xbf16, #tpu.memory_space<vmem>>, %arg5: memref<1x128xf32, #tpu.memory_space<vmem>>, %arg6: memref<16x128xbf16, #tpu.memory_space<vmem>>, %arg7: memref<1x128xf32, #tpu.memory_space<vmem>>, %arg8: memref<1x128xf32, #tpu.memory_space<vmem>>, %arg9: memref<16x128xbf16, #tpu.memory_space<vmem>>, %arg10: memref<16x128xf32, #tpu.memory_space<vmem>>) attributes {dimension_semantics = [#tpu.dimension_semantics<parallel>, #tpu.dimension_semantics<parallel>, #tpu.dimension_semantics<arbitrary>], iteration_bounds = array<i64: 1, 1, 1>, scalar_prefetch = 0 : i64, scratch_operands = 1 : i64, tpu.core_type = #tpu.core_type<tc>, window_params = [{transform_indices = @transform_0, window_bounds = array<i64: 16, 256>}, {transform_indices = @transform_1, window_bounds = array<i64: 256, 128>}, {transform_indices = @transform_2, window_bounds = array<i64: 1, 128>}, {transform_indices = @transform_3, window_bounds = array<i64: 16, 128>}, {transform_indices = @transform_4, window_bounds = array<i64: 1, 128>}, {transform_indices = @transform_5, window_bounds = array<i64: 1, 128>}, {transform_indices = @transform_6, window_bounds = array<i64: 16, 128>}]} {
    %c0_i32 = arith.constant 0 : i32
    %0 = arith.cmpi eq, %arg2, %c0_i32 : i32
    %1 = arith.extui %0 : i1 to i32
    %c0_i32_0 = arith.constant 0 : i32
    %2 = arith.cmpi ne, %1, %c0_i32_0 : i32
    scf.if %2 {
      %cst_10 = arith.constant 0.000000e+00 : f32
      %12 = vector.broadcast %cst_10 : f32 to vector<16x128xf32>
      %c0_11 = arith.constant 0 : index
      %c0_12 = arith.constant 0 : index
      %13 = vector.load %arg10[%c0_11, %c0_12] : memref<16x128xf32, #tpu.memory_space<vmem>>, vector<16x128xf32>
      tpu.vector_store %arg10[%c0_11, %c0_12], %12 {strides = array<i32>} : memref<16x128xf32, #tpu.memory_space<vmem>>, vector<16x128xf32>,
    } else {
    }
    %c0 = arith.constant 0 : index
    %c0_1 = arith.constant 0 : index
    %3 = vector.load %arg10[%c0, %c0_1] : memref<16x128xf32, #tpu.memory_space<vmem>>, vector<16x128xf32>
    %c0_2 = arith.constant 0 : index
    %c0_3 = arith.constant 0 : index
    %4 = vector.load %arg3[%c0_2, %c0_3] : memref<16x256xbf16, #tpu.memory_space<vmem>>, vector<16x256xbf16>
    %c0_4 = arith.constant 0 : index
    %c0_5 = arith.constant 0 : index
    %5 = vector.load %arg4[%c0_4, %c0_5] : memref<256x128xbf16, #tpu.memory_space<vmem>>, vector<256x128xbf16>
    %cst = arith.constant dense<0.000000e+00> : vector<16x128xf32>
    %6 = tpu.matmul %4, %5, %cst {dimension_numbers = #tpu.dot_dimension_numbers<[1], [0], [0], [1], [0, 0, 1, 1], [], []>} : vector<16x256xbf16>, vector<256x128xbf16>, vector<16x128xf32> -> vector<16x128xf32>
    %7 = arith.addf %3, %6 : vector<16x128xf32>
    %c0_6 = arith.constant 0 : index
    %c0_7 = arith.constant 0 : index
    %8 = vector.load %arg10[%c0_6, %c0_7] : memref<16x128xf32, #tpu.memory_space<vmem>>, vector<16x128xf32>
    tpu.vector_store %arg10[%c0_6, %c0_7], %7 {strides = array<i32>} : memref<16x128xf32, #tpu.memory_space<vmem>>, vector<16x128xf32>,
    %c0_i32_8 = arith.constant 0 : i32
    %9 = arith.cmpi eq, %arg2, %c0_i32_8 : i32
    %10 = arith.extui %9 : i1 to i32
    %c0_i32_9 = arith.constant 0 : i32
    %11 = arith.cmpi ne, %10, %c0_i32_9 : i32
    scf.if %11 {
      %c0_10 = arith.constant 0 : index
      %c0_11 = arith.constant 0 : index
      %12 = vector.load %arg10[%c0_10, %c0_11] : memref<16x128xf32, #tpu.memory_space<vmem>>, vector<16x128xf32>
      %c0_12 = arith.constant 0 : index
      %c0_13 = arith.constant 0 : index
      %13 = vector.load %arg5[%c0_12, %c0_13] : memref<1x128xf32, #tpu.memory_space<vmem>>, vector<1x128xf32>
      %14 = vector.broadcast %13 : vector<1x128xf32> to vector<16x128xf32>
      %15 = arith.addf %12, %14 : vector<16x128xf32>
      %c0_14 = arith.constant 0 : index
      %c0_15 = arith.constant 0 : index
      %16 = vector.load %arg6[%c0_14, %c0_15] : memref<16x128xbf16, #tpu.memory_space<vmem>>, vector<16x128xbf16>
      %17 = arith.extf %16 : vector<16x128xbf16> to vector<16x128xf32>
      %18 = arith.addf %15, %17 : vector<16x128xf32>
      %c0_16 = arith.constant 0 : index
      %c0_17 = arith.constant 0 : index
      %19 = vector.load %arg7[%c0_16, %c0_17] : memref<1x128xf32, #tpu.memory_space<vmem>>, vector<1x128xf32>
      %c0_18 = arith.constant 0 : index
      %c0_19 = arith.constant 0 : index
      %20 = vector.load %arg8[%c0_18, %c0_19] : memref<1x128xf32, #tpu.memory_space<vmem>>, vector<1x128xf32>
      %cst_20 = arith.constant dense<0.000000e+00> : vector<16xf32>
      %21 = vector.multi_reduction <add>, %18, %cst_20 [1] : vector<16x128xf32> to vector<16xf32>
      %22 = vector.shape_cast %21 : vector<16xf32> to vector<16x1xf32>
      %cst_21 = arith.constant 1.280000e+02 : f32
      %23 = vector.broadcast %cst_21 : f32 to vector<16x1xf32>
      %24 = arith.divf %22, %23 : vector<16x1xf32>
      %25 = vector.broadcast %24 : vector<16x1xf32> to vector<16x128xf32>
      %26 = arith.subf %18, %25 : vector<16x128xf32>
      %27 = arith.mulf %26, %26 : vector<16x128xf32>
      %cst_22 = arith.constant dense<0.000000e+00> : vector<16xf32>
      %28 = vector.multi_reduction <add>, %27, %cst_22 [1] : vector<16x128xf32> to vector<16xf32>
      %29 = vector.shape_cast %28 : vector<16xf32> to vector<16x1xf32>
      %cst_23 = arith.constant 1.280000e+02 : f32
      %30 = vector.broadcast %cst_23 : f32 to vector<16x1xf32>
      %31 = arith.divf %29, %30 : vector<16x1xf32>
      %32 = vector.broadcast %24 : vector<16x1xf32> to vector<16x128xf32>
      %33 = arith.subf %18, %32 : vector<16x128xf32>
      %cst_24 = arith.constant 9.99999974E-6 : f32
      %34 = vector.broadcast %cst_24 : f32 to vector<16x1xf32>
      %35 = arith.addf %31, %34 : vector<16x1xf32>
      %36 = math.rsqrt %35 : vector<16x1xf32>
      %37 = vector.broadcast %36 : vector<16x1xf32> to vector<16x128xf32>
      %38 = arith.mulf %33, %37 : vector<16x128xf32>
      %39 = vector.broadcast %19 : vector<1x128xf32> to vector<16x128xf32>
      %40 = arith.mulf %38, %39 : vector<16x128xf32>
      %41 = vector.broadcast %20 : vector<1x128xf32> to vector<16x128xf32>
      %42 = arith.addf %40, %41 : vector<16x128xf32>
      %43 = arith.truncf %42 : vector<16x128xf32> to vector<16x128xbf16>
      %c0_25 = arith.constant 0 : index
      %c0_26 = arith.constant 0 : index
      %44 = vector.load %arg9[%c0_25, %c0_26] : memref<16x128xbf16, #tpu.memory_space<vmem>>, vector<16x128xbf16>
      tpu.vector_store %arg9[%c0_25, %c0_26], %43 {strides = array<i32>} : memref<16x128xbf16, #tpu.memory_space<vmem>>, vector<16x128xbf16>,
    } else {
    }
    return
  }
  func.func @transform_0(%arg0: i32, %arg1: i32, %arg2: i32) -> (i32, i32) {
    %c0_i32 = arith.constant 0 : i32
    return %arg0, %arg2 : i32, i32
  }
  func.func @transform_1(%arg0: i32, %arg1: i32, %arg2: i32) -> (i32, i32) {
    %c0_i32 = arith.constant 0 : i32
    return %arg2, %arg1 : i32, i32
  }
  func.func @transform_2(%arg0: i32, %arg1: i32, %arg2: i32) -> (i32, i32) {
    %c0_i32 = arith.constant 0 : i32
    %c0_i32_0 = arith.constant 0 : i32
    return %c0_i32, %arg1 : i32, i32
  }
  func.func @transform_3(%arg0: i32, %arg1: i32, %arg2: i32) -> (i32, i32) {
    %c0_i32 = arith.constant 0 : i32
    return %arg0, %arg1 : i32, i32
  }
  func.func @transform_4(%arg0: i32, %arg1: i32, %arg2: i32) -> (i32, i32) {
    %c0_i32 = arith.constant 0 : i32
    %c0_i32_0 = arith.constant 0 : i32
    return %c0_i32, %arg1 : i32, i32
  }
  func.func @transform_5(%arg0: i32, %arg1: i32, %arg2: i32) -> (i32, i32) {
    %c0_i32 = arith.constant 0 : i32
    %c0_i32_0 = arith.constant 0 : i32
    return %c0_i32, %arg1 : i32, i32
  }
  func.func @transform_6(%arg0: i32, %arg1: i32, %arg2: i32) -> (i32, i32) {
    %c0_i32 = arith.constant 0 : i32
    return %arg0, %arg1 : i32, i32
  }
}

module attributes {stable_mosaic.version = 11 : i64} {
  func.func @_linear_kernel(%arg0: i32, %arg1: i32, %arg2: i32, %arg3: memref<16x128xbf16, #tpu.memory_space<vmem>>, %arg4: memref<128x256xbf16, #tpu.memory_space<vmem>>, %arg5: memref<1x256xf32, #tpu.memory_space<vmem>>, %arg6: memref<16x256xbf16, #tpu.memory_space<vmem>>, %arg7: memref<16x256xf32, #tpu.memory_space<vmem>>) attributes {dimension_semantics = [#tpu.dimension_semantics<parallel>, #tpu.dimension_semantics<parallel>, #tpu.dimension_semantics<arbitrary>], iteration_bounds = array<i64: 1, 1, 1>, scalar_prefetch = 0 : i64, scratch_operands = 1 : i64, tpu.core_type = #tpu.core_type<tc>, window_params = [{transform_indices = @transform_0, window_bounds = array<i64: 16, 128>}, {transform_indices = @transform_1, window_bounds = array<i64: 128, 256>}, {transform_indices = @transform_2, window_bounds = array<i64: 1, 256>}, {transform_indices = @transform_3, window_bounds = array<i64: 16, 256>}]} {
    %c0_i32 = arith.constant 0 : i32
    %0 = arith.cmpi eq, %arg2, %c0_i32 : i32
    %1 = arith.extui %0 : i1 to i32
    %c0_i32_0 = arith.constant 0 : i32
    %2 = arith.cmpi ne, %1, %c0_i32_0 : i32
    scf.if %2 {
      %cst_10 = arith.constant 0.000000e+00 : f32
      %12 = vector.broadcast %cst_10 : f32 to vector<16x256xf32>
      %c0_11 = arith.constant 0 : index
      %c0_12 = arith.constant 0 : index
      %13 = vector.load %arg7[%c0_11, %c0_12] : memref<16x256xf32, #tpu.memory_space<vmem>>, vector<16x256xf32>
      tpu.vector_store %arg7[%c0_11, %c0_12], %12 {strides = array<i32>} : memref<16x256xf32, #tpu.memory_space<vmem>>, vector<16x256xf32>,
    } else {
    }
    %c0 = arith.constant 0 : index
    %c0_1 = arith.constant 0 : index
    %3 = vector.load %arg7[%c0, %c0_1] : memref<16x256xf32, #tpu.memory_space<vmem>>, vector<16x256xf32>
    %c0_2 = arith.constant 0 : index
    %c0_3 = arith.constant 0 : index
    %4 = vector.load %arg3[%c0_2, %c0_3] : memref<16x128xbf16, #tpu.memory_space<vmem>>, vector<16x128xbf16>
    %c0_4 = arith.constant 0 : index
    %c0_5 = arith.constant 0 : index
    %5 = vector.load %arg4[%c0_4, %c0_5] : memref<128x256xbf16, #tpu.memory_space<vmem>>, vector<128x256xbf16>
    %cst = arith.constant dense<0.000000e+00> : vector<16x256xf32>
    %6 = tpu.matmul %4, %5, %cst {dimension_numbers = #tpu.dot_dimension_numbers<[1], [0], [0], [1], [0, 0, 1, 1], [], []>} : vector<16x128xbf16>, vector<128x256xbf16>, vector<16x256xf32> -> vector<16x256xf32>
    %7 = arith.addf %3, %6 : vector<16x256xf32>
    %c0_6 = arith.constant 0 : index
    %c0_7 = arith.constant 0 : index
    %8 = vector.load %arg7[%c0_6, %c0_7] : memref<16x256xf32, #tpu.memory_space<vmem>>, vector<16x256xf32>
    tpu.vector_store %arg7[%c0_6, %c0_7], %7 {strides = array<i32>} : memref<16x256xf32, #tpu.memory_space<vmem>>, vector<16x256xf32>,
    %c0_i32_8 = arith.constant 0 : i32
    %9 = arith.cmpi eq, %arg2, %c0_i32_8 : i32
    %10 = arith.extui %9 : i1 to i32
    %c0_i32_9 = arith.constant 0 : i32
    %11 = arith.cmpi ne, %10, %c0_i32_9 : i32
    scf.if %11 {
      %c0_10 = arith.constant 0 : index
      %c0_11 = arith.constant 0 : index
      %12 = vector.load %arg7[%c0_10, %c0_11] : memref<16x256xf32, #tpu.memory_space<vmem>>, vector<16x256xf32>
      %c0_12 = arith.constant 0 : index
      %c0_13 = arith.constant 0 : index
      %13 = vector.load %arg5[%c0_12, %c0_13] : memref<1x256xf32, #tpu.memory_space<vmem>>, vector<1x256xf32>
      %14 = vector.broadcast %13 : vector<1x256xf32> to vector<16x256xf32>
      %15 = arith.addf %12, %14 : vector<16x256xf32>
      %16 = arith.truncf %15 : vector<16x256xf32> to vector<16x256xbf16>
      %c0_14 = arith.constant 0 : index
      %c0_15 = arith.constant 0 : index
      %17 = vector.load %arg6[%c0_14, %c0_15] : memref<16x256xbf16, #tpu.memory_space<vmem>>, vector<16x256xbf16>
      tpu.vector_store %arg6[%c0_14, %c0_15], %16 {strides = array<i32>} : memref<16x256xbf16, #tpu.memory_space<vmem>>, vector<16x256xbf16>,
    } else {
    }
    return
  }
  func.func @transform_0(%arg0: i32, %arg1: i32, %arg2: i32) -> (i32, i32) {
    %c0_i32 = arith.constant 0 : i32
    return %arg0, %arg2 : i32, i32
  }
  func.func @transform_1(%arg0: i32, %arg1: i32, %arg2: i32) -> (i32, i32) {
    %c0_i32 = arith.constant 0 : i32
    return %arg2, %arg1 : i32, i32
  }
  func.func @transform_2(%arg0: i32, %arg1: i32, %arg2: i32) -> (i32, i32) {
    %c0_i32 = arith.constant 0 : i32
    %c0_i32_0 = arith.constant 0 : i32
    return %c0_i32, %arg1 : i32, i32
  }
  func.func @transform_3(%arg0: i32, %arg1: i32, %arg2: i32) -> (i32, i32) {
    %c0_i32 = arith.constant 0 : i32
    return %arg0, %arg1 : i32, i32
  }
}

module attributes {stable_mosaic.version = 11 : i64} {
  func.func @_attention_kernel(%arg0: i32, %arg1: i32, %arg2: memref<1x8x128xbf16, #tpu.memory_space<vmem>>, %arg3: memref<1x8x128xbf16, #tpu.memory_space<vmem>>, %arg4: memref<1x8x128xbf16, #tpu.memory_space<vmem>>, %arg5: memref<1x1x8xi32, #tpu.memory_space<vmem>>, %arg6: memref<128x128xbf16, #tpu.memory_space<vmem>>, %arg7: memref<1x128xf32, #tpu.memory_space<vmem>>, %arg8: memref<1x8x128xf32, #tpu.memory_space<vmem>>, %arg9: memref<1x128xf32, #tpu.memory_space<vmem>>, %arg10: memref<1x128xf32, #tpu.memory_space<vmem>>, %arg11: memref<1x8x128xbf16, #tpu.memory_space<vmem>>) attributes {dimension_semantics = [#tpu.dimension_semantics<parallel>, #tpu.dimension_semantics<parallel>], iteration_bounds = array<i64: 2, 1>, scalar_prefetch = 0 : i64, scratch_operands = 0 : i64, tpu.core_type = #tpu.core_type<tc>, window_params = [{transform_indices = @transform_0, window_bounds = array<i64: 1, 8, 128>}, {transform_indices = @transform_1, window_bounds = array<i64: 1, 8, 128>}, {transform_indices = @transform_2, window_bounds = array<i64: 1, 8, 128>}, {transform_indices = @transform_3, window_bounds = array<i64: 1, 1, 8>}, {pipeline_mode = #tpu.pipeline_mode<synchronous>, transform_indices = @transform_4, window_bounds = array<i64: 128, 128>}, {pipeline_mode = #tpu.pipeline_mode<synchronous>, transform_indices = @transform_5, window_bounds = array<i64: 1, 128>}, {transform_indices = @transform_6, window_bounds = array<i64: 1, 8, 128>}, {pipeline_mode = #tpu.pipeline_mode<synchronous>, transform_indices = @transform_7, window_bounds = array<i64: 1, 128>}, {pipeline_mode = #tpu.pipeline_mode<synchronous>, transform_indices = @transform_8, window_bounds = array<i64: 1, 128>}, {transform_indices = @transform_9, window_bounds = array<i64: 1, 8, 128>}]} {
    %c0 = arith.constant 0 : index
    %c0_0 = arith.constant 0 : index
    %c0_1 = arith.constant 0 : index
    %0 = vector.load %arg2[%c0, %c0_0, %c0_1] : memref<1x8x128xbf16, #tpu.memory_space<vmem>>, vector<1x8x128xbf16>
    %1 = vector.shape_cast %0 : vector<1x8x128xbf16> to vector<8x128xbf16>
    %c0_2 = arith.constant 0 : index
    %c0_3 = arith.constant 0 : index
    %c0_4 = arith.constant 0 : index
    %2 = vector.load %arg3[%c0_2, %c0_3, %c0_4] : memref<1x8x128xbf16, #tpu.memory_space<vmem>>, vector<1x8x128xbf16>
    %3 = vector.shape_cast %2 : vector<1x8x128xbf16> to vector<8x128xbf16>
    %c0_5 = arith.constant 0 : index
    %c0_6 = arith.constant 0 : index
    %c0_7 = arith.constant 0 : index
    %4 = vector.load %arg4[%c0_5, %c0_6, %c0_7] : memref<1x8x128xbf16, #tpu.memory_space<vmem>>, vector<1x8x128xbf16>
    %5 = vector.shape_cast %4 : vector<1x8x128xbf16> to vector<8x128xbf16>
    %cst = arith.constant dense<0.000000e+00> : vector<8x8xf32>
    %6 = tpu.matmul %1, %3, %cst {dimension_numbers = #tpu.dot_dimension_numbers<[1], [1], [0], [0], [0, 0, 1, 0], [], []>} : vector<8x128xbf16>, vector<8x128xbf16>, vector<8x8xf32> -> vector<8x8xf32>
    %cst_8 = arith.constant 0.0883883461 : f32
    %7 = vector.broadcast %cst_8 : f32 to vector<8x8xf32>
    %8 = arith.mulf %6, %7 : vector<8x8xf32>
    %c0_9 = arith.constant 0 : index
    %c0_10 = arith.constant 0 : index
    %c0_11 = arith.constant 0 : index
    %9 = vector.load %arg5[%c0_9, %c0_10, %c0_11] : memref<1x1x8xi32, #tpu.memory_space<vmem>>, vector<1x1x8xi32>
    %10 = vector.shape_cast %9 : vector<1x1x8xi32> to vector<1x8xi32>
    %c0_i32 = arith.constant 0 : i32
    %11 = vector.broadcast %c0_i32 : i32 to vector<1x8xi32>
    %12 = arith.cmpi ne, %10, %11 : vector<1x8xi32>
    %13 = tpu.iota {dimensions = array<i32: 0>} : vector<8x8xi32>
    %c8_i32 = arith.constant 8 : i32
    %14 = arith.muli %arg1, %c8_i32 : i32
    %15 = vector.broadcast %14 : i32 to vector<8x8xi32>
    %16 = arith.addi %13, %15 : vector<8x8xi32>
    %17 = tpu.iota {dimensions = array<i32: 1>} : vector<8x8xi32>
    %18 = arith.cmpi sge, %16, %17 : vector<8x8xi32>
    %19 = vector.broadcast %12 : vector<1x8xi1> to vector<8x8xi1>
    %20 = arith.andi %19, %18 : vector<8x8xi1>
    %cst_12 = arith.constant -1.000000e+09 : f32
    %21 = vector.broadcast %cst_12 : f32 to vector<8x8xf32>
    %22 = arith.select %20, %8, %21 : vector<8x8xi1>, vector<8x8xf32>
    %cst_13 = arith.constant dense<0xFF800000> : vector<8xf32>
    %23 = vector.multi_reduction <maximumf>, %22, %cst_13 [1] : vector<8x8xf32> to vector<8xf32>
    %24 = vector.shape_cast %23 : vector<8xf32> to vector<8x1xf32>
    %25 = vector.broadcast %24 : vector<8x1xf32> to vector<8x8xf32>
    %26 = arith.subf %22, %25 : vector<8x8xf32>
    %27 = math.exp %26 : vector<8x8xf32>
    %cst_14 = arith.constant dense<0.000000e+00> : vector<8xf32>
    %28 = vector.multi_reduction <add>, %27, %cst_14 [1] : vector<8x8xf32> to vector<8xf32>
    %29 = vector.shape_cast %28 : vector<8xf32> to vector<8x1xf32>
    %30 = arith.truncf %27 : vector<8x8xf32> to vector<8x8xbf16>
    %cst_15 = arith.constant dense<0.000000e+00> : vector<8x128xf32>
    %31 = tpu.matmul %30, %5, %cst_15 {dimension_numbers = #tpu.dot_dimension_numbers<[1], [0], [0], [1], [0, 0, 1, 1], [], []>} : vector<8x8xbf16>, vector<8x128xbf16>, vector<8x128xf32> -> vector<8x128xf32>
    %32 = tpu.reciprocal %29 {approx = true} : vector<8x1xf32> -> vector<8x1xf32>
    %33 = vector.broadcast %32 : vector<8x1xf32> to vector<8x128xf32>
    %34 = arith.mulf %31, %33 : vector<8x128xf32>
    %35 = arith.truncf %34 : vector<8x128xf32> to vector<8x128xbf16>
    %c0_16 = arith.constant 0 : index
    %c0_17 = arith.constant 0 : index
    %36 = vector.load %arg6[%c0_16, %c0_17] : memref<128x128xbf16, #tpu.memory_space<vmem>>, vector<128x128xbf16>
    %cst_18 = arith.constant dense<0.000000e+00> : vector<8x128xf32>
    %37 = tpu.matmul %35, %36, %cst_18 {dimension_numbers = #tpu.dot_dimension_numbers<[1], [0], [0], [1], [0, 0, 1, 1], [], []>} : vector<8x128xbf16>, vector<128x128xbf16>, vector<8x128xf32> -> vector<8x128xf32>
    %c0_19 = arith.constant 0 : index
    %c0_20 = arith.constant 0 : index
    %38 = vector.load %arg7[%c0_19, %c0_20] : memref<1x128xf32, #tpu.memory_space<vmem>>, vector<1x128xf32>
    %39 = vector.broadcast %38 : vector<1x128xf32> to vector<8x128xf32>
    %40 = arith.addf %37, %39 : vector<8x128xf32>
    %c0_21 = arith.constant 0 : index
    %c0_22 = arith.constant 0 : index
    %c0_23 = arith.constant 0 : index
    %41 = vector.load %arg8[%c0_21, %c0_22, %c0_23] : memref<1x8x128xf32, #tpu.memory_space<vmem>>, vector<1x8x128xf32>
    %42 = vector.shape_cast %41 : vector<1x8x128xf32> to vector<8x128xf32>
    %43 = arith.addf %40, %42 : vector<8x128xf32>
    %cst_24 = arith.constant dense<0.000000e+00> : vector<8xf32>
    %44 = vector.multi_reduction <add>, %43, %cst_24 [1] : vector<8x128xf32> to vector<8xf32>
    %45 = vector.shape_cast %44 : vector<8xf32> to vector<8x1xf32>
    %cst_25 = arith.constant 1.280000e+02 : f32
    %46 = vector.broadcast %cst_25 : f32 to vector<8x1xf32>
    %47 = arith.divf %45, %46 : vector<8x1xf32>
    %48 = vector.broadcast %47 : vector<8x1xf32> to vector<8x128xf32>
    %49 = arith.subf %43, %48 : vector<8x128xf32>
    %50 = arith.mulf %49, %49 : vector<8x128xf32>
    %cst_26 = arith.constant dense<0.000000e+00> : vector<8xf32>
    %51 = vector.multi_reduction <add>, %50, %cst_26 [1] : vector<8x128xf32> to vector<8xf32>
    %52 = vector.shape_cast %51 : vector<8xf32> to vector<8x1xf32>
    %cst_27 = arith.constant 1.280000e+02 : f32
    %53 = vector.broadcast %cst_27 : f32 to vector<8x1xf32>
    %54 = arith.divf %52, %53 : vector<8x1xf32>
    %55 = vector.broadcast %47 : vector<8x1xf32> to vector<8x128xf32>
    %56 = arith.subf %43, %55 : vector<8x128xf32>
    %cst_28 = arith.constant 9.99999974E-6 : f32
    %57 = vector.broadcast %cst_28 : f32 to vector<8x1xf32>
    %58 = arith.addf %54, %57 : vector<8x1xf32>
    %59 = math.rsqrt %58 : vector<8x1xf32>
    %60 = vector.broadcast %59 : vector<8x1xf32> to vector<8x128xf32>
    %61 = arith.mulf %56, %60 : vector<8x128xf32>
    %c0_29 = arith.constant 0 : index
    %c0_30 = arith.constant 0 : index
    %62 = vector.load %arg9[%c0_29, %c0_30] : memref<1x128xf32, #tpu.memory_space<vmem>>, vector<1x128xf32>
    %63 = vector.broadcast %62 : vector<1x128xf32> to vector<8x128xf32>
    %64 = arith.mulf %61, %63 : vector<8x128xf32>
    %c0_31 = arith.constant 0 : index
    %c0_32 = arith.constant 0 : index
    %65 = vector.load %arg10[%c0_31, %c0_32] : memref<1x128xf32, #tpu.memory_space<vmem>>, vector<1x128xf32>
    %66 = vector.broadcast %65 : vector<1x128xf32> to vector<8x128xf32>
    %67 = arith.addf %64, %66 : vector<8x128xf32>
    %68 = arith.truncf %67 : vector<8x128xf32> to vector<8x128xbf16>
    %c0_33 = arith.constant 0 : index
    %c0_34 = arith.constant 0 : index
    %c0_35 = arith.constant 0 : index
    %69 = vector.load %arg11[%c0_33, %c0_34, %c0_35] : memref<1x8x128xbf16, #tpu.memory_space<vmem>>, vector<1x8x128xbf16>
    %70 = vector.shape_cast %69 : vector<1x8x128xbf16> to vector<8x128xbf16>
    %71 = vector.shape_cast %68 : vector<8x128xbf16> to vector<1x8x128xbf16>
    tpu.vector_store %arg11[%c0_33, %c0_34, %c0_35], %71 {strides = array<i32>} : memref<1x8x128xbf16, #tpu.memory_space<vmem>>, vector<1x8x128xbf16>,
    return
  }
  func.func @transform_0(%arg0: i32, %arg1: i32) -> (i32, i32, i32) {
    %c0_i32 = arith.constant 0 : i32
    %c0_i32_0 = arith.constant 0 : i32
    return %arg0, %arg1, %c0_i32 : i32, i32, i32
  }
  func.func @transform_1(%arg0: i32, %arg1: i32) -> (i32, i32, i32) {
    %c0_i32 = arith.constant 0 : i32
    %c1_i32 = arith.constant 1 : i32
    %c0_i32_0 = arith.constant 0 : i32
    return %arg0, %c0_i32, %c1_i32 : i32, i32, i32
  }
  func.func @transform_2(%arg0: i32, %arg1: i32) -> (i32, i32, i32) {
    %c0_i32 = arith.constant 0 : i32
    %c2_i32 = arith.constant 2 : i32
    %c0_i32_0 = arith.constant 0 : i32
    return %arg0, %c0_i32, %c2_i32 : i32, i32, i32
  }
  func.func @transform_3(%arg0: i32, %arg1: i32) -> (i32, i32, i32) {
    %c0_i32 = arith.constant 0 : i32
    %c0_i32_0 = arith.constant 0 : i32
    %c0_i32_1 = arith.constant 0 : i32
    return %arg0, %c0_i32, %c0_i32_0 : i32, i32, i32
  }
  func.func @transform_4(%arg0: i32, %arg1: i32) -> (i32, i32) {
    %c0_i32 = arith.constant 0 : i32
    %c0_i32_0 = arith.constant 0 : i32
    %c0_i32_1 = arith.constant 0 : i32
    return %c0_i32, %c0_i32_0 : i32, i32
  }
  func.func @transform_5(%arg0: i32, %arg1: i32) -> (i32, i32) {
    %c0_i32 = arith.constant 0 : i32
    %c0_i32_0 = arith.constant 0 : i32
    %c0_i32_1 = arith.constant 0 : i32
    return %c0_i32, %c0_i32_0 : i32, i32
  }
  func.func @transform_6(%arg0: i32, %arg1: i32) -> (i32, i32, i32) {
    %c0_i32 = arith.constant 0 : i32
    %c0_i32_0 = arith.constant 0 : i32
    return %arg0, %arg1, %c0_i32 : i32, i32, i32
  }
  func.func @transform_7(%arg0: i32, %arg1: i32) -> (i32, i32) {
    %c0_i32 = arith.constant 0 : i32
    %c0_i32_0 = arith.constant 0 : i32
    %c0_i32_1 = arith.constant 0 : i32
    return %c0_i32, %c0_i32_0 : i32, i32
  }
  func.func @transform_8(%arg0: i32, %arg1: i32) -> (i32, i32) {
    %c0_i32 = arith.constant 0 : i32
    %c0_i32_0 = arith.constant 0 : i32
    %c0_i32_1 = arith.constant 0 : i32
    return %c0_i32, %c0_i32_0 : i32, i32
  }
  func.func @transform_9(%arg0: i32, %arg1: i32) -> (i32, i32, i32) {
    %c0_i32 = arith.constant 0 : i32
    %c0_i32_0 = arith.constant 0 : i32
    return %arg0, %arg1, %c0_i32 : i32, i32, i32
  }
}

module attributes {stable_mosaic.version = 11 : i64} {
  func.func @_linear_kernel(%arg0: i32, %arg1: i32, %arg2: i32, %arg3: memref<16x128xbf16, #tpu.memory_space<vmem>>, %arg4: memref<128x128xbf16, #tpu.memory_space<vmem>>, %arg5: memref<1x128xf32, #tpu.memory_space<vmem>>, %arg6: memref<16x128xbf16, #tpu.memory_space<vmem>>, %arg7: memref<16x128xf32, #tpu.memory_space<vmem>>) attributes {dimension_semantics = [#tpu.dimension_semantics<parallel>, #tpu.dimension_semantics<parallel>, #tpu.dimension_semantics<arbitrary>], iteration_bounds = array<i64: 1, 1, 1>, scalar_prefetch = 0 : i64, scratch_operands = 1 : i64, tpu.core_type = #tpu.core_type<tc>, window_params = [{transform_indices = @transform_0, window_bounds = array<i64: 16, 128>}, {transform_indices = @transform_1, window_bounds = array<i64: 128, 128>}, {transform_indices = @transform_2, window_bounds = array<i64: 1, 128>}, {transform_indices = @transform_3, window_bounds = array<i64: 16, 128>}]} {
    %c0_i32 = arith.constant 0 : i32
    %0 = arith.cmpi eq, %arg2, %c0_i32 : i32
    %1 = arith.extui %0 : i1 to i32
    %c0_i32_0 = arith.constant 0 : i32
    %2 = arith.cmpi ne, %1, %c0_i32_0 : i32
    scf.if %2 {
      %cst_10 = arith.constant 0.000000e+00 : f32
      %12 = vector.broadcast %cst_10 : f32 to vector<16x128xf32>
      %c0_11 = arith.constant 0 : index
      %c0_12 = arith.constant 0 : index
      %13 = vector.load %arg7[%c0_11, %c0_12] : memref<16x128xf32, #tpu.memory_space<vmem>>, vector<16x128xf32>
      tpu.vector_store %arg7[%c0_11, %c0_12], %12 {strides = array<i32>} : memref<16x128xf32, #tpu.memory_space<vmem>>, vector<16x128xf32>,
    } else {
    }
    %c0 = arith.constant 0 : index
    %c0_1 = arith.constant 0 : index
    %3 = vector.load %arg7[%c0, %c0_1] : memref<16x128xf32, #tpu.memory_space<vmem>>, vector<16x128xf32>
    %c0_2 = arith.constant 0 : index
    %c0_3 = arith.constant 0 : index
    %4 = vector.load %arg3[%c0_2, %c0_3] : memref<16x128xbf16, #tpu.memory_space<vmem>>, vector<16x128xbf16>
    %c0_4 = arith.constant 0 : index
    %c0_5 = arith.constant 0 : index
    %5 = vector.load %arg4[%c0_4, %c0_5] : memref<128x128xbf16, #tpu.memory_space<vmem>>, vector<128x128xbf16>
    %cst = arith.constant dense<0.000000e+00> : vector<16x128xf32>
    %6 = tpu.matmul %4, %5, %cst {dimension_numbers = #tpu.dot_dimension_numbers<[1], [0], [0], [1], [0, 0, 1, 1], [], []>} : vector<16x128xbf16>, vector<128x128xbf16>, vector<16x128xf32> -> vector<16x128xf32>
    %7 = arith.addf %3, %6 : vector<16x128xf32>
    %c0_6 = arith.constant 0 : index
    %c0_7 = arith.constant 0 : index
    %8 = vector.load %arg7[%c0_6, %c0_7] : memref<16x128xf32, #tpu.memory_space<vmem>>, vector<16x128xf32>
    tpu.vector_store %arg7[%c0_6, %c0_7], %7 {strides = array<i32>} : memref<16x128xf32, #tpu.memory_space<vmem>>, vector<16x128xf32>,
    %c0_i32_8 = arith.constant 0 : i32
    %9 = arith.cmpi eq, %arg2, %c0_i32_8 : i32
    %10 = arith.extui %9 : i1 to i32
    %c0_i32_9 = arith.constant 0 : i32
    %11 = arith.cmpi ne, %10, %c0_i32_9 : i32
    scf.if %11 {
      %c0_10 = arith.constant 0 : index
      %c0_11 = arith.constant 0 : index
      %12 = vector.load %arg7[%c0_10, %c0_11] : memref<16x128xf32, #tpu.memory_space<vmem>>, vector<16x128xf32>
      %c0_12 = arith.constant 0 : index
      %c0_13 = arith.constant 0 : index
      %13 = vector.load %arg5[%c0_12, %c0_13] : memref<1x128xf32, #tpu.memory_space<vmem>>, vector<1x128xf32>
      %14 = vector.broadcast %13 : vector<1x128xf32> to vector<16x128xf32>
      %15 = arith.addf %12, %14 : vector<16x128xf32>
      %16 = arith.truncf %15 : vector<16x128xf32> to vector<16x128xbf16>
      %c0_14 = arith.constant 0 : index
      %c0_15 = arith.constant 0 : index
      %17 = vector.load %arg6[%c0_14, %c0_15] : memref<16x128xbf16, #tpu.memory_space<vmem>>, vector<16x128xbf16>
      tpu.vector_store %arg6[%c0_14, %c0_15], %16 {strides = array<i32>} : memref<16x128xbf16, #tpu.memory_space<vmem>>, vector<16x128xbf16>,
    } else {
    }
    return
  }
  func.func @transform_0(%arg0: i32, %arg1: i32, %arg2: i32) -> (i32, i32) {
    %c0_i32 = arith.constant 0 : i32
    return %arg0, %arg2 : i32, i32
  }
  func.func @transform_1(%arg0: i32, %arg1: i32, %arg2: i32) -> (i32, i32) {
    %c0_i32 = arith.constant 0 : i32
    return %arg2, %arg1 : i32, i32
  }
  func.func @transform_2(%arg0: i32, %arg1: i32, %arg2: i32) -> (i32, i32) {
    %c0_i32 = arith.constant 0 : i32
    %c0_i32_0 = arith.constant 0 : i32
    return %c0_i32, %arg1 : i32, i32
  }
  func.func @transform_3(%arg0: i32, %arg1: i32, %arg2: i32) -> (i32, i32) {
    %c0_i32 = arith.constant 0 : i32
    return %arg0, %arg1 : i32, i32
  }
}

module attributes {stable_mosaic.version = 11 : i64} {
  func.func @_attention_kernel(%arg0: i32, %arg1: i32, %arg2: memref<1x8x128xbf16, #tpu.memory_space<vmem>>, %arg3: memref<1x8x128xbf16, #tpu.memory_space<vmem>>, %arg4: memref<1x8x128xbf16, #tpu.memory_space<vmem>>, %arg5: memref<1x1x8xi32, #tpu.memory_space<vmem>>, %arg6: memref<128x128xbf16, #tpu.memory_space<vmem>>, %arg7: memref<1x128xf32, #tpu.memory_space<vmem>>, %arg8: memref<1x8x128xbf16, #tpu.memory_space<vmem>>, %arg9: memref<1x128xf32, #tpu.memory_space<vmem>>, %arg10: memref<1x128xf32, #tpu.memory_space<vmem>>, %arg11: memref<1x8x128xbf16, #tpu.memory_space<vmem>>) attributes {dimension_semantics = [#tpu.dimension_semantics<parallel>, #tpu.dimension_semantics<parallel>], iteration_bounds = array<i64: 2, 1>, scalar_prefetch = 0 : i64, scratch_operands = 0 : i64, tpu.core_type = #tpu.core_type<tc>, window_params = [{transform_indices = @transform_0, window_bounds = array<i64: 1, 8, 128>}, {transform_indices = @transform_1, window_bounds = array<i64: 1, 8, 128>}, {transform_indices = @transform_2, window_bounds = array<i64: 1, 8, 128>}, {transform_indices = @transform_3, window_bounds = array<i64: 1, 1, 8>}, {pipeline_mode = #tpu.pipeline_mode<synchronous>, transform_indices = @transform_4, window_bounds = array<i64: 128, 128>}, {pipeline_mode = #tpu.pipeline_mode<synchronous>, transform_indices = @transform_5, window_bounds = array<i64: 1, 128>}, {transform_indices = @transform_6, window_bounds = array<i64: 1, 8, 128>}, {pipeline_mode = #tpu.pipeline_mode<synchronous>, transform_indices = @transform_7, window_bounds = array<i64: 1, 128>}, {pipeline_mode = #tpu.pipeline_mode<synchronous>, transform_indices = @transform_8, window_bounds = array<i64: 1, 128>}, {transform_indices = @transform_9, window_bounds = array<i64: 1, 8, 128>}]} {
    %c0 = arith.constant 0 : index
    %c0_0 = arith.constant 0 : index
    %c0_1 = arith.constant 0 : index
    %0 = vector.load %arg2[%c0, %c0_0, %c0_1] : memref<1x8x128xbf16, #tpu.memory_space<vmem>>, vector<1x8x128xbf16>
    %1 = vector.shape_cast %0 : vector<1x8x128xbf16> to vector<8x128xbf16>
    %c0_2 = arith.constant 0 : index
    %c0_3 = arith.constant 0 : index
    %c0_4 = arith.constant 0 : index
    %2 = vector.load %arg3[%c0_2, %c0_3, %c0_4] : memref<1x8x128xbf16, #tpu.memory_space<vmem>>, vector<1x8x128xbf16>
    %3 = vector.shape_cast %2 : vector<1x8x128xbf16> to vector<8x128xbf16>
    %c0_5 = arith.constant 0 : index
    %c0_6 = arith.constant 0 : index
    %c0_7 = arith.constant 0 : index
    %4 = vector.load %arg4[%c0_5, %c0_6, %c0_7] : memref<1x8x128xbf16, #tpu.memory_space<vmem>>, vector<1x8x128xbf16>
    %5 = vector.shape_cast %4 : vector<1x8x128xbf16> to vector<8x128xbf16>
    %cst = arith.constant dense<0.000000e+00> : vector<8x8xf32>
    %6 = tpu.matmul %1, %3, %cst {dimension_numbers = #tpu.dot_dimension_numbers<[1], [1], [0], [0], [0, 0, 1, 0], [], []>} : vector<8x128xbf16>, vector<8x128xbf16>, vector<8x8xf32> -> vector<8x8xf32>
    %cst_8 = arith.constant 0.0883883461 : f32
    %7 = vector.broadcast %cst_8 : f32 to vector<8x8xf32>
    %8 = arith.mulf %6, %7 : vector<8x8xf32>
    %c0_9 = arith.constant 0 : index
    %c0_10 = arith.constant 0 : index
    %c0_11 = arith.constant 0 : index
    %9 = vector.load %arg5[%c0_9, %c0_10, %c0_11] : memref<1x1x8xi32, #tpu.memory_space<vmem>>, vector<1x1x8xi32>
    %10 = vector.shape_cast %9 : vector<1x1x8xi32> to vector<1x8xi32>
    %c0_i32 = arith.constant 0 : i32
    %11 = vector.broadcast %c0_i32 : i32 to vector<1x8xi32>
    %12 = arith.cmpi ne, %10, %11 : vector<1x8xi32>
    %cst_12 = arith.constant -1.000000e+09 : f32
    %13 = vector.shape_cast %12 : vector<1x8xi1> to vector<1x8xi1>
    %14 = vector.broadcast %13 : vector<1x8xi1> to vector<8x8xi1>
    %15 = vector.broadcast %cst_12 : f32 to vector<8x8xf32>
    %16 = arith.select %14, %8, %15 : vector<8x8xi1>, vector<8x8xf32>
    %cst_13 = arith.constant dense<0xFF800000> : vector<8xf32>
    %17 = vector.multi_reduction <maximumf>, %16, %cst_13 [1] : vector<8x8xf32> to vector<8xf32>
    %18 = vector.shape_cast %17 : vector<8xf32> to vector<8x1xf32>
    %19 = vector.broadcast %18 : vector<8x1xf32> to vector<8x8xf32>
    %20 = arith.subf %16, %19 : vector<8x8xf32>
    %21 = math.exp %20 : vector<8x8xf32>
    %cst_14 = arith.constant dense<0.000000e+00> : vector<8xf32>
    %22 = vector.multi_reduction <add>, %21, %cst_14 [1] : vector<8x8xf32> to vector<8xf32>
    %23 = vector.shape_cast %22 : vector<8xf32> to vector<8x1xf32>
    %24 = arith.truncf %21 : vector<8x8xf32> to vector<8x8xbf16>
    %cst_15 = arith.constant dense<0.000000e+00> : vector<8x128xf32>
    %25 = tpu.matmul %24, %5, %cst_15 {dimension_numbers = #tpu.dot_dimension_numbers<[1], [0], [0], [1], [0, 0, 1, 1], [], []>} : vector<8x8xbf16>, vector<8x128xbf16>, vector<8x128xf32> -> vector<8x128xf32>
    %26 = tpu.reciprocal %23 {approx = true} : vector<8x1xf32> -> vector<8x1xf32>
    %27 = vector.broadcast %26 : vector<8x1xf32> to vector<8x128xf32>
    %28 = arith.mulf %25, %27 : vector<8x128xf32>
    %29 = arith.truncf %28 : vector<8x128xf32> to vector<8x128xbf16>
    %c0_16 = arith.constant 0 : index
    %c0_17 = arith.constant 0 : index
    %30 = vector.load %arg6[%c0_16, %c0_17] : memref<128x128xbf16, #tpu.memory_space<vmem>>, vector<128x128xbf16>
    %cst_18 = arith.constant dense<0.000000e+00> : vector<8x128xf32>
    %31 = tpu.matmul %29, %30, %cst_18 {dimension_numbers = #tpu.dot_dimension_numbers<[1], [0], [0], [1], [0, 0, 1, 1], [], []>} : vector<8x128xbf16>, vector<128x128xbf16>, vector<8x128xf32> -> vector<8x128xf32>
    %c0_19 = arith.constant 0 : index
    %c0_20 = arith.constant 0 : index
    %32 = vector.load %arg7[%c0_19, %c0_20] : memref<1x128xf32, #tpu.memory_space<vmem>>, vector<1x128xf32>
    %33 = vector.broadcast %32 : vector<1x128xf32> to vector<8x128xf32>
    %34 = arith.addf %31, %33 : vector<8x128xf32>
    %c0_21 = arith.constant 0 : index
    %c0_22 = arith.constant 0 : index
    %c0_23 = arith.constant 0 : index
    %35 = vector.load %arg8[%c0_21, %c0_22, %c0_23] : memref<1x8x128xbf16, #tpu.memory_space<vmem>>, vector<1x8x128xbf16>
    %36 = vector.shape_cast %35 : vector<1x8x128xbf16> to vector<8x128xbf16>
    %37 = arith.extf %36 : vector<8x128xbf16> to vector<8x128xf32>
    %38 = arith.addf %34, %37 : vector<8x128xf32>
    %cst_24 = arith.constant dense<0.000000e+00> : vector<8xf32>
    %39 = vector.multi_reduction <add>, %38, %cst_24 [1] : vector<8x128xf32> to vector<8xf32>
    %40 = vector.shape_cast %39 : vector<8xf32> to vector<8x1xf32>
    %cst_25 = arith.constant 1.280000e+02 : f32
    %41 = vector.broadcast %cst_25 : f32 to vector<8x1xf32>
    %42 = arith.divf %40, %41 : vector<8x1xf32>
    %43 = vector.broadcast %42 : vector<8x1xf32> to vector<8x128xf32>
    %44 = arith.subf %38, %43 : vector<8x128xf32>
    %45 = arith.mulf %44, %44 : vector<8x128xf32>
    %cst_26 = arith.constant dense<0.000000e+00> : vector<8xf32>
    %46 = vector.multi_reduction <add>, %45, %cst_26 [1] : vector<8x128xf32> to vector<8xf32>
    %47 = vector.shape_cast %46 : vector<8xf32> to vector<8x1xf32>
    %cst_27 = arith.constant 1.280000e+02 : f32
    %48 = vector.broadcast %cst_27 : f32 to vector<8x1xf32>
    %49 = arith.divf %47, %48 : vector<8x1xf32>
    %50 = vector.broadcast %42 : vector<8x1xf32> to vector<8x128xf32>
    %51 = arith.subf %38, %50 : vector<8x128xf32>
    %cst_28 = arith.constant 9.99999974E-6 : f32
    %52 = vector.broadcast %cst_28 : f32 to vector<8x1xf32>
    %53 = arith.addf %49, %52 : vector<8x1xf32>
    %54 = math.rsqrt %53 : vector<8x1xf32>
    %55 = vector.broadcast %54 : vector<8x1xf32> to vector<8x128xf32>
    %56 = arith.mulf %51, %55 : vector<8x128xf32>
    %c0_29 = arith.constant 0 : index
    %c0_30 = arith.constant 0 : index
    %57 = vector.load %arg9[%c0_29, %c0_30] : memref<1x128xf32, #tpu.memory_space<vmem>>, vector<1x128xf32>
    %58 = vector.broadcast %57 : vector<1x128xf32> to vector<8x128xf32>
    %59 = arith.mulf %56, %58 : vector<8x128xf32>
    %c0_31 = arith.constant 0 : index
    %c0_32 = arith.constant 0 : index
    %60 = vector.load %arg10[%c0_31, %c0_32] : memref<1x128xf32, #tpu.memory_space<vmem>>, vector<1x128xf32>
    %61 = vector.broadcast %60 : vector<1x128xf32> to vector<8x128xf32>
    %62 = arith.addf %59, %61 : vector<8x128xf32>
    %63 = arith.truncf %62 : vector<8x128xf32> to vector<8x128xbf16>
    %c0_33 = arith.constant 0 : index
    %c0_34 = arith.constant 0 : index
    %c0_35 = arith.constant 0 : index
    %64 = vector.load %arg11[%c0_33, %c0_34, %c0_35] : memref<1x8x128xbf16, #tpu.memory_space<vmem>>, vector<1x8x128xbf16>
    %65 = vector.shape_cast %64 : vector<1x8x128xbf16> to vector<8x128xbf16>
    %66 = vector.shape_cast %63 : vector<8x128xbf16> to vector<1x8x128xbf16>
    tpu.vector_store %arg11[%c0_33, %c0_34, %c0_35], %66 {strides = array<i32>} : memref<1x8x128xbf16, #tpu.memory_space<vmem>>, vector<1x8x128xbf16>,
    return
  }
  func.func @transform_0(%arg0: i32, %arg1: i32) -> (i32, i32, i32) {
    %c0_i32 = arith.constant 0 : i32
    %c0_i32_0 = arith.constant 0 : i32
    return %arg0, %arg1, %c0_i32 : i32, i32, i32
  }
  func.func @transform_1(%arg0: i32, %arg1: i32) -> (i32, i32, i32) {
    %c0_i32 = arith.constant 0 : i32
    %c0_i32_0 = arith.constant 0 : i32
    %c0_i32_1 = arith.constant 0 : i32
    return %arg0, %c0_i32, %c0_i32_0 : i32, i32, i32
  }
  func.func @transform_2(%arg0: i32, %arg1: i32) -> (i32, i32, i32) {
    %c0_i32 = arith.constant 0 : i32
    %c1_i32 = arith.constant 1 : i32
    %c0_i32_0 = arith.constant 0 : i32
    return %arg0, %c0_i32, %c1_i32 : i32, i32, i32
  }
  func.func @transform_3(%arg0: i32, %arg1: i32) -> (i32, i32, i32) {
    %c0_i32 = arith.constant 0 : i32
    %c0_i32_0 = arith.constant 0 : i32
    %c0_i32_1 = arith.constant 0 : i32
    return %arg0, %c0_i32, %c0_i32_0 : i32, i32, i32
  }
  func.func @transform_4(%arg0: i32, %arg1: i32) -> (i32, i32) {
    %c0_i32 = arith.constant 0 : i32
    %c0_i32_0 = arith.constant 0 : i32
    %c0_i32_1 = arith.constant 0 : i32
    return %c0_i32, %c0_i32_0 : i32, i32
  }
  func.func @transform_5(%arg0: i32, %arg1: i32) -> (i32, i32) {
    %c0_i32 = arith.constant 0 : i32
    %c0_i32_0 = arith.constant 0 : i32
    %c0_i32_1 = arith.constant 0 : i32
    return %c0_i32, %c0_i32_0 : i32, i32
  }
  func.func @transform_6(%arg0: i32, %arg1: i32) -> (i32, i32, i32) {
    %c0_i32 = arith.constant 0 : i32
    %c0_i32_0 = arith.constant 0 : i32
    return %arg0, %arg1, %c0_i32 : i32, i32, i32
  }
  func.func @transform_7(%arg0: i32, %arg1: i32) -> (i32, i32) {
    %c0_i32 = arith.constant 0 : i32
    %c0_i32_0 = arith.constant 0 : i32
    %c0_i32_1 = arith.constant 0 : i32
    return %c0_i32, %c0_i32_0 : i32, i32
  }
  func.func @transform_8(%arg0: i32, %arg1: i32) -> (i32, i32) {
    %c0_i32 = arith.constant 0 : i32
    %c0_i32_0 = arith.constant 0 : i32
    %c0_i32_1 = arith.constant 0 : i32
    return %c0_i32, %c0_i32_0 : i32, i32
  }
  func.func @transform_9(%arg0: i32, %arg1: i32) -> (i32, i32, i32) {
    %c0_i32 = arith.constant 0 : i32
    %c0_i32_0 = arith.constant 0 : i32
    return %arg0, %arg1, %c0_i32 : i32, i32, i32
  }
}

module attributes {stable_mosaic.version = 11 : i64} {
  func.func @_head_metrics_kernel(%arg0: i32, %arg1: i32, %arg2: memref<16x128xbf16, #tpu.memory_space<vmem>>, %arg3: memref<128x256xbf16, #tpu.memory_space<vmem>>, %arg4: memref<1x256xf32, #tpu.memory_space<vmem>>, %arg5: memref<16x1xi32, #tpu.memory_space<vmem>>, %arg6: memref<16x256xf32, #tpu.memory_space<vmem>>, %arg7: memref<16x128xf32, #tpu.memory_space<vmem>>, %arg8: memref<16x1xf32, #tpu.memory_space<vmem>>, %arg9: memref<16x1xf32, #tpu.memory_space<vmem>>, %arg10: memref<16x1xf32, #tpu.memory_space<vmem>>, %arg11: memref<16x1xi32, #tpu.memory_space<vmem>>) attributes {dimension_semantics = [#tpu.dimension_semantics<parallel>, #tpu.dimension_semantics<arbitrary>], iteration_bounds = array<i64: 1, 1>, scalar_prefetch = 0 : i64, scratch_operands = 4 : i64, tpu.core_type = #tpu.core_type<tc>, window_params = [{transform_indices = @transform_0, window_bounds = array<i64: 16, 128>}, {transform_indices = @transform_1, window_bounds = array<i64: 128, 256>}, {transform_indices = @transform_2, window_bounds = array<i64: 1, 256>}, {transform_indices = @transform_3, window_bounds = array<i64: 16, 1>}, {transform_indices = @transform_4, window_bounds = array<i64: 16, 256>}, {transform_indices = @transform_5, window_bounds = array<i64: 16, 128>}]} {
    %c0_i32 = arith.constant 0 : i32
    %0 = arith.cmpi eq, %arg1, %c0_i32 : i32
    %1 = arith.extui %0 : i1 to i32
    %c0_i32_0 = arith.constant 0 : i32
    %2 = arith.cmpi ne, %1, %c0_i32_0 : i32
    scf.if %2 {
      %cst_33 = arith.constant 0xFF800000 : f32
      %53 = vector.broadcast %cst_33 : f32 to vector<16x1xf32>
      %c0_34 = arith.constant 0 : index
      %c0_35 = arith.constant 0 : index
      %54 = vector.load %arg8[%c0_34, %c0_35] : memref<16x1xf32, #tpu.memory_space<vmem>>, vector<16x1xf32>
      tpu.vector_store %arg8[%c0_34, %c0_35], %53 {strides = array<i32>} : memref<16x1xf32, #tpu.memory_space<vmem>>, vector<16x1xf32>,
      %cst_36 = arith.constant 0.000000e+00 : f32
      %55 = vector.broadcast %cst_36 : f32 to vector<16x1xf32>
      %c0_37 = arith.constant 0 : index
      %c0_38 = arith.constant 0 : index
      %56 = vector.load %arg9[%c0_37, %c0_38] : memref<16x1xf32, #tpu.memory_space<vmem>>, vector<16x1xf32>
      tpu.vector_store %arg9[%c0_37, %c0_38], %55 {strides = array<i32>} : memref<16x1xf32, #tpu.memory_space<vmem>>, vector<16x1xf32>,
      %cst_39 = arith.constant 0.000000e+00 : f32
      %57 = vector.broadcast %cst_39 : f32 to vector<16x1xf32>
      %c0_40 = arith.constant 0 : index
      %c0_41 = arith.constant 0 : index
      %58 = vector.load %arg10[%c0_40, %c0_41] : memref<16x1xf32, #tpu.memory_space<vmem>>, vector<16x1xf32>
      tpu.vector_store %arg10[%c0_40, %c0_41], %57 {strides = array<i32>} : memref<16x1xf32, #tpu.memory_space<vmem>>, vector<16x1xf32>,
      %c0_i32_42 = arith.constant 0 : i32
      %59 = vector.broadcast %c0_i32_42 : i32 to vector<16x1xi32>
      %c0_43 = arith.constant 0 : index
      %c0_44 = arith.constant 0 : index
      %60 = vector.load %arg11[%c0_43, %c0_44] : memref<16x1xi32, #tpu.memory_space<vmem>>, vector<16x1xi32>
      tpu.vector_store %arg11[%c0_43, %c0_44], %59 {strides = array<i32>} : memref<16x1xi32, #tpu.memory_space<vmem>>, vector<16x1xi32>,
    } else {
    }
    %c0 = arith.constant 0 : index
    %c0_1 = arith.constant 0 : index
    %3 = vector.load %arg2[%c0, %c0_1] : memref<16x128xbf16, #tpu.memory_space<vmem>>, vector<16x128xbf16>
    %c0_2 = arith.constant 0 : index
    %c0_3 = arith.constant 0 : index
    %4 = vector.load %arg3[%c0_2, %c0_3] : memref<128x256xbf16, #tpu.memory_space<vmem>>, vector<128x256xbf16>
    %cst = arith.constant dense<0.000000e+00> : vector<16x256xf32>
    %5 = tpu.matmul %3, %4, %cst {dimension_numbers = #tpu.dot_dimension_numbers<[1], [0], [0], [1], [0, 0, 1, 1], [], []>} : vector<16x128xbf16>, vector<128x256xbf16>, vector<16x256xf32> -> vector<16x256xf32>
    %c0_4 = arith.constant 0 : index
    %c0_5 = arith.constant 0 : index
    %6 = vector.load %arg4[%c0_4, %c0_5] : memref<1x256xf32, #tpu.memory_space<vmem>>, vector<1x256xf32>
    %7 = vector.broadcast %6 : vector<1x256xf32> to vector<16x256xf32>
    %8 = arith.addf %5, %7 : vector<16x256xf32>
    %c0_6 = arith.constant 0 : index
    %c0_7 = arith.constant 0 : index
    %9 = vector.load %arg6[%c0_6, %c0_7] : memref<16x256xf32, #tpu.memory_space<vmem>>, vector<16x256xf32>
    tpu.vector_store %arg6[%c0_6, %c0_7], %8 {strides = array<i32>} : memref<16x256xf32, #tpu.memory_space<vmem>>, vector<16x256xf32>,
    %10 = tpu.iota {dimensions = array<i32: 1>} : vector<16x256xi32>
    %c256_i32 = arith.constant 256 : i32
    %11 = arith.muli %arg1, %c256_i32 : i32
    %12 = vector.broadcast %11 : i32 to vector<16x256xi32>
    %13 = arith.addi %10, %12 : vector<16x256xi32>
    %c0_8 = arith.constant 0 : index
    %c0_9 = arith.constant 0 : index
    %14 = vector.load %arg5[%c0_8, %c0_9] : memref<16x1xi32, #tpu.memory_space<vmem>>, vector<16x1xi32>
    %cst_10 = arith.constant dense<0xFF800000> : vector<16xf32>
    %15 = vector.multi_reduction <maximumf>, %8, %cst_10 [1] : vector<16x256xf32> to vector<16xf32>
    %16 = vector.shape_cast %15 : vector<16xf32> to vector<16x1xf32>
    %17 = vector.broadcast %16 : vector<16x1xf32> to vector<16x256xf32>
    %18 = arith.cmpf oge, %8, %17 : vector<16x256xf32>
    %c1073741824_i32 = arith.constant 1073741824 : i32
    %19 = vector.broadcast %c1073741824_i32 : i32 to vector<16x256xi32>
    %20 = arith.select %18, %13, %19 : vector<16x256xi1>, vector<16x256xi32>
    %cst_11 = arith.constant dense<2147483647> : vector<16xi32>
    %21 = vector.multi_reduction <minsi>, %20, %cst_11 [1] : vector<16x256xi32> to vector<16xi32>
    %22 = vector.shape_cast %21 : vector<16xi32> to vector<16x1xi32>
    %c0_12 = arith.constant 0 : index
    %c0_13 = arith.constant 0 : index
    %23 = vector.load %arg8[%c0_12, %c0_13] : memref<16x1xf32, #tpu.memory_space<vmem>>, vector<16x1xf32>
    %24 = arith.maximumf %23, %16 : vector<16x1xf32>
    %c0_14 = arith.constant 0 : index
    %c0_15 = arith.constant 0 : index
    %25 = vector.load %arg9[%c0_14, %c0_15] : memref<16x1xf32, #tpu.memory_space<vmem>>, vector<16x1xf32>
    %26 = arith.subf %23, %24 : vector<16x1xf32>
    %27 = math.exp %26 : vector<16x1xf32>
    %28 = arith.mulf %25, %27 : vector<16x1xf32>
    %29 = vector.broadcast %24 : vector<16x1xf32> to vector<16x256xf32>
    %30 = arith.subf %8, %29 : vector<16x256xf32>
    %31 = math.exp %30 : vector<16x256xf32>
    %cst_16 = arith.constant dense<0.000000e+00> : vector<16xf32>
    %32 = vector.multi_reduction <add>, %31, %cst_16 [1] : vector<16x256xf32> to vector<16xf32>
    %33 = vector.shape_cast %32 : vector<16xf32> to vector<16x1xf32>
    %34 = arith.addf %28, %33 : vector<16x1xf32>
    %c0_17 = arith.constant 0 : index
    %c0_18 = arith.constant 0 : index
    %35 = vector.load %arg9[%c0_17, %c0_18] : memref<16x1xf32, #tpu.memory_space<vmem>>, vector<16x1xf32>
    tpu.vector_store %arg9[%c0_17, %c0_18], %34 {strides = array<i32>} : memref<16x1xf32, #tpu.memory_space<vmem>>, vector<16x1xf32>,
    %c0_19 = arith.constant 0 : index
    %c0_20 = arith.constant 0 : index
    %36 = vector.load %arg8[%c0_19, %c0_20] : memref<16x1xf32, #tpu.memory_space<vmem>>, vector<16x1xf32>
    tpu.vector_store %arg8[%c0_19, %c0_20], %24 {strides = array<i32>} : memref<16x1xf32, #tpu.memory_space<vmem>>, vector<16x1xf32>,
    %c0_21 = arith.constant 0 : index
    %c0_22 = arith.constant 0 : index
    %37 = vector.load %arg10[%c0_21, %c0_22] : memref<16x1xf32, #tpu.memory_space<vmem>>, vector<16x1xf32>
    %38 = vector.broadcast %14 : vector<16x1xi32> to vector<16x256xi32>
    %39 = arith.cmpi eq, %13, %38 : vector<16x256xi32>
    %cst_23 = arith.constant 0.000000e+00 : f32
    %40 = vector.broadcast %cst_23 : f32 to vector<16x256xf32>
    %41 = arith.select %39, %8, %40 : vector<16x256xi1>, vector<16x256xf32>
    %cst_24 = arith.constant dense<0.000000e+00> : vector<16xf32>
    %42 = vector.multi_reduction <add>, %41, %cst_24 [1] : vector<16x256xf32> to vector<16xf32>
    %43 = vector.shape_cast %42 : vector<16xf32> to vector<16x1xf32>
    %44 = arith.addf %37, %43 : vector<16x1xf32>
    %c0_25 = arith.constant 0 : index
    %c0_26 = arith.constant 0 : index
    %45 = vector.load %arg10[%c0_25, %c0_26] : memref<16x1xf32, #tpu.memory_space<vmem>>, vector<16x1xf32>
    tpu.vector_store %arg10[%c0_25, %c0_26], %44 {strides = array<i32>} : memref<16x1xf32, #tpu.memory_space<vmem>>, vector<16x1xf32>,
    %46 = arith.cmpf ogt, %16, %23 : vector<16x1xf32>
    %c0_27 = arith.constant 0 : index
    %c0_28 = arith.constant 0 : index
    %47 = vector.load %arg11[%c0_27, %c0_28] : memref<16x1xi32, #tpu.memory_space<vmem>>, vector<16x1xi32>
    %48 = arith.select %46, %22, %47 : vector<16x1xi1>, vector<16x1xi32>
    %c0_29 = arith.constant 0 : index
    %c0_30 = arith.constant 0 : index
    %49 = vector.load %arg11[%c0_29, %c0_30] : memref<16x1xi32, #tpu.memory_space<vmem>>, vector<16x1xi32>
    tpu.vector_store %arg11[%c0_29, %c0_30], %48 {strides = array<i32>} : memref<16x1xi32, #tpu.memory_space<vmem>>, vector<16x1xi32>,
    %c0_i32_31 = arith.constant 0 : i32
    %50 = arith.cmpi eq, %arg1, %c0_i32_31 : i32
    %51 = arith.extui %50 : i1 to i32
    %c0_i32_32 = arith.constant 0 : i32
    %52 = arith.cmpi ne, %51, %c0_i32_32 : i32
    scf.if %52 {
      %c0_33 = arith.constant 0 : index
      %c0_34 = arith.constant 0 : index
      %53 = vector.load %arg8[%c0_33, %c0_34] : memref<16x1xf32, #tpu.memory_space<vmem>>, vector<16x1xf32>
      %c0_35 = arith.constant 0 : index
      %c0_36 = arith.constant 0 : index
      %54 = vector.load %arg9[%c0_35, %c0_36] : memref<16x1xf32, #tpu.memory_space<vmem>>, vector<16x1xf32>
      %55 = math.log %54 : vector<16x1xf32>
      %56 = arith.addf %53, %55 : vector<16x1xf32>
      %c0_37 = arith.constant 0 : index
      %c0_38 = arith.constant 0 : index
      %57 = vector.load %arg10[%c0_37, %c0_38] : memref<16x1xf32, #tpu.memory_space<vmem>>, vector<16x1xf32>
      %58 = arith.subf %56, %57 : vector<16x1xf32>
      %59 = tpu.iota {dimensions = array<i32: 1>} : vector<16x128xi32>
      %c0_i32_39 = arith.constant 0 : i32
      %60 = vector.broadcast %c0_i32_39 : i32 to vector<16x128xi32>
      %61 = arith.cmpi eq, %59, %60 : vector<16x128xi32>
      %c1_i32 = arith.constant 1 : i32
      %62 = vector.broadcast %c1_i32 : i32 to vector<16x128xi32>
      %63 = arith.cmpi eq, %59, %62 : vector<16x128xi32>
      %c0_40 = arith.constant 0 : index
      %c0_41 = arith.constant 0 : index
      %64 = vector.load %arg11[%c0_40, %c0_41] : memref<16x1xi32, #tpu.memory_space<vmem>>, vector<16x1xi32>
      %65 = arith.sitofp %64 : vector<16x1xi32> to vector<16x1xf32>
      %cst_42 = arith.constant 0.000000e+00 : f32
      %66 = vector.shape_cast %65 : vector<16x1xf32> to vector<16x1xf32>
      %67 = vector.broadcast %66 : vector<16x1xf32> to vector<16x128xf32>
      %68 = vector.broadcast %cst_42 : f32 to vector<16x128xf32>
      %69 = arith.select %63, %67, %68 : vector<16x128xi1>, vector<16x128xf32>
      %70 = vector.shape_cast %58 : vector<16x1xf32> to vector<16x1xf32>
      %71 = vector.broadcast %70 : vector<16x1xf32> to vector<16x128xf32>
      %72 = arith.select %61, %71, %69 : vector<16x128xi1>, vector<16x128xf32>
      %c0_43 = arith.constant 0 : index
      %c0_44 = arith.constant 0 : index
      %73 = vector.load %arg7[%c0_43, %c0_44] : memref<16x128xf32, #tpu.memory_space<vmem>>, vector<16x128xf32>
      tpu.vector_store %arg7[%c0_43, %c0_44], %72 {strides = array<i32>} : memref<16x128xf32, #tpu.memory_space<vmem>>, vector<16x128xf32>,
    } else {
    }
    return
  }
  func.func @transform_0(%arg0: i32, %arg1: i32) -> (i32, i32) {
    %c0_i32 = arith.constant 0 : i32
    %c0_i32_0 = arith.constant 0 : i32
    return %arg0, %c0_i32 : i32, i32
  }
  func.func @transform_1(%arg0: i32, %arg1: i32) -> (i32, i32) {
    %c0_i32 = arith.constant 0 : i32
    %c0_i32_0 = arith.constant 0 : i32
    return %c0_i32, %arg1 : i32, i32
  }
  func.func @transform_2(%arg0: i32, %arg1: i32) -> (i32, i32) {
    %c0_i32 = arith.constant 0 : i32
    %c0_i32_0 = arith.constant 0 : i32
    return %c0_i32, %arg1 : i32, i32
  }
  func.func @transform_3(%arg0: i32, %arg1: i32) -> (i32, i32) {
    %c0_i32 = arith.constant 0 : i32
    %c0_i32_0 = arith.constant 0 : i32
    return %arg0, %c0_i32 : i32, i32
  }
  func.func @transform_4(%arg0: i32, %arg1: i32) -> (i32, i32) {
    %c0_i32 = arith.constant 0 : i32
    return %arg0, %arg1 : i32, i32
  }
  func.func @transform_5(%arg0: i32, %arg1: i32) -> (i32, i32) {
    %c0_i32 = arith.constant 0 : i32
    %c0_i32_0 = arith.constant 0 : i32
    return %arg0, %c0_i32 : i32, i32
  }
}

</mosaic_0001>

<bundles_post_ra>
// kernel: adversary_train_forward.15
= control target key start
LH: loop header
LB: loop body
LE: loop exit
PB: predicated region body
PF: predicated region fallthrough
CT: control target
= control target key end

     0   :  { %s475_s1 = inlined_call_operand.vmem [shape: bf16[256,128], index: 1, kind: input, shape index: {}]   ;;  %s476_s0 = inlined_call_operand.vmem [shape: bf16[16,256], index: 0, kind: input, shape index: {}]   ;;  %s477_s3 = inlined_call_operand.vmem [shape: bf16[16,128], index: 3, kind: input, shape index: {}]   ;;  %s478_s2 = inlined_call_operand.vmem [shape: f32[1,128], index: 2, kind: input, shape index: {}]   ;;  %s479_s4 = inlined_call_operand.vmem [shape: f32[1,128], index: 4, kind: input, shape index: {}]   ;;  %s480_s5 = inlined_call_operand.vmem [shape: f32[1,128], index: 5, kind: input, shape index: {}]   ;;  %s481_s6 = inlined_call_operand.vmem [shape: bf16[16,128], index: 6, kind: output, shape index: {}]  }
   0x1   :  { %v348_v0 = vld [vmem:[%s475_s1 + $0x78] sm:$0xff]   ;;  %v350_v2 = vld [vmem:[%s475_s1 + $0x70] sm:$0xff]   ;;  %v352_v4 = vld [vmem:[%s475_s1 + $0x68] sm:$0xff]  }
   0x2   :  { %v349_v1 = vld [vmem:[%s475_s1 + $0x38] sm:$0xff]   ;;  %326 = vmatprep.subr.bf16.mxu0 %v348_v0  ;;  %v351_v3 = vld [vmem:[%s475_s1 + $0x30] sm:$0xff]   ;;  %v353_v5 = vld [vmem:[%s475_s1 + $0x28] sm:$0xff]  }
   0x3   :  { %327 = vmatpush3.bf16.msra.mxu0 %v349_v1  ;;  %v354_v6 = vld [vmem:[%s475_s1 + $0x60] sm:$0xff]   ;;  %v356_v8 = vld [vmem:[%s475_s1 + $0x58] sm:$0xff]   ;;  %v358_v10 = vld [vmem:[%s475_s1 + $0x50] sm:$0xff]  }
   0x4   :  { %328 = vmatprep.subr.bf16.mxu0 %v350_v2  ;;  %v355_v7 = vld [vmem:[%s475_s1 + $0x20] sm:$0xff]   ;;  %v357_v9 = vld [vmem:[%s475_s1 + $0x18] sm:$0xff]   ;;  %v359_v12 = vld [vmem:[%s475_s1 + $0x10] sm:$0xff]  }
   0x5   :  { %v366_v11 = vld [vmem:[%s476_s0 + $0x4] ss:$8 sps:$4 sm:$0xff]   ;;  %v364_v17 = vld [vmem:[%s476_s0] ss:$8 sps:$4 sm:$0xff]  }
   0x6   :  { %204 = vmatprep.mubr.bf16.mxu0 %v366_v11  ;;  %v360_v13 = vld [vmem:[%s475_s1 + $0x48] sm:$0xff]   ;;  %v362_v15 = vld [vmem:[%s475_s1 + $0x40] sm:$0xff]  }
   0x7   :  { %329 = vmatpush3.bf16.msra.mxu0 %v351_v3  ;;  %v361_v14 = vld [vmem:[%s475_s1 + $0x8] sm:$0xff]   ;;  %v363_v16 = vld [vmem:[%s475_s1] sm:$0xff]  }
   0x8   :  { %330 = vmatprep.subr.bf16.mxu0 %v352_v4  ;;  %v318_v19 = vld [vmem:[%s477_s3] sm:$0xff]  }
   0x9   :  { %v310_v21 = vld [vmem:[%s478_s2] ss:$0 sm:$0xff]  ;;  %v319_v23 = vunpack.c.l.bf16 %v318_v19  ;;  %v320_v29 = vunpack.c.h.bf16 %v318_v19 }
   0xa   :  { %v311_v48 = vld [vmem:[%s479_s4] ss:$0 sm:$0xff] }
   0xb   :  { %331 = vmatpush3.bf16.msra.mxu0 %v353_v5  ;;  %v312_v52 = vld [vmem:[%s480_s5] ss:$0 sm:$0xff] }
   0xc   :  { %332 = vmatprep.subr.bf16.mxu0 %v354_v6 }
   0xf   :  { %333 = vmatpush3.bf16.msra.mxu0 %v355_v7 }
  0x10   :  { %334 = vmatprep.subr.bf16.mxu0 %v356_v8 }
  0x13   :  { %335 = vmatpush3.bf16.msra.mxu0 %v357_v9 }
  0x14   :  { %336 = vmatprep.subr.bf16.mxu0 %v358_v10 }
  0x17   :  { %337 = vmatpush3.bf16.msra.mxu0 %v359_v12 }
  0x18   :  { %338 = vmatprep.subr.bf16.mxu0 %v360_v13 }
  0x1b   :  { %339 = vmatpush3.bf16.msra.mxu0 %v361_v14 }
  0x1c   :  { %340 = vmatprep.subr.bf16.mxu0 %v362_v15 }
  0x1f   :  { %341 = vmatpush3.bf16.msra.mxu0 %v363_v16 }
  0x22   :  { %205 = vmatmul.mubr.bf16.vlgmr.msra.gmra.mxu0 %v364_v17 }
  0xe2   :  { %v342_v18 = vpop.f32.mrf.mxu0 }
  0xe4   :  { %v343_v20 = vpop.f32.mrf.mxu0 }
  0xe5   :  { %v344_v22 = vadd.f32 %v343_v20, %v342_v18 }
  0xe6   :  { %v345_v24 = vpop.f32.mrf.mxu0 }
  0xe7   :  { %v229_v25 = vadd.f32 %v344_v22, %v310_v21 }
  0xe8   :  { %v346_v26 = vpop.f32.mrf.mxu0 }
  0xe9   :  { %v347_v27 = vadd.f32 %v346_v26, %v345_v24  ;;  %v235_v28 = vadd.f32 %v319_v23, %v229_v25 }
  0xeb   :  { %v230_v30 = vadd.f32 %v347_v27, %v310_v21  ;;  %239 = vadd.xlane.f32.xlu0 %v235_v28 }
  0xed   :  { %v236_v31 = vadd.f32 %v320_v29, %v230_v30 }
  0xef   :  { %241 = vadd.xlane.f32.xlu0 %v236_v31 }
 0x174   :  { %v240_v32 = vpop.xlane.xlu0 %239 }
 0x175   :  { %v244_v33 = vmul.f32 0.0078125, %v240_v32 }
 0x177   :  { %v246_v34 = vsub.f32 %v235_v28, %v244_v33 }
 0x178   :  { %v242_v35 = vpop.xlane.xlu0 %241 }
 0x179   :  { %v245_v36 = vmul.f32 0.0078125, %v242_v35  ;;  %v248_v37 = vmul.f32 %v246_v34, %v246_v34 }
 0x17b   :  { %v247_v38 = vsub.f32 %v236_v31, %v245_v36  ;;  %250 = vadd.xlane.f32.xlu1 %v248_v37 }
 0x17d   :  { %v249_v39 = vmul.f32 %v247_v38, %v247_v38 }
 0x17f   :  { %252 = vadd.xlane.f32.xlu1 %v249_v39 }
 0x204   :  { %v251_v40 = vpop.xlane.xlu1 %250 }
 0x205   :  { %v254_v41 = vmul.f32 0.0078125, %v251_v40 }
 0x207   :  { %v256_v42 = vadd.f32 1e-05, %v254_v41 }
 0x208   :  { %v253_v43 = vpop.xlane.xlu1 %252 }
 0x209   :  { %367 = vrsqrt.f32 %v256_v42  ;;  %v255_v44 = vmul.f32 0.0078125, %v253_v43 }
 0x20b   :  { %v257_v45 = vadd.f32 1e-05, %v255_v44 }
 0x20d   :  { %369 = vrsqrt.f32 %v257_v45 }
 0x216   :  { %v368_v46 = vpop.eup %367 }
 0x217   :  { %v260_v47 = vmul.f32 %v368_v46, %v246_v34 }
 0x219   :  { %v268_v50 = vmul.f32 %v311_v48, %v260_v47 }
 0x21a   :  { %v370_v49 = vpop.eup %369 }
 0x21b   :  { %v261_v51 = vmul.f32 %v370_v49, %v247_v38  ;;  %v276_v54 = vadd.f32 %v312_v52, %v268_v50 }
 0x21d   :  { %v269_v53 = vmul.f32 %v311_v48, %v261_v51 }
 0x21f   :  { %v277_v55 = vadd.f32 %v312_v52, %v269_v53 }
 0x221   :  { %v324_v56 = vpack.c.bf16 %v277_v55, %v276_v54 }
 0x223   :  { %325 = vst [vmem:[%s481_s6] sm:$0xff] %v324_v56  }

// kernel: adversary_train_forward.14
= control target key start
LH: loop header
LB: loop body
LE: loop exit
PB: predicated region body
PF: predicated region fallthrough
CT: control target
= control target key end

     0   :  { %v314_v1 = vmov 0   ;;  %v191_v18 = vlaneseq  ;;  %s395_s1 = inlined_call_operand.vmem [shape: bf16[128,256], index: 1, kind: input, shape index: {}]   ;;  %s396_s0 = inlined_call_operand.vmem [shape: bf16[16,128], index: 0, kind: input, shape index: {}]   ;;  %s397_s2 = inlined_call_operand.vmem [shape: f32[1,256], index: 2, kind: input, shape index: {}]   ;;  %s398_s3 = inlined_call_operand.vmem [shape: bf16[16,256], index: 3, kind: output, shape index: {}]  }
   0x1   :  { %v281_v0 = vld [vmem:[%s395_s1 + $0x74] ss:$8 sps:$4 sm:$0xff]   ;;  %163 = vmatprep.mubr.bf16.mxu0 %v314_v1  ;;  %v283_v2 = vld [vmem:[%s395_s1 + $0x70] ss:$8 sps:$4 sm:$0xff]   ;;  %v284_v3 = vld [vmem:[%s395_s1 + $0x64] ss:$8 sps:$4 sm:$0xff]  }
   0x2   :  { %131 = vmatprep.subr.bf16.mxu0 %v281_v0  ;;  %v286_v4 = vld [vmem:[%s395_s1 + $0x60] ss:$8 sps:$4 sm:$0xff]   ;;  %v287_v5 = vld [vmem:[%s395_s1 + $0x54] ss:$8 sps:$4 sm:$0xff]   ;;  %v289_v6 = vld [vmem:[%s395_s1 + $0x50] ss:$8 sps:$4 sm:$0xff]  }
   0x3   :  { %132 = vmatpush1.bf16.msra.mxu0 %v283_v2  ;;  %v290_v7 = vld [vmem:[%s395_s1 + $0x44] ss:$8 sps:$4 sm:$0xff]   ;;  %v292_v8 = vld [vmem:[%s395_s1 + $0x40] ss:$8 sps:$4 sm:$0xff]   ;;  %v293_v9 = vld [vmem:[%s395_s1 + $0x34] ss:$8 sps:$4 sm:$0xff]  }
   0x4   :  { %133 = vmatprep.subr.bf16.mxu0 %v284_v3  ;;  %v295_v10 = vld [vmem:[%s395_s1 + $0x30] ss:$8 sps:$4 sm:$0xff]   ;;  %v296_v11 = vld [vmem:[%s395_s1 + $0x24] ss:$8 sps:$4 sm:$0xff]   ;;  %v298_v12 = vld [vmem:[%s395_s1 + $0x20] ss:$8 sps:$4 sm:$0xff]  }
   0x5   :  { %v299_v13 = vld [vmem:[%s395_s1 + $0x14] ss:$8 sps:$4 sm:$0xff]   ;;  %v301_v14 = vld [vmem:[%s395_s1 + $0x10] ss:$8 sps:$4 sm:$0xff]   ;;  %v302_v15 = vld [vmem:[%s395_s1 + $0x4] ss:$8 sps:$4 sm:$0xff]  }
   0x6   :  { %v304_v16 = vld [vmem:[%s395_s1] ss:$8 sps:$4 sm:$0xff]   ;;  %v192_v19 = vshrl.u32 %v191_v18, 7 }
   0x7   :  { %134 = vmatpush1.bf16.msra.mxu0 %v286_v4  ;;  %v305_v17 = vld [vmem:[%s396_s0] sm:$0xff]  }
   0x8   :  { %135 = vmatprep.subr.bf16.mxu0 %v287_v5  ;;  %v193_v20 = vsub.s32 0, %v192_v19  ;;  %v189_v21 = vld [vmem:[%s397_s2] sm:$0x3]  ;;  %v197_v22 = vsub.s32 1, %v192_v19 }
   0xa   :  { %v194_v23 = vrot.slane %v189_v21, %v193_v20  ;;  %v198_v24 = vrot.slane %v189_v21, %v197_v22 }
   0xb   :  { %136 = vmatpush1.bf16.msra.mxu0 %v289_v6 }
   0xc   :  { %137 = vmatprep.subr.bf16.mxu0 %v290_v7 }
   0xf   :  { %138 = vmatpush1.bf16.msra.mxu0 %v292_v8 }
  0x10   :  { %139 = vmatprep.subr.bf16.mxu0 %v293_v9 }
  0x13   :  { %140 = vmatpush1.bf16.msra.mxu0 %v295_v10 }
  0x14   :  { %141 = vmatprep.subr.bf16.mxu0 %v296_v11 }
  0x17   :  { %142 = vmatpush1.bf16.msra.mxu0 %v298_v12 }
  0x18   :  { %143 = vmatprep.subr.bf16.mxu0 %v299_v13 }
  0x1b   :  { %144 = vmatpush1.bf16.msra.mxu0 %v301_v14 }
  0x1c   :  { %145 = vmatprep.subr.bf16.mxu0 %v302_v15 }
  0x1f   :  { %146 = vmatpush1.bf16.msra.mxu0 %v304_v16 }
  0x22   :  { %164 = vmatmul.mubr.bf16.vlgmr.msra.gmra.mxu0 %v305_v17 }
  0xe2   :  { %v165_v25 = vpop.f32.mrf.mxu0 }
  0xe3   :  { %v201_v26 = vadd.f32 %v194_v23, %v165_v25 }
  0xe4   :  { %v167_v27 = vpop.f32.mrf.mxu0 }
  0xe5   :  { %v205_v28 = vmul.f32 %v201_v26, %v201_v26  ;;  %v202_v29 = vadd.f32 %v198_v24, %v167_v27 }
  0xe6   :  { %v169_v30 = vpop.f32.mrf.mxu0 }
  0xe7   :  { %v209_v31 = vmul.f32 %v205_v28, %v201_v26  ;;  %v206_v32 = vmul.f32 %v202_v29, %v202_v29  ;;  %v203_v33 = vadd.f32 %v194_v23, %v169_v30 }
  0xe8   :  { %v171_v34 = vpop.f32.mrf.mxu0 }
  0xe9   :  { %v213_v35 = vmul.f32 0.044715, %v209_v31  ;;  %v210_v36 = vmul.f32 %v206_v32, %v202_v29  ;;  %v207_v37 = vmul.f32 %v203_v33, %v203_v33  ;;  %v204_v38 = vadd.f32 %v198_v24, %v171_v34 }
  0xeb   :  { %v217_v39 = vadd.f32 %v213_v35, %v201_v26  ;;  %v214_v40 = vmul.f32 0.044715, %v210_v36  ;;  %v211_v41 = vmul.f32 %v207_v37, %v203_v33  ;;  %v208_v42 = vmul.f32 %v204_v38, %v204_v38 }
  0xed   :  { %v221_v43 = vmul.f32 0.7978846, %v217_v39  ;;  %v218_v44 = vadd.f32 %v214_v40, %v202_v29  ;;  %v215_v45 = vmul.f32 0.044715, %v211_v41  ;;  %v212_v46 = vmul.f32 %v208_v42, %v204_v38 }
  0xef   :  { %306 = vtanh.f32 %v221_v43  ;;  %v222_v47 = vmul.f32 0.7978846, %v218_v44  ;;  %v219_v48 = vadd.f32 %v215_v45, %v203_v33  ;;  %v216_v49 = vmul.f32 0.044715, %v212_v46 }
  0xf1   :  { %308 = vtanh.f32 %v222_v47  ;;  %v223_v50 = vmul.f32 0.7978846, %v219_v48  ;;  %v220_v51 = vadd.f32 %v216_v49, %v204_v38 }
  0xf3   :  { %310 = vtanh.f32 %v223_v50  ;;  %v224_v52 = vmul.f32 0.7978846, %v220_v51 }
  0xf5   :  { %312 = vtanh.f32 %v224_v52 }
  0xfc   :  { %v307_v53 = vpop.eup %306 }
  0xfd   :  { %v229_v54 = vadd.f32 1.0, %v307_v53 }
  0xfe   :  { %v309_v55 = vpop.eup %308 }
  0xff   :  { %v233_v56 = vmul.f32 0.5, %v229_v54  ;;  %v230_v57 = vadd.f32 1.0, %v309_v55 }
 0x100   :  { %v311_v58 = vpop.eup %310 }
 0x101   :  { %v234_v59 = vmul.f32 0.5, %v230_v57  ;;  %v231_v60 = vadd.f32 1.0, %v311_v58  ;;  %v237_v62 = vmul.f32 %v233_v56, %v201_v26 }
 0x102   :  { %v313_v61 = vpop.eup %312 }
 0x103   :  { %v238_v63 = vmul.f32 %v234_v59, %v202_v29  ;;  %v235_v0 = vmul.f32 0.5, %v231_v60  ;;  %v232_v1 = vadd.f32 1.0, %v313_v61 }
 0x105   :  { %v278_v2 = vpack.c.bf16 %v238_v63, %v237_v62  ;;  %v236_v3 = vmul.f32 0.5, %v232_v1  ;;  %v239_v4 = vmul.f32 %v235_v0, %v203_v33 }
 0x107   :  { %253 = vst [vmem:[%s398_s3] sm:$0xff] %v278_v2  ;;  %v240_v5 = vmul.f32 %v236_v3, %v204_v38 }
 0x109   :  { %v279_v6 = vpack.c.bf16 %v240_v5, %v239_v4 }
 0x10b   :  { %254 = vst [vmem:[%s398_s3 + $0x8] sm:$0xff] %v279_v6 }

// kernel: adversary_train_forward.13
= control target key start
LH: loop header
LB: loop body
LE: loop exit
PB: predicated region body
PF: predicated region fallthrough
CT: control target
= control target key end

     0   :  { %s1041_s30 = smov 0   ;;  %s1043_s10 = smov 0   ;;  %s1146_s0 = inlined_call_operand.vmem [shape: bf16[2,8,384], index: 0, kind: input, shape index: {}, may-alias: {0,1,2}]   ;;  %s1147_s1 = inlined_call_operand.vmem [shape: bf16[2,8,384], index: 1, kind: input, shape index: {}, may-alias: {0,1,2}]   ;;  %s1148_s2 = inlined_call_operand.vmem [shape: bf16[2,8,384], index: 2, kind: input, shape index: {}, may-alias: {0,1,2}]   ;;  %s1149_s3 = inlined_call_operand.vmem [shape: s32[2,1,8], index: 3, kind: input, shape index: {}]   ;;  %s1150_s4 = inlined_call_operand.vmem [shape: bf16[128,128], index: 4, kind: input, shape index: {}]   ;;  %s1151_s5 = inlined_call_operand.vmem [shape: f32[1,128], index: 5, kind: input, shape index: {}]   ;;  %s1152_s6 = inlined_call_operand.vmem [shape: f32[2,8,128], index: 6, kind: input, shape index: {}]   ;;  %s1153_s7 = inlined_call_operand.vmem [shape: f32[1,128], index: 7, kind: input, shape index: {}]   ;;  %s1154_s8 = inlined_call_operand.vmem [shape: f32[1,128], index: 8, kind: input, shape index: {}]   ;;  %s1155_s9 = inlined_call_operand.vmem [shape: bf16[2,8,128], index: 9, kind: output, shape index: {}]  }
   0x1   :  { %s1045_s11 = smov 0  }
   0x2 LB: > { %s31_s12 = sadd.s32 1, %s982_s10  ;;  %p855_p0 = scmp.ge.s32.totalorder %s986_s11, 1  ;;  %s986_s11 = sphi %s1045_s11, %s19_s11   ;;  %s982_s10 = sphi %s1043_s10, %s1157_s10   ;;  %s978_s30 = sphi %s1041_s30, %s1156_s30  }
   0x3   : > { %p33_p1 = scmp.ge.s32.totalorder %s31_s12, 2  ;;  %p351_p2 = scmp.lt.s32.totalorder %s986_s11, 3 }
   0x5   : > { %s1159_s12 = smov (%p33_p1, %s31_s12), 0  ;;  %p352_p3 = pnand %p855_p0, %p351_p2 }
   0x6   : > { %p415_p4 = scmp.lt.s32.totalorder (!%p352_p3), %s978_s30, 1 }
   0x7   : > { %355 = sbr.rel (%p352_p3) target bundleno = 1082 (0x43a), region = 56 }
   0xc   : > { %v988_v0 = vmov 0.0   ;;  %vm989_vm0 = vmmov 0   ;;  %s1161_s30 = smov (!%p415_p4, %s978_s30), 1  ;;  %v501_v3 = vlaneseq  ;;  %v990_v7 = vmov 0   ;;  %v950_v25 = vld [vmem:[%s1150_s4 + $0x38] sm:$0xff]   ;;  %v951_v26 = vld [vmem:[%s1150_s4 + $0x30] sm:$0xff]  }
   0xd   : > { %890 = vmatprep.subr.bf16.mxu0 %v988_v0  ;;  %892 = vmatprep.mubr.msk.bf16.mxu0 %vm989_vm0, %v988_v0  ;;  %s1066_s13 = smul.u32 12, %s1161_s30  ;;  %s438_s22 = scalar_lea.vmem %s1149_s3, %s1161_s30  ;;  %vm507_vm3 = vcmask 64512   ;;  %vm521_vm4 = vcmask 1043456   ;;  %v952_v27 = vld [vmem:[%s1150_s4 + $0x28] sm:$0xff]   ;;  %v953_v28 = vld [vmem:[%s1150_s4 + $0x20] sm:$0xff]   ;;  %v954_v29 = vld [vmem:[%s1150_s4 + $0x18] sm:$0xff]  }
   0xe   : > { %902 = vmatprep.subr.bf16.mxu1 %v988_v0  ;;  %918 = vmatprep.mubr.msk.bf16.mxu1 %vm989_vm0, %v988_v0  ;;  %v498_v4 = vld [vmem:[%s438_s22] sm:$0x1]  ;;  %v502_v5 = vshrl.u32 %v501_v3, 7  ;;  %v955_v30 = vld [vmem:[%s1150_s4 + $0x10] sm:$0xff]   ;;  %v956_v31 = vld [vmem:[%s1150_s4 + $0x8] sm:$0xff]   ;;  %s860_s18 = sshll.u32 %s1161_s30, 2 }
   0xf   : > { %s780_s16 = scalar_lea.vmem %s1147_s1, %s1066_s13  ;;  %s423_s19 = scalar_lea.vmem %s1146_s0, %s1066_s13  ;;  %vm499_vm1 = vcmp.ne.s32.totalorder %v498_v4, 0  ;;  %903 = vmatpush3.bf16.msra.mxu1 %v950_v25  ;;  %v957_v32 = vld [vmem:[%s1150_s4] sm:$0xff]  }
  0x10   : > { %v861_v1 = vld [vmem:[%s780_s16 + $0x4] sm:$0xf]  ;;  %v454_v2 = vld [vmem:[%s423_s19] sm:$0xf]  ;;  %v503_v6 = vsub.s32 0, %v502_v5  ;;  %v500_v8 = vsel %vm499_vm1, 1, %v990_v7  ;;  %s784_s25 = scalar_lea.vmem %s1148_s2, %s1066_s13  ;;  %904 = vmatprep.subr.bf16.mxu1 %v988_v0  ;;  %s452_s21 = scalar_lea.vmem %s1155_s9, %s860_s18 }
  0x11   : > { %891 = vmatpush3.bf16.xpose.msra.mxu0 %v861_v1  ;;  %v862_v17 = vld [vmem:[%s784_s25 + $0x8] sm:$0xf]  ;;  %s859_s25 = sshll.u32 %s1161_s30, 3  ;;  %v864_v41 = vld [vmem:[%s1151_s5] ss:$0 sm:$0xff] }
  0x12   : > { %896 = vmatprep.subr.bf16.mxu0 %v988_v0  ;;  %v504_v9 = vrot.slane %v500_v8, %v503_v6  ;;  %v523_v18 = vsel %vm521_vm4, %v862_v17, 0  ;;  %s445_s28 = scalar_lea.vmem %s1152_s6, %s859_s25  ;;  %v873_v57 = vld [vmem:[%s1153_s7] ss:$0 sm:$0xff] }
  0x13   : > { %905 = vmatpush3.bf16.msra.mxu1 %v951_v26  ;;  %v679_v43 = vld [vmem:[%s445_s28] sm:$0xff] }
  0x14   : > { %vm505_vm2 = vcmp.eq.s32.totalorder %v504_v9, 1  ;;  %906 = vmatprep.subr.bf16.mxu1 %v988_v0  ;;  %v874_v59 = vld [vmem:[%s1154_s8] ss:$0 sm:$0xff] }
  0x17   : > { %907 = vmatpush3.bf16.msra.mxu1 %v952_v27 }
  0x18   : > { %893 = vmatmul.mubr.bf16.vlgmr.msra.gmra.mxu0 %v454_v2  ;;  %908 = vmatprep.subr.bf16.mxu1 %v988_v0 }
  0x19   : > { %898 = vmatprep.mubr.msk.bf16.mxu0 %vm989_vm0, %v988_v0  ;;  %897 = vmatpush3.bf16.msra.mxu0 %v523_v18 }
  0x1b   : > { %909 = vmatpush3.bf16.msra.mxu1 %v953_v28 }
  0x1c   : > { %910 = vmatprep.subr.bf16.mxu1 %v988_v0 }
  0x1f   : > { %911 = vmatpush3.bf16.msra.mxu1 %v954_v29 }
  0x20   : > { %912 = vmatprep.subr.bf16.mxu1 %v988_v0 }
  0x23   : > { %913 = vmatpush3.bf16.msra.mxu1 %v955_v30 }
  0x24   : > { %914 = vmatprep.subr.bf16.mxu1 %v988_v0 }
  0x27   : > { %915 = vmatpush3.bf16.msra.mxu1 %v956_v31 }
  0x28   : > { %916 = vmatprep.subr.bf16.mxu1 %v988_v0 }
  0x2b   : > { %917 = vmatpush3.bf16.msra.mxu1 %v957_v32 }
  0xd8   : > { %v491_v10 = vpop.f32.mrf.mxu0 }
  0xd9   : > { %v497_v11 = vmul.f32 0.088388346, %v491_v10 }
  0xda   : > { %v894_v12 = vpop.f32.mrf.mxu0 }
  0xdb   : > { %v506_v13 = vsel %vm505_vm2, %v497_v11, -1e+09 }
  0xdc   : > { %v494_v14 = vpop.f32.mrf.mxu0  ;;  %v508_v15 = vsel %vm507_vm3, %v506_v13, -inf }
  0xdd   : > { %509 = vmax.xlane.f32.xlu0 %v508_v15 }
  0xde   : > { %v895_v16 = vpop.f32.mrf.mxu0 }
 0x166   : > { %v510_v19 = vpop.xlane.xlu0 %509 }
 0x167   : > { %v511_v20 = vsub.f32 %v506_v13, %v510_v19 }
 0x169   : > { %v512_v21 = vmul.f32 1.442695, %v511_v20 }
 0x16b   : > { %958 = vpow2.f32 %v512_v21 }
 0x178   : > { %v959_v22 = vpop.eup %958 }
 0x179   : > { %v514_v23 = vsel %vm507_vm3, %v959_v22, 0.0  ;;  %v517_v24 = vpack.c.bf16 %v959_v22, %v959_v22 }
 0x17a   : > { %515 = vadd.xlane.f32.xlu0 %v514_v23 }
 0x17b   : > { %899 = vmatmul.mubr.msk.bf16.vlgmr.msra.gmra.mxu0 %vm507_vm3, %v517_v24 }
 0x203   : > { %v516_v33 = vpop.xlane.xlu0 %515 }
 0x204   : > { %960 = vrcp.f32 %v516_v33 }
 0x211   : > { %v961_v34 = vpop.eup %960 }
 0x23b   : > { %v559_v35 = vpop.f32.mrf.mxu0 }
 0x23c   : > { %v566_v36 = vmul.f32 %v961_v34, %v559_v35 }
 0x23d   : > { %v900_v37 = vpop.f32.mrf.mxu0 }
 0x23e   : > { %v567_v38 = vpack.c.bf16 %v566_v36, %v566_v36 }
 0x23f   : > { %v562_v39 = vpop.f32.mrf.mxu0 }
 0x240   : > { %919 = vmatmul.mubr.bf16.vlgmr.msra.gmra.mxu1 %v567_v38 }
 0x241   : > { %v901_v40 = vpop.f32.mrf.mxu0 }
 0x300   : > { %v673_v42 = vpop.f32.mrf.mxu1 }
 0x301   : > { %v674_v44 = vadd.f32 %v864_v41, %v673_v42 }
 0x302   : > { %v920_v45 = vpop.f32.mrf.mxu1 }
 0x303   : > { %v680_v46 = vadd.f32 %v679_v43, %v674_v44 }
 0x304   : > { %v676_v47 = vpop.f32.mrf.mxu1 }
 0x305   : > { %681 = vadd.xlane.f32.xlu1 %v680_v46 }
 0x306   : > { %v921_v48 = vpop.f32.mrf.mxu1 }
 0x38e   : > { %v682_v49 = vpop.xlane.xlu1 %681 }
 0x38f   : > { %v684_v50 = vmul.f32 0.0078125, %v682_v49 }
 0x391   : > { %v685_v51 = vsub.f32 %v680_v46, %v684_v50 }
 0x393   : > { %v686_v52 = vmul.f32 %v685_v51, %v685_v51 }
 0x395   : > { %687 = vadd.xlane.f32.xlu1 %v686_v52 }
 0x41e   : > { %v688_v53 = vpop.xlane.xlu1 %687 }
 0x41f   : > { %v689_v54 = vmul.f32 0.0078125, %v688_v53 }
 0x421   : > { %v690_v55 = vadd.f32 1e-05, %v689_v54 }
 0x423   : > { %962 = vrsqrt.f32 %v690_v55 }
 0x430   : > { %v963_v56 = vpop.eup %962 }
 0x431   : > { %v692_v58 = vmul.f32 %v963_v56, %v685_v51 }
 0x433   : > { %v700_v60 = vmul.f32 %v873_v57, %v692_v58 }
 0x435   : > { %v708_v61 = vadd.f32 %v874_v59, %v700_v60 }
 0x437   : > { %v709_v62 = vpack.c.bf16 %v708_v61, %v708_v61 }
 0x439   : > { %710 = vst [vmem:[%s452_s21] sm:$0xf] %v709_v62 }
 0x43a PF: > { %s19_s11 = sadd.s32 1, %s986_s11   ;;  %s1156_s30 = smov %s982_s10 }
 0x43b   : > { %p16_p5 = scmp.ge.s32.totalorder %s19_s11, 4   ;;  %s1157_s10 = smov %s1159_s12 }
 0x43d   :  { %18 = sbr.rel (!%p16_p5) target bundleno = 2 (0x2), region = 98 }

// kernel: adversary_train_forward.12
= control target key start
LH: loop header
LB: loop body
LE: loop exit
PB: predicated region body
PF: predicated region fallthrough
CT: control target
= control target key end

     0   :  { %v446_v0 = vmov 0.0   ;;  %vm447_vm0 = vmmov 0   ;;  %v448_v3 = vmov 0   ;;  %v301_v29 = vlaneseq  ;;  %s562_s1 = inlined_call_operand.vmem [shape: bf16[128,384], index: 1, kind: input, shape index: {}]   ;;  %s563_s0 = inlined_call_operand.vmem [shape: f32[16,128], index: 0, kind: input, shape index: {}]   ;;  %s564_s2 = inlined_call_operand.vmem [shape: f32[1,384], index: 2, kind: input, shape index: {}]   ;;  %s565_s3 = inlined_call_operand.vmem [shape: bf16[16,384], index: 3, kind: output, shape index: {}]  }
   0x1   :  { %391 = vmatprep.subr.bf16.mxu1 %v446_v0  ;;  %v414_v1 = vld [vmem:[%s562_s1 + $0xac] ss:$12 sps:$4 sm:$0xff]   ;;  %407 = vmatprep.mubr.msk.bf16.mxu1 %vm447_vm0, %v446_v0  ;;  %v416_v2 = vld [vmem:[%s562_s1 + $0xb0] ss:$12 sps:$4 sm:$0xff]   ;;  %v417_v4 = vld [vmem:[%s562_s1 + $0xa8] ss:$12 sps:$4 sm:$0xff]  }
   0x2   :  { %226 = vmatprep.mubr.bf16.mxu0 %v448_v3  ;;  %194 = vmatprep.subr.bf16.mxu0 %v414_v1  ;;  %v418_v5 = vld [vmem:[%s562_s1 + $0x94] ss:$12 sps:$4 sm:$0xff]   ;;  %v420_v6 = vld [vmem:[%s562_s1 + $0x98] ss:$12 sps:$4 sm:$0xff]   ;;  %v421_v7 = vld [vmem:[%s562_s1 + $0x90] ss:$12 sps:$4 sm:$0xff]  }
   0x3   :  { %392 = vmatpush3.bf16.msra.mxu1 %v416_v2  ;;  %195 = vmatpush1.bf16.msra.mxu0 %v417_v4  ;;  %v422_v8 = vld [vmem:[%s562_s1 + $0x7c] ss:$12 sps:$4 sm:$0xff]   ;;  %v424_v9 = vld [vmem:[%s562_s1 + $0x80] ss:$12 sps:$4 sm:$0xff]   ;;  %v425_v10 = vld [vmem:[%s562_s1 + $0x78] ss:$12 sps:$4 sm:$0xff]  }
   0x4   :  { %393 = vmatprep.subr.bf16.mxu1 %v446_v0  ;;  %196 = vmatprep.subr.bf16.mxu0 %v418_v5  ;;  %v426_v11 = vld [vmem:[%s562_s1 + $0x64] ss:$12 sps:$4 sm:$0xff]   ;;  %v428_v12 = vld [vmem:[%s562_s1 + $0x68] ss:$12 sps:$4 sm:$0xff]   ;;  %v429_v13 = vld [vmem:[%s562_s1 + $0x60] ss:$12 sps:$4 sm:$0xff]  }
   0x5   :  { %v430_v14 = vld [vmem:[%s562_s1 + $0x4c] ss:$12 sps:$4 sm:$0xff]   ;;  %v432_v15 = vld [vmem:[%s562_s1 + $0x50] ss:$12 sps:$4 sm:$0xff]   ;;  %v433_v16 = vld [vmem:[%s562_s1 + $0x48] ss:$12 sps:$4 sm:$0xff]  }
   0x6   :  { %v434_v17 = vld [vmem:[%s562_s1 + $0x34] ss:$12 sps:$4 sm:$0xff]   ;;  %v436_v18 = vld [vmem:[%s562_s1 + $0x38] ss:$12 sps:$4 sm:$0xff]   ;;  %v437_v19 = vld [vmem:[%s562_s1 + $0x30] ss:$12 sps:$4 sm:$0xff]  }
   0x7   :  { %394 = vmatpush3.bf16.msra.mxu1 %v420_v6  ;;  %197 = vmatpush1.bf16.msra.mxu0 %v421_v7  ;;  %v438_v20 = vld [vmem:[%s562_s1 + $0x1c] ss:$12 sps:$4 sm:$0xff]   ;;  %v440_v21 = vld [vmem:[%s562_s1 + $0x20] ss:$12 sps:$4 sm:$0xff]   ;;  %v441_v22 = vld [vmem:[%s562_s1 + $0x18] ss:$12 sps:$4 sm:$0xff]  }
   0x8   :  { %395 = vmatprep.subr.bf16.mxu1 %v446_v0  ;;  %198 = vmatprep.subr.bf16.mxu0 %v422_v8  ;;  %v442_v23 = vld [vmem:[%s562_s1 + $0x4] ss:$12 sps:$4 sm:$0xff]   ;;  %v444_v24 = vld [vmem:[%s562_s1 + $0x8] ss:$12 sps:$4 sm:$0xff]   ;;  %v445_v27 = vld [vmem:[%s562_s1] ss:$12 sps:$4 sm:$0xff]  }
   0x9   :  { %v31_v25 = vld [vmem:[%s563_s0] sm:$0xff]  ;;  %v32_v26 = vld [vmem:[%s563_s0 + $0x8] sm:$0xff]  ;;  %v302_v30 = vshrl.u32 %v301_v29, 7 }
   0xa   :  { %v33_v28 = vpack.c.bf16 %v32_v26, %v31_v25  ;;  %v299_v32 = vld [vmem:[%s564_s2] sm:$0x7] }
   0xb   :  { %396 = vmatpush3.bf16.msra.mxu1 %v424_v9  ;;  %199 = vmatpush1.bf16.msra.mxu0 %v425_v10  ;;  %v311_v31 = vsub.s32 2, %v302_v30  ;;  %v303_v33 = vsub.s32 0, %v302_v30  ;;  %v307_v34 = vsub.s32 1, %v302_v30 }
   0xc   :  { %397 = vmatprep.subr.bf16.mxu1 %v446_v0  ;;  %200 = vmatprep.subr.bf16.mxu0 %v426_v11 }
   0xd   :  { %v312_v35 = vrot.slane %v299_v32, %v311_v31  ;;  %v304_v37 = vrot.slane %v299_v32, %v303_v33  ;;  %v308_v38 = vrot.slane %v299_v32, %v307_v34 }
   0xf   :  { %398 = vmatpush3.bf16.msra.mxu1 %v428_v12  ;;  %201 = vmatpush1.bf16.msra.mxu0 %v429_v13 }
  0x10   :  { %399 = vmatprep.subr.bf16.mxu1 %v446_v0  ;;  %202 = vmatprep.subr.bf16.mxu0 %v430_v14 }
  0x13   :  { %400 = vmatpush3.bf16.msra.mxu1 %v432_v15  ;;  %203 = vmatpush1.bf16.msra.mxu0 %v433_v16 }
  0x14   :  { %401 = vmatprep.subr.bf16.mxu1 %v446_v0  ;;  %204 = vmatprep.subr.bf16.mxu0 %v434_v17 }
  0x17   :  { %402 = vmatpush3.bf16.msra.mxu1 %v436_v18  ;;  %205 = vmatpush1.bf16.msra.mxu0 %v437_v19 }
  0x18   :  { %403 = vmatprep.subr.bf16.mxu1 %v446_v0  ;;  %206 = vmatprep.subr.bf16.mxu0 %v438_v20 }
  0x1b   :  { %404 = vmatpush3.bf16.msra.mxu1 %v440_v21  ;;  %207 = vmatpush1.bf16.msra.mxu0 %v441_v22 }
  0x1c   :  { %405 = vmatprep.subr.bf16.mxu1 %v446_v0  ;;  %208 = vmatprep.subr.bf16.mxu0 %v442_v23 }
  0x1f   :  { %406 = vmatpush3.bf16.msra.mxu1 %v444_v24  ;;  %209 = vmatpush1.bf16.msra.mxu0 %v445_v27 }
  0x22   :  { %408 = vmatmul.mubr.bf16.vlgmr.msra.gmra.mxu1 %v33_v28  ;;  %227 = vmatmul.mubr.bf16.vlgmr.msra.gmra.mxu0 %v33_v28 }
  0xe2   :  { %v271_v36 = vpop.f32.mrf.mxu1  ;;  %v228_v40 = vpop.f32.mrf.mxu0 }
  0xe3   :  { %v318_v39 = vadd.f32 %v312_v35, %v271_v36  ;;  %v316_v44 = vadd.f32 %v304_v37, %v228_v40 }
  0xe4   :  { %v409_v41 = vpop.f32.mrf.mxu1  ;;  %v230_v43 = vpop.f32.mrf.mxu0 }
  0xe5   :  { %v379_v42 = vpack.c.bf16 %v318_v39, %v318_v39  ;;  %v317_v45 = vadd.f32 %v308_v38, %v230_v43 }
  0xe6   :  { %v274_v46 = vpop.f32.mrf.mxu1  ;;  %v232_v48 = vpop.f32.mrf.mxu0 }
  0xe7   :  { %343 = vst [vmem:[%s565_s3 + $0x8] sm:$0xf] %v379_v42  ;;  %v321_v47 = vadd.f32 %v312_v35, %v274_v46  ;;  %v378_v49 = vpack.c.bf16 %v317_v45, %v316_v44  ;;  %v319_v53 = vadd.f32 %v304_v37, %v232_v48 }
  0xe8   :  { %v410_v50 = vpop.f32.mrf.mxu1  ;;  %v234_v52 = vpop.f32.mrf.mxu0 }
  0xe9   :  { %v381_v51 = vpack.c.bf16 %v321_v47, %v321_v47  ;;  %342 = vst [vmem:[%s565_s3] sm:$0xff] %v378_v49  ;;  %v320_v54 = vadd.f32 %v308_v38, %v234_v52 }
  0xeb   :  { %345 = vst [vmem:[%s565_s3 + $0x14] sm:$0xf] %v381_v51  ;;  %v380_v55 = vpack.c.bf16 %v320_v54, %v319_v53 }
  0xed   :  { %344 = vst [vmem:[%s565_s3 + $0xc] sm:$0xff] %v380_v55 }

// kernel: adversary_train_forward.19
= control target key start
LH: loop header
LB: loop body
LE: loop exit
PB: predicated region body
PF: predicated region fallthrough
CT: control target
= control target key end

     0   :  { %v270_v1 = vmov 0   ;;  %v191_v18 = vlaneseq  ;;  %s351_s1 = inlined_call_operand.vmem [shape: bf16[128,256], index: 1, kind: input, shape index: {}]   ;;  %s352_s0 = inlined_call_operand.vmem [shape: bf16[16,128], index: 0, kind: input, shape index: {}]   ;;  %s353_s2 = inlined_call_operand.vmem [shape: f32[1,256], index: 2, kind: input, shape index: {}]   ;;  %s354_s3 = inlined_call_operand.vmem [shape: bf16[16,256], index: 3, kind: output, shape index: {}]  }
   0x1   :  { %v245_v0 = vld [vmem:[%s351_s1 + $0x74] ss:$8 sps:$4 sm:$0xff]   ;;  %163 = vmatprep.mubr.bf16.mxu0 %v270_v1  ;;  %v247_v2 = vld [vmem:[%s351_s1 + $0x70] ss:$8 sps:$4 sm:$0xff]   ;;  %v248_v3 = vld [vmem:[%s351_s1 + $0x64] ss:$8 sps:$4 sm:$0xff]  }
   0x2   :  { %131 = vmatprep.subr.bf16.mxu0 %v245_v0  ;;  %v250_v4 = vld [vmem:[%s351_s1 + $0x60] ss:$8 sps:$4 sm:$0xff]   ;;  %v251_v5 = vld [vmem:[%s351_s1 + $0x54] ss:$8 sps:$4 sm:$0xff]   ;;  %v253_v6 = vld [vmem:[%s351_s1 + $0x50] ss:$8 sps:$4 sm:$0xff]  }
   0x3   :  { %132 = vmatpush1.bf16.msra.mxu0 %v247_v2  ;;  %v254_v7 = vld [vmem:[%s351_s1 + $0x44] ss:$8 sps:$4 sm:$0xff]   ;;  %v256_v8 = vld [vmem:[%s351_s1 + $0x40] ss:$8 sps:$4 sm:$0xff]   ;;  %v257_v9 = vld [vmem:[%s351_s1 + $0x34] ss:$8 sps:$4 sm:$0xff]  }
   0x4   :  { %133 = vmatprep.subr.bf16.mxu0 %v248_v3  ;;  %v259_v10 = vld [vmem:[%s351_s1 + $0x30] ss:$8 sps:$4 sm:$0xff]   ;;  %v260_v11 = vld [vmem:[%s351_s1 + $0x24] ss:$8 sps:$4 sm:$0xff]   ;;  %v262_v12 = vld [vmem:[%s351_s1 + $0x20] ss:$8 sps:$4 sm:$0xff]  }
   0x5   :  { %v263_v13 = vld [vmem:[%s351_s1 + $0x14] ss:$8 sps:$4 sm:$0xff]   ;;  %v265_v14 = vld [vmem:[%s351_s1 + $0x10] ss:$8 sps:$4 sm:$0xff]   ;;  %v266_v15 = vld [vmem:[%s351_s1 + $0x4] ss:$8 sps:$4 sm:$0xff]  }
   0x6   :  { %v268_v16 = vld [vmem:[%s351_s1] ss:$8 sps:$4 sm:$0xff]   ;;  %v192_v19 = vshrl.u32 %v191_v18, 7 }
   0x7   :  { %134 = vmatpush1.bf16.msra.mxu0 %v250_v4  ;;  %v269_v17 = vld [vmem:[%s352_s0] sm:$0xff]  }
   0x8   :  { %135 = vmatprep.subr.bf16.mxu0 %v251_v5  ;;  %v193_v20 = vsub.s32 0, %v192_v19  ;;  %v197_v21 = vsub.s32 1, %v192_v19  ;;  %v189_v22 = vld [vmem:[%s353_s2] sm:$0x3] }
   0xa   :  { %v194_v23 = vrot.slane %v189_v22, %v193_v20  ;;  %v198_v24 = vrot.slane %v189_v22, %v197_v21 }
   0xb   :  { %136 = vmatpush1.bf16.msra.mxu0 %v253_v6 }
   0xc   :  { %137 = vmatprep.subr.bf16.mxu0 %v254_v7 }
   0xf   :  { %138 = vmatpush1.bf16.msra.mxu0 %v256_v8 }
  0x10   :  { %139 = vmatprep.subr.bf16.mxu0 %v257_v9 }
  0x13   :  { %140 = vmatpush1.bf16.msra.mxu0 %v259_v10 }
  0x14   :  { %141 = vmatprep.subr.bf16.mxu0 %v260_v11 }
  0x17   :  { %142 = vmatpush1.bf16.msra.mxu0 %v262_v12 }
  0x18   :  { %143 = vmatprep.subr.bf16.mxu0 %v263_v13 }
  0x1b   :  { %144 = vmatpush1.bf16.msra.mxu0 %v265_v14 }
  0x1c   :  { %145 = vmatprep.subr.bf16.mxu0 %v266_v15 }
  0x1f   :  { %146 = vmatpush1.bf16.msra.mxu0 %v268_v16 }
  0x22   :  { %164 = vmatmul.mubr.bf16.vlgmr.msra.gmra.mxu0 %v269_v17 }
  0xe2   :  { %v165_v25 = vpop.f32.mrf.mxu0 }
  0xe3   :  { %v201_v27 = vadd.f32 %v194_v23, %v165_v25 }
  0xe4   :  { %v167_v26 = vpop.f32.mrf.mxu0 }
  0xe5   :  { %v202_v28 = vadd.f32 %v198_v24, %v167_v26 }
  0xe6   :  { %v169_v29 = vpop.f32.mrf.mxu0 }
  0xe7   :  { %v242_v30 = vpack.c.bf16 %v202_v28, %v201_v27  ;;  %v203_v32 = vadd.f32 %v194_v23, %v169_v29 }
  0xe8   :  { %v171_v31 = vpop.f32.mrf.mxu0 }
  0xe9   :  { %217 = vst [vmem:[%s354_s3] sm:$0xff] %v242_v30  ;;  %v204_v33 = vadd.f32 %v198_v24, %v171_v31 }
  0xeb   :  { %v243_v34 = vpack.c.bf16 %v204_v33, %v203_v32 }
  0xed   :  { %218 = vst [vmem:[%s354_s3 + $0x8] sm:$0xff] %v243_v34 }

// kernel: adversary_train_forward.18
= control target key start
LH: loop header
LB: loop body
LE: loop exit
PB: predicated region body
PF: predicated region fallthrough
CT: control target
= control target key end

     0   :  { %v227_v0 = vmov 0.0   ;;  %vm228_vm0 = vmmov 0   ;;  %s282_s1 = inlined_call_operand.vmem [shape: bf16[128,128], index: 1, kind: input, shape index: {}]   ;;  %s283_s0 = inlined_call_operand.vmem [shape: bf16[16,128], index: 0, kind: input, shape index: {}]   ;;  %s284_s2 = inlined_call_operand.vmem [shape: f32[1,128], index: 2, kind: input, shape index: {}]   ;;  %s285_s3 = inlined_call_operand.vmem [shape: bf16[16,128], index: 3, kind: output, shape index: {}]  }
   0x1   :  { %196 = vmatprep.subr.bf16.mxu0 %v227_v0  ;;  %v218_v1 = vld [vmem:[%s282_s1 + $0x38] sm:$0xff]   ;;  %212 = vmatprep.mubr.msk.bf16.mxu0 %vm228_vm0, %v227_v0  ;;  %v219_v2 = vld [vmem:[%s282_s1 + $0x30] sm:$0xff]   ;;  %v220_v3 = vld [vmem:[%s282_s1 + $0x28] sm:$0xff]  }
   0x2   :  { %197 = vmatpush3.bf16.msra.mxu0 %v218_v1  ;;  %v221_v4 = vld [vmem:[%s282_s1 + $0x20] sm:$0xff]   ;;  %v222_v5 = vld [vmem:[%s282_s1 + $0x18] sm:$0xff]   ;;  %v223_v6 = vld [vmem:[%s282_s1 + $0x10] sm:$0xff]  }
   0x3   :  { %198 = vmatprep.subr.bf16.mxu0 %v227_v0  ;;  %v224_v7 = vld [vmem:[%s282_s1 + $0x8] sm:$0xff]   ;;  %v225_v8 = vld [vmem:[%s282_s1] sm:$0xff]  }
   0x4   :  { %v226_v9 = vld [vmem:[%s283_s0] sm:$0xff]  }
   0x5   :  { %v177_v11 = vld [vmem:[%s284_s2] ss:$0 sm:$0xff] }
   0x6   :  { %199 = vmatpush3.bf16.msra.mxu0 %v219_v2 }
   0x7   :  { %200 = vmatprep.subr.bf16.mxu0 %v227_v0 }
   0xa   :  { %201 = vmatpush3.bf16.msra.mxu0 %v220_v3 }
   0xb   :  { %202 = vmatprep.subr.bf16.mxu0 %v227_v0 }
   0xe   :  { %203 = vmatpush3.bf16.msra.mxu0 %v221_v4 }
   0xf   :  { %204 = vmatprep.subr.bf16.mxu0 %v227_v0 }
  0x12   :  { %205 = vmatpush3.bf16.msra.mxu0 %v222_v5 }
  0x13   :  { %206 = vmatprep.subr.bf16.mxu0 %v227_v0 }
  0x16   :  { %207 = vmatpush3.bf16.msra.mxu0 %v223_v6 }
  0x17   :  { %208 = vmatprep.subr.bf16.mxu0 %v227_v0 }
  0x1a   :  { %209 = vmatpush3.bf16.msra.mxu0 %v224_v7 }
  0x1b   :  { %210 = vmatprep.subr.bf16.mxu0 %v227_v0 }
  0x1e   :  { %211 = vmatpush3.bf16.msra.mxu0 %v225_v8 }
  0x21   :  { %213 = vmatmul.mubr.bf16.vlgmr.msra.gmra.mxu0 %v226_v9 }
  0xe1   :  { %v129_v10 = vpop.f32.mrf.mxu0 }
  0xe2   :  { %v152_v14 = vadd.f32 %v177_v11, %v129_v10 }
  0xe3   :  { %v214_v12 = vpop.f32.mrf.mxu0 }
  0xe5   :  { %v132_v13 = vpop.f32.mrf.mxu0 }
  0xe6   :  { %v153_v15 = vadd.f32 %v177_v11, %v132_v13 }
  0xe7   :  { %v215_v16 = vpop.f32.mrf.mxu0 }
  0xe8   :  { %v185_v17 = vpack.c.bf16 %v153_v15, %v152_v14 }
  0xea   :  { %186 = vst [vmem:[%s285_s3] sm:$0xff] %v185_v17  }

// kernel: adversary_train_forward.17
= control target key start
LH: loop header
LB: loop body
LE: loop exit
PB: predicated region body
PF: predicated region fallthrough
CT: control target
= control target key end

     0   :  { %s1050_s30 = smov 0   ;;  %s1052_s10 = smov 0   ;;  %s1155_s0 = inlined_call_operand.vmem [shape: bf16[2,8,384], index: 0, kind: input, shape index: {}, may-alias: {0,1,2}]   ;;  %s1156_s1 = inlined_call_operand.vmem [shape: bf16[2,8,384], index: 1, kind: input, shape index: {}, may-alias: {0,1,2}]   ;;  %s1157_s2 = inlined_call_operand.vmem [shape: bf16[2,8,384], index: 2, kind: input, shape index: {}, may-alias: {0,1,2}]   ;;  %s1158_s3 = inlined_call_operand.vmem [shape: s32[2,1,8], index: 3, kind: input, shape index: {}]   ;;  %s1159_s4 = inlined_call_operand.vmem [shape: bf16[128,128], index: 4, kind: input, shape index: {}]   ;;  %s1160_s5 = inlined_call_operand.vmem [shape: f32[1,128], index: 5, kind: input, shape index: {}]   ;;  %s1161_s6 = inlined_call_operand.vmem [shape: f32[2,8,128], index: 6, kind: input, shape index: {}]   ;;  %s1162_s7 = inlined_call_operand.vmem [shape: f32[1,128], index: 7, kind: input, shape index: {}]   ;;  %s1163_s8 = inlined_call_operand.vmem [shape: f32[1,128], index: 8, kind: input, shape index: {}]   ;;  %s1164_s9 = inlined_call_operand.vmem [shape: bf16[2,8,128], index: 9, kind: output, shape index: {}]  }
   0x1   :  { %s1054_s11 = smov 0  }
   0x2 LB: > { %s31_s12 = sadd.s32 1, %s991_s10  ;;  %p864_p0 = scmp.ge.s32.totalorder %s995_s11, 1  ;;  %s995_s11 = sphi %s1054_s11, %s19_s11   ;;  %s991_s10 = sphi %s1052_s10, %s1166_s10   ;;  %s987_s30 = sphi %s1050_s30, %s1165_s30  }
   0x3   : > { %p33_p1 = scmp.ge.s32.totalorder %s31_s12, 2  ;;  %p351_p2 = scmp.lt.s32.totalorder %s995_s11, 3 }
   0x5   : > { %s1168_s12 = smov (%p33_p1, %s31_s12), 0  ;;  %p352_p3 = pnand %p864_p0, %p351_p2 }
   0x6   : > { %p415_p4 = scmp.lt.s32.totalorder (!%p352_p3), %s987_s30, 1 }
   0x7   : > { %355 = sbr.rel (%p352_p3) target bundleno = 1082 (0x43a), region = 56 }
   0xc   : > { %v997_v0 = vmov 0.0   ;;  %vm998_vm0 = vmmov 0   ;;  %s1170_s30 = smov (!%p415_p4, %s987_s30), 1  ;;  %v500_v3 = vlaneseq  ;;  %v999_v7 = vmov 0   ;;  %v959_v26 = vld [vmem:[%s1159_s4 + $0x38] sm:$0xff]   ;;  %v960_v27 = vld [vmem:[%s1159_s4 + $0x30] sm:$0xff]  }
   0xd   : > { %899 = vmatprep.subr.bf16.mxu0 %v997_v0  ;;  %901 = vmatprep.mubr.msk.bf16.mxu0 %vm998_vm0, %v997_v0  ;;  %s1075_s13 = smul.u32 12, %s1170_s30  ;;  %s438_s22 = scalar_lea.vmem %s1158_s3, %s1170_s30  ;;  %vm516_vm5 = vcmask 64512   ;;  %vm530_vm6 = vcmask 1043456   ;;  %v961_v28 = vld [vmem:[%s1159_s4 + $0x28] sm:$0xff]   ;;  %v962_v29 = vld [vmem:[%s1159_s4 + $0x20] sm:$0xff]   ;;  %v963_v30 = vld [vmem:[%s1159_s4 + $0x18] sm:$0xff]  }
   0xe   : > { %911 = vmatprep.subr.bf16.mxu1 %v997_v0  ;;  %927 = vmatprep.mubr.msk.bf16.mxu1 %vm998_vm0, %v997_v0  ;;  %v498_v4 = vld [vmem:[%s438_s22] sm:$0x1]  ;;  %v501_v5 = vshrl.u32 %v500_v3, 7  ;;  %v506_v9 = vand.u32 127, %v500_v3  ;;  %v964_v31 = vld [vmem:[%s1159_s4 + $0x10] sm:$0xff]   ;;  %v965_v32 = vld [vmem:[%s1159_s4 + $0x8] sm:$0xff]  }
   0xf   : > { %s789_s16 = scalar_lea.vmem %s1156_s1, %s1075_s13  ;;  %s423_s19 = scalar_lea.vmem %s1155_s0, %s1075_s13  ;;  %vm499_vm1 = vcmp.ne.s32.totalorder %v498_v4, 0  ;;  %912 = vmatpush3.bf16.msra.mxu1 %v959_v26  ;;  %v966_v33 = vld [vmem:[%s1159_s4] sm:$0xff]  }
  0x10   : > { %v870_v1 = vld [vmem:[%s789_s16 + $0x4] sm:$0xf]  ;;  %v454_v2 = vld [vmem:[%s423_s19] sm:$0xf]  ;;  %v511_v6 = vsub.s32 0, %v501_v5  ;;  %v508_v8 = vsel %vm499_vm1, 1, %v999_v7  ;;  %vm507_vm2 = vcmp.ge.s32.totalorder %v501_v5, %v506_v9  ;;  %s793_s25 = scalar_lea.vmem %s1157_s2, %s1075_s13  ;;  %913 = vmatprep.subr.bf16.mxu1 %v997_v0 }
  0x11   : > { %900 = vmatpush3.bf16.xpose.msra.mxu0 %v870_v1  ;;  %v871_v18 = vld [vmem:[%s793_s25 + $0x8] sm:$0xf]  ;;  %s868_s25 = sshll.u32 %s1170_s30, 3  ;;  %v873_v42 = vld [vmem:[%s1160_s5] ss:$0 sm:$0xff]  ;;  %s869_s18 = sshll.u32 %s1170_s30, 2 }
  0x12   : > { %905 = vmatprep.subr.bf16.mxu0 %v997_v0  ;;  %v512_v10 = vrot.slane %v508_v8, %v511_v6  ;;  %v532_v19 = vsel %vm530_vm6, %v871_v18, 0  ;;  %s445_s28 = scalar_lea.vmem %s1161_s6, %s868_s25  ;;  %v882_v58 = vld [vmem:[%s1162_s7] ss:$0 sm:$0xff]  ;;  %s452_s21 = scalar_lea.vmem %s1164_s9, %s869_s18 }
  0x13   : > { %914 = vmatpush3.bf16.msra.mxu1 %v960_v27  ;;  %v688_v44 = vld [vmem:[%s445_s28] sm:$0xff] }
  0x14   : > { %vm513_vm3 = vcmp.eq.s32.totalorder %v512_v10, 1  ;;  %915 = vmatprep.subr.bf16.mxu1 %v997_v0  ;;  %v883_v60 = vld [vmem:[%s1163_s8] ss:$0 sm:$0xff] }
  0x15   : > { %vm514_vm4 = vmand %vm513_vm3, %vm507_vm2 }
  0x17   : > { %916 = vmatpush3.bf16.msra.mxu1 %v961_v28 }
  0x18   : > { %902 = vmatmul.mubr.bf16.vlgmr.msra.gmra.mxu0 %v454_v2  ;;  %917 = vmatprep.subr.bf16.mxu1 %v997_v0 }
  0x19   : > { %907 = vmatprep.mubr.msk.bf16.mxu0 %vm998_vm0, %v997_v0  ;;  %906 = vmatpush3.bf16.msra.mxu0 %v532_v19 }
  0x1b   : > { %918 = vmatpush3.bf16.msra.mxu1 %v962_v29 }
  0x1c   : > { %919 = vmatprep.subr.bf16.mxu1 %v997_v0 }
  0x1f   : > { %920 = vmatpush3.bf16.msra.mxu1 %v963_v30 }
  0x20   : > { %921 = vmatprep.subr.bf16.mxu1 %v997_v0 }
  0x23   : > { %922 = vmatpush3.bf16.msra.mxu1 %v964_v31 }
  0x24   : > { %923 = vmatprep.subr.bf16.mxu1 %v997_v0 }
  0x27   : > { %924 = vmatpush3.bf16.msra.mxu1 %v965_v32 }
  0x28   : > { %925 = vmatprep.subr.bf16.mxu1 %v997_v0 }
  0x2b   : > { %926 = vmatpush3.bf16.msra.mxu1 %v966_v33 }
  0xd8   : > { %v491_v11 = vpop.f32.mrf.mxu0 }
  0xd9   : > { %v497_v12 = vmul.f32 0.088388346, %v491_v11 }
  0xda   : > { %v903_v13 = vpop.f32.mrf.mxu0 }
  0xdb   : > { %v515_v14 = vsel %vm514_vm4, %v497_v12, -1e+09 }
  0xdc   : > { %v494_v15 = vpop.f32.mrf.mxu0  ;;  %v517_v16 = vsel %vm516_vm5, %v515_v14, -inf }
  0xdd   : > { %518 = vmax.xlane.f32.xlu0 %v517_v16 }
  0xde   : > { %v904_v17 = vpop.f32.mrf.mxu0 }
 0x166   : > { %v519_v20 = vpop.xlane.xlu0 %518 }
 0x167   : > { %v520_v21 = vsub.f32 %v515_v14, %v519_v20 }
 0x169   : > { %v521_v22 = vmul.f32 1.442695, %v520_v21 }
 0x16b   : > { %967 = vpow2.f32 %v521_v22 }
 0x178   : > { %v968_v23 = vpop.eup %967 }
 0x179   : > { %v523_v24 = vsel %vm516_vm5, %v968_v23, 0.0  ;;  %v526_v25 = vpack.c.bf16 %v968_v23, %v968_v23 }
 0x17a   : > { %524 = vadd.xlane.f32.xlu0 %v523_v24 }
 0x17b   : > { %908 = vmatmul.mubr.msk.bf16.vlgmr.msra.gmra.mxu0 %vm516_vm5, %v526_v25 }
 0x203   : > { %v525_v34 = vpop.xlane.xlu0 %524 }
 0x204   : > { %969 = vrcp.f32 %v525_v34 }
 0x211   : > { %v970_v35 = vpop.eup %969 }
 0x23b   : > { %v568_v36 = vpop.f32.mrf.mxu0 }
 0x23c   : > { %v575_v37 = vmul.f32 %v970_v35, %v568_v36 }
 0x23d   : > { %v909_v38 = vpop.f32.mrf.mxu0 }
 0x23e   : > { %v576_v39 = vpack.c.bf16 %v575_v37, %v575_v37 }
 0x23f   : > { %v571_v40 = vpop.f32.mrf.mxu0 }
 0x240   : > { %928 = vmatmul.mubr.bf16.vlgmr.msra.gmra.mxu1 %v576_v39 }
 0x241   : > { %v910_v41 = vpop.f32.mrf.mxu0 }
 0x300   : > { %v682_v43 = vpop.f32.mrf.mxu1 }
 0x301   : > { %v683_v45 = vadd.f32 %v873_v42, %v682_v43 }
 0x302   : > { %v929_v46 = vpop.f32.mrf.mxu1 }
 0x303   : > { %v689_v47 = vadd.f32 %v688_v44, %v683_v45 }
 0x304   : > { %v685_v48 = vpop.f32.mrf.mxu1 }
 0x305   : > { %690 = vadd.xlane.f32.xlu1 %v689_v47 }
 0x306   : > { %v930_v49 = vpop.f32.mrf.mxu1 }
 0x38e   : > { %v691_v50 = vpop.xlane.xlu1 %690 }
 0x38f   : > { %v693_v51 = vmul.f32 0.0078125, %v691_v50 }
 0x391   : > { %v694_v52 = vsub.f32 %v689_v47, %v693_v51 }
 0x393   : > { %v695_v53 = vmul.f32 %v694_v52, %v694_v52 }
 0x395   : > { %696 = vadd.xlane.f32.xlu1 %v695_v53 }
 0x41e   : > { %v697_v54 = vpop.xlane.xlu1 %696 }
 0x41f   : > { %v698_v55 = vmul.f32 0.0078125, %v697_v54 }
 0x421   : > { %v699_v56 = vadd.f32 1e-05, %v698_v55 }
 0x423   : > { %971 = vrsqrt.f32 %v699_v56 }
 0x430   : > { %v972_v57 = vpop.eup %971 }
 0x431   : > { %v701_v59 = vmul.f32 %v972_v57, %v694_v52 }
 0x433   : > { %v709_v61 = vmul.f32 %v882_v58, %v701_v59 }
 0x435   : > { %v717_v62 = vadd.f32 %v883_v60, %v709_v61 }
 0x437   : > { %v718_v63 = vpack.c.bf16 %v717_v62, %v717_v62 }
 0x439   : > { %719 = vst [vmem:[%s452_s21] sm:$0xf] %v718_v63 }
 0x43a PF: > { %s19_s11 = sadd.s32 1, %s995_s11   ;;  %s1165_s30 = smov %s991_s10 }
 0x43b   : > { %p16_p5 = scmp.ge.s32.totalorder %s19_s11, 4   ;;  %s1166_s10 = smov %s1168_s12 }
 0x43d   :  { %18 = sbr.rel (!%p16_p5) target bundleno = 2 (0x2), region = 98 }

// kernel: squeeze.3
= control target key start
LH: loop header
LB: loop body
LE: loop exit
PB: predicated region body
PF: predicated region fallthrough
CT: control target
= control target key end

     0   :  { %vm8_vm0 = vcmask 64512   ;;  %s42_s0 = inlined_call_operand.vmem [shape: f32[16], index: 0, kind: input, shape index: {}]   ;;  %s43_s1 = inlined_call_operand.vmem [shape: f32[2,8], index: 1, kind: output, shape index: {}]  }
   0x1   :  { %v5_v0 = vld [vmem:[%s42_s0] sm:$0x1]  ;;  %s25_s0 = smov 120  }
   0x2   :  { %6 = vst [vmem:[#allocation1] sm:$0x1] %v5_v0 }
   0x9   :  { %v10_v1 = vld [vmem:[#allocation1] sm:$0x1]  }
   0xa   :  { %v7_v2 = vld [vmem:[#allocation1] sm:$0x1]   ;;  %11 = vrot.lane.b32.xlu0 %v10_v1, %s25_s0 }
   0xb   :  { %9 = vst.msk [vmem:[#allocation0] sm:$0x1] %vm8_vm0, %v7_v2  }
  0x7c   :  { %v12_v3 = vpop.permute.xlu0 %11  }
  0x7d   :  { %15 = vst.msk [vmem:[#allocation0 + $0x1] sm:$0x1] %vm8_vm0, %v12_v3  }
  0x84   :  { %v20_v4 = vld [vmem:[#allocation0] sm:$0x3] }
  0x85   :  { %23 = vst [vmem:[%s43_s1] sm:$0x3] %v20_v4 }

// kernel: adversary_train_forward.20
= control target key start
LH: loop header
LB: loop body
LE: loop exit
PB: predicated region body
PF: predicated region fallthrough
CT: control target
= control target key end

     0   :  { %s1023_s30 = smov 0   ;;  %s1025_s10 = smov 0   ;;  %s1131_s0 = inlined_call_operand.vmem [shape: bf16[2,8,128], index: 0, kind: input, shape index: {}]   ;;  %s1132_s1 = inlined_call_operand.vmem [shape: bf16[2,8,256], index: 1, kind: input, shape index: {}, may-alias: {1,2}]   ;;  %s1133_s2 = inlined_call_operand.vmem [shape: bf16[2,8,256], index: 2, kind: input, shape index: {}, may-alias: {1,2}]   ;;  %s1134_s3 = inlined_call_operand.vmem [shape: s32[2,1,8], index: 3, kind: input, shape index: {}]   ;;  %s1135_s4 = inlined_call_operand.vmem [shape: bf16[128,128], index: 4, kind: input, shape index: {}]   ;;  %s1136_s5 = inlined_call_operand.vmem [shape: f32[1,128], index: 5, kind: input, shape index: {}]   ;;  %s1137_s6 = inlined_call_operand.vmem [shape: bf16[2,8,128], index: 6, kind: input, shape index: {}]   ;;  %s1138_s7 = inlined_call_operand.vmem [shape: f32[1,128], index: 7, kind: input, shape index: {}]   ;;  %s1139_s8 = inlined_call_operand.vmem [shape: f32[1,128], index: 8, kind: input, shape index: {}]   ;;  %s1140_s9 = inlined_call_operand.vmem [shape: bf16[2,8,128], index: 9, kind: output, shape index: {}]  }
   0x1   :  { %s1027_s11 = smov 0  }
   0x2 LB: > { %s31_s12 = sadd.s32 1, %s964_s10  ;;  %p835_p0 = scmp.ge.s32.totalorder %s968_s11, 1  ;;  %s968_s11 = sphi %s1027_s11, %s19_s11   ;;  %s964_s10 = sphi %s1025_s10, %s1142_s10   ;;  %s960_s30 = sphi %s1023_s30, %s1141_s30  }
   0x3   : > { %p33_p1 = scmp.ge.s32.totalorder %s31_s12, 2  ;;  %p348_p2 = scmp.lt.s32.totalorder %s968_s11, 3 }
   0x5   : > { %s1144_s12 = smov (%p33_p1, %s31_s12), 0  ;;  %p349_p3 = pnand %p835_p0, %p348_p2 }
   0x6   : > { %p409_p4 = scmp.lt.s32.totalorder (!%p349_p3), %s960_s30, 1 }
   0x7   : > { %352 = sbr.rel (%p349_p3) target bundleno = 1081 (0x439), region = 56 }
   0xc   : > { %v970_v0 = vmov 0.0   ;;  %vm971_vm0 = vmmov 0   ;;  %s1146_s30 = smov (!%p409_p4, %s960_s30), 1  ;;  %v492_v3 = vlaneseq  ;;  %v972_v7 = vmov 0   ;;  %v932_v25 = vld [vmem:[%s1135_s4 + $0x38] sm:$0xff]   ;;  %v933_v26 = vld [vmem:[%s1135_s4 + $0x30] sm:$0xff]  }
   0xd   : > { %873 = vmatprep.subr.bf16.mxu0 %v970_v0  ;;  %875 = vmatprep.mubr.msk.bf16.mxu0 %vm971_vm0, %v970_v0  ;;  %s858_s13 = sshll.u32 %s1146_s30, 3  ;;  %s1049_s14 = sshll.u32 %s1146_s30, 2  ;;  %vm498_vm3 = vcmask 64512   ;;  %vm512_vm4 = vcmask 1043456   ;;  %v934_v27 = vld [vmem:[%s1135_s4 + $0x28] sm:$0xff]   ;;  %v935_v28 = vld [vmem:[%s1135_s4 + $0x20] sm:$0xff]  }
   0xe   : > { %885 = vmatprep.subr.bf16.mxu1 %v970_v0  ;;  %901 = vmatprep.mubr.msk.bf16.mxu1 %vm971_vm0, %v970_v0  ;;  %s420_s17 = scalar_lea.vmem %s1132_s1, %s858_s13  ;;  %s415_s20 = scalar_lea.vmem %s1131_s0, %s1049_s14  ;;  %v493_v5 = vshrl.u32 %v492_v3, 7  ;;  %v936_v29 = vld [vmem:[%s1135_s4 + $0x18] sm:$0xff]   ;;  %v937_v30 = vld [vmem:[%s1135_s4 + $0x10] sm:$0xff]   ;;  %v938_v31 = vld [vmem:[%s1135_s4 + $0x8] sm:$0xff]  }
   0xf   : > { %v446_v1 = vld [vmem:[%s420_s17] sm:$0xf]  ;;  %s429_s23 = scalar_lea.vmem %s1134_s3, %s1146_s30  ;;  %s764_s26 = scalar_lea.vmem %s1133_s2, %s858_s13  ;;  %886 = vmatpush3.bf16.msra.mxu1 %v932_v25 }
  0x10   : > { %874 = vmatpush3.bf16.xpose.msra.mxu0 %v446_v1  ;;  %v445_v2 = vld [vmem:[%s415_s20] sm:$0xf]  ;;  %v494_v6 = vsub.s32 0, %v493_v5  ;;  %v843_v17 = vld [vmem:[%s764_s26 + $0x4] sm:$0xf]  ;;  %887 = vmatprep.subr.bf16.mxu1 %v970_v0  ;;  %s436_s28 = scalar_lea.vmem %s1137_s6, %s1049_s14  ;;  %s443_s20 = scalar_lea.vmem %s1140_s9, %s1049_s14 }
  0x11   : > { %879 = vmatprep.subr.bf16.mxu0 %v970_v0  ;;  %v489_v4 = vld [vmem:[%s429_s23] sm:$0x1]  ;;  %v514_v18 = vsel %vm512_vm4, %v843_v17, 0 }
  0x12   : > { %vm490_vm1 = vcmp.ne.s32.totalorder %v489_v4, 0  ;;  %v939_v32 = vld [vmem:[%s1135_s4] sm:$0xff]  }
  0x13   : > { %v491_v8 = vsel %vm490_vm1, 1, %v972_v7  ;;  %888 = vmatpush3.bf16.msra.mxu1 %v933_v26  ;;  %v670_v41 = vld [vmem:[%s436_s28] sm:$0xf] }
  0x14   : > { %v495_v9 = vrot.slane %v491_v8, %v494_v6  ;;  %889 = vmatprep.subr.bf16.mxu1 %v970_v0  ;;  %v845_v42 = vld [vmem:[%s1136_s5] ss:$0 sm:$0xff]  ;;  %v671_v43 = vunpack.c.l.bf16 %v670_v41 }
  0x15   : > { %v854_v58 = vld [vmem:[%s1138_s7] ss:$0 sm:$0xff] }
  0x16   : > { %vm496_vm2 = vcmp.eq.s32.totalorder %v495_v9, 1  ;;  %v855_v60 = vld [vmem:[%s1139_s8] ss:$0 sm:$0xff] }
  0x17   : > { %876 = vmatmul.mubr.bf16.vlgmr.msra.gmra.mxu0 %v445_v2  ;;  %890 = vmatpush3.bf16.msra.mxu1 %v934_v27 }
  0x18   : > { %881 = vmatprep.mubr.msk.bf16.mxu0 %vm971_vm0, %v970_v0  ;;  %880 = vmatpush3.bf16.msra.mxu0 %v514_v18 }
  0x19   : > { %891 = vmatprep.subr.bf16.mxu1 %v970_v0 }
  0x1b   : > { %892 = vmatpush3.bf16.msra.mxu1 %v935_v28 }
  0x1c   : > { %893 = vmatprep.subr.bf16.mxu1 %v970_v0 }
  0x1f   : > { %894 = vmatpush3.bf16.msra.mxu1 %v936_v29 }
  0x20   : > { %895 = vmatprep.subr.bf16.mxu1 %v970_v0 }
  0x23   : > { %896 = vmatpush3.bf16.msra.mxu1 %v937_v30 }
  0x24   : > { %897 = vmatprep.subr.bf16.mxu1 %v970_v0 }
  0x27   : > { %898 = vmatpush3.bf16.msra.mxu1 %v938_v31 }
  0x28   : > { %899 = vmatprep.subr.bf16.mxu1 %v970_v0 }
  0x2b   : > { %900 = vmatpush3.bf16.msra.mxu1 %v939_v32 }
  0xd7   : > { %v482_v10 = vpop.f32.mrf.mxu0 }
  0xd8   : > { %v488_v11 = vmul.f32 0.088388346, %v482_v10 }
  0xd9   : > { %v877_v12 = vpop.f32.mrf.mxu0 }
  0xda   : > { %v497_v13 = vsel %vm496_vm2, %v488_v11, -1e+09 }
  0xdb   : > { %v485_v14 = vpop.f32.mrf.mxu0  ;;  %v499_v15 = vsel %vm498_vm3, %v497_v13, -inf }
  0xdc   : > { %500 = vmax.xlane.f32.xlu0 %v499_v15 }
  0xdd   : > { %v878_v16 = vpop.f32.mrf.mxu0 }
 0x165   : > { %v501_v19 = vpop.xlane.xlu0 %500 }
 0x166   : > { %v502_v20 = vsub.f32 %v497_v13, %v501_v19 }
 0x168   : > { %v503_v21 = vmul.f32 1.442695, %v502_v20 }
 0x16a   : > { %940 = vpow2.f32 %v503_v21 }
 0x177   : > { %v941_v22 = vpop.eup %940 }
 0x178   : > { %v505_v23 = vsel %vm498_vm3, %v941_v22, 0.0  ;;  %v508_v24 = vpack.c.bf16 %v941_v22, %v941_v22 }
 0x179   : > { %506 = vadd.xlane.f32.xlu0 %v505_v23 }
 0x17a   : > { %882 = vmatmul.mubr.msk.bf16.vlgmr.msra.gmra.mxu0 %vm498_vm3, %v508_v24 }
 0x202   : > { %v507_v33 = vpop.xlane.xlu0 %506 }
 0x203   : > { %942 = vrcp.f32 %v507_v33 }
 0x210   : > { %v943_v34 = vpop.eup %942 }
 0x23a   : > { %v550_v35 = vpop.f32.mrf.mxu0 }
 0x23b   : > { %v557_v36 = vmul.f32 %v943_v34, %v550_v35 }
 0x23c   : > { %v883_v37 = vpop.f32.mrf.mxu0 }
 0x23d   : > { %v558_v38 = vpack.c.bf16 %v557_v36, %v557_v36 }
 0x23e   : > { %v553_v39 = vpop.f32.mrf.mxu0 }
 0x23f   : > { %902 = vmatmul.mubr.bf16.vlgmr.msra.gmra.mxu1 %v558_v38 }
 0x240   : > { %v884_v40 = vpop.f32.mrf.mxu0 }
 0x2ff   : > { %v664_v44 = vpop.f32.mrf.mxu1 }
 0x300   : > { %v665_v45 = vadd.f32 %v845_v42, %v664_v44 }
 0x301   : > { %v903_v46 = vpop.f32.mrf.mxu1 }
 0x302   : > { %v672_v47 = vadd.f32 %v671_v43, %v665_v45 }
 0x303   : > { %v667_v48 = vpop.f32.mrf.mxu1 }
 0x304   : > { %673 = vadd.xlane.f32.xlu1 %v672_v47 }
 0x305   : > { %v904_v49 = vpop.f32.mrf.mxu1 }
 0x38d   : > { %v674_v50 = vpop.xlane.xlu1 %673 }
 0x38e   : > { %v676_v51 = vmul.f32 0.0078125, %v674_v50 }
 0x390   : > { %v677_v52 = vsub.f32 %v672_v47, %v676_v51 }
 0x392   : > { %v678_v53 = vmul.f32 %v677_v52, %v677_v52 }
 0x394   : > { %679 = vadd.xlane.f32.xlu1 %v678_v53 }
 0x41d   : > { %v680_v54 = vpop.xlane.xlu1 %679 }
 0x41e   : > { %v681_v55 = vmul.f32 0.0078125, %v680_v54 }
 0x420   : > { %v682_v56 = vadd.f32 1e-05, %v681_v55 }
 0x422   : > { %944 = vrsqrt.f32 %v682_v56 }
 0x42f   : > { %v945_v57 = vpop.eup %944 }
 0x430   : > { %v684_v59 = vmul.f32 %v945_v57, %v677_v52 }
 0x432   : > { %v692_v61 = vmul.f32 %v854_v58, %v684_v59 }
 0x434   : > { %v700_v62 = vadd.f32 %v855_v60, %v692_v61 }
 0x436   : > { %v701_v63 = vpack.c.bf16 %v700_v62, %v700_v62 }
 0x438   : > { %702 = vst [vmem:[%s443_s20] sm:$0xf] %v701_v63 }
 0x439 PF: > { %s19_s11 = sadd.s32 1, %s968_s11   ;;  %s1141_s30 = smov %s964_s10 }
 0x43a   : > { %p16_p5 = scmp.ge.s32.totalorder %s19_s11, 4   ;;  %s1142_s10 = smov %s1144_s12 }
 0x43c   :  { %18 = sbr.rel (!%p16_p5) target bundleno = 2 (0x2), region = 98 }

// kernel: adversary_train_forward.23
= control target key start
LH: loop header
LB: loop body
LE: loop exit
PB: predicated region body
PF: predicated region fallthrough
CT: control target
= control target key end

     0   :  { %vm25_vm0 = vcmask 7168   ;;  %v492_v2 = vmov 0   ;;  %s697_s0 = inlined_call_operand.vmem [shape: bf16[16,128], index: 0, kind: input, shape index: {}]   ;;  %s698_s1 = inlined_call_operand.vmem [shape: bf16[128,256], index: 1, kind: input, shape index: {}]   ;;  %s699_s2 = inlined_call_operand.vmem [shape: f32[1,256], index: 2, kind: input, shape index: {}]   ;;  %s700_s3 = inlined_call_operand.vmem [shape: s32[16,1], index: 3, kind: input, shape index: {}]   ;;  %s701_s4 = inlined_call_operand.hbm [shape: f32[16,256], index: 4, kind: output, shape index: {0}]   ;;  %s702_s5 = inlined_call_operand.vmem [shape: f32[16,128], index: 5, kind: output, shape index: {1}]  }
   0x1   :  { %v429_v0 = vld [vmem:[%s698_s1 + $0x74] ss:$8 sps:$4 sm:$0xff]   ;;  %v431_v1 = vld [vmem:[%s698_s1 + $0x70] ss:$8 sps:$4 sm:$0xff]   ;;  %32 = vst.msk [vmem:[#allocation5] sm:$0xff] %vm25_vm0, %v492_v2  ;;  %33 = vst.msk [vmem:[#allocation5 + $0x8] sm:$0xff] %vm25_vm0, %v492_v2  ;;  %182 = vmatprep.mubr.bf16.mxu0 %v492_v2  ;;  %427 = vset.pattern.permute.xlu1 %v492_v2 }
   0x2   :  { %150 = vmatprep.subr.bf16.mxu0 %v429_v0  ;;  %v432_v3 = vld [vmem:[%s698_s1 + $0x64] ss:$8 sps:$4 sm:$0xff]   ;;  %428 = vset.pattern.permute.xlu0 %v492_v2  ;;  %v434_v4 = vld [vmem:[%s698_s1 + $0x60] ss:$8 sps:$4 sm:$0xff]   ;;  %v435_v5 = vld [vmem:[%s698_s1 + $0x54] ss:$8 sps:$4 sm:$0xff]  }
   0x3   :  { %151 = vmatpush1.bf16.msra.mxu0 %v431_v1  ;;  %v437_v6 = vld [vmem:[%s698_s1 + $0x50] ss:$8 sps:$4 sm:$0xff]   ;;  %v438_v7 = vld [vmem:[%s698_s1 + $0x44] ss:$8 sps:$4 sm:$0xff]   ;;  %v440_v8 = vld [vmem:[%s698_s1 + $0x40] ss:$8 sps:$4 sm:$0xff]  }
   0x4   :  { %152 = vmatprep.subr.bf16.mxu0 %v432_v3  ;;  %v441_v9 = vld [vmem:[%s698_s1 + $0x34] ss:$8 sps:$4 sm:$0xff]  }
   0x7   :  { %153 = vmatpush1.bf16.msra.mxu0 %v434_v4 }
   0x8   :  { %154 = vmatprep.subr.bf16.mxu0 %v435_v5 }
   0xb   :  { %155 = vmatpush1.bf16.msra.mxu0 %v437_v6 }
   0xc   :  { %156 = vmatprep.subr.bf16.mxu0 %v438_v7 }
   0xd   :  { %11 = vsyncpa [#allocation7], 0  ;;  %v443_v10 = vld [vmem:[%s698_s1 + $0x30] ss:$8 sps:$4 sm:$0xff]   ;;  %v444_v11 = vld [vmem:[%s698_s1 + $0x24] ss:$8 sps:$4 sm:$0xff]   ;;  %v54_v18 = vlaneseq }
   0xe   :  { %v446_v12 = vld [vmem:[%s698_s1 + $0x20] ss:$8 sps:$4 sm:$0xff]   ;;  %v447_v13 = vld [vmem:[%s698_s1 + $0x14] ss:$8 sps:$4 sm:$0xff]   ;;  %v449_v14 = vld [vmem:[%s698_s1 + $0x10] ss:$8 sps:$4 sm:$0xff]  }
   0xf   :  { %157 = vmatpush1.bf16.msra.mxu0 %v440_v8  ;;  %v450_v15 = vld [vmem:[%s698_s1 + $0x4] ss:$8 sps:$4 sm:$0xff]   ;;  %v452_v16 = vld [vmem:[%s698_s1] ss:$8 sps:$4 sm:$0xff]   ;;  %v55_v19 = vshrl.u32 %v54_v18, 7  ;;  %v493_v35 = vmov -inf  }
  0x10   :  { %158 = vmatprep.subr.bf16.mxu0 %v441_v9  ;;  %v453_v17 = vld [vmem:[%s697_s0] sm:$0xff]   ;;  %26 = vst.msk [vmem:[#allocation2] sm:$0xff] %vm25_vm0, %v493_v35  ;;  %27 = vst.msk [vmem:[#allocation2 + $0x8] sm:$0xff] %vm25_vm0, %v493_v35  ;;  %v494_v36 = vmov 0.0   ;;  %v606_v37 = vand.u32 127, %v54_v18  ;;  %v205_v58 = vld [vmem:[%s700_s3 + $0x8] sm:$0xff] }
  0x11   :  { %v56_v20 = vsub.s32 0, %v55_v19  ;;  %v52_v21 = vld [vmem:[%s699_s2] sm:$0x3]  ;;  %v60_v22 = vsub.s32 1, %v55_v19  ;;  %28 = vst.msk [vmem:[#allocation3] sm:$0xff] %vm25_vm0, %v494_v36  ;;  %29 = vst.msk [vmem:[#allocation3 + $0x8] sm:$0xff] %vm25_vm0, %v494_v36 }
  0x12   :  { %30 = vst.msk [vmem:[#allocation4] sm:$0xff] %vm25_vm0, %v494_v36  ;;  %31 = vst.msk [vmem:[#allocation4 + $0x8] sm:$0xff] %vm25_vm0, %v494_v36  ;;  %v611_v39 = vadd.s32 128, %v606_v37  ;;  %v204_v52 = vld [vmem:[%s700_s3] sm:$0xff]  ;;  %s495_s3 = smov [#allocation6]  }
  0x13   :  { %159 = vmatpush1.bf16.msra.mxu0 %v443_v10  ;;  %v57_v23 = vrot.slane %v52_v21, %v56_v20  ;;  %v61_v24 = vrot.slane %v52_v21, %v60_v22  ;;  %s389_s30 = sshll.u32 %s495_s3, 4  ;;  %s390_s30 = int_to_ptr.vmem [resolvable:$true] %s389_s30 }
  0x14   :  { %160 = vmatprep.subr.bf16.mxu0 %v444_v11  ;;  %s470_s6 = scalar_lea.vmem %s390_s30, 512  ;;  %p475_p1 = scmp.lt.s32.totalorder %s390_s30, %s390_s30 }
  0x15   :  { %p471_p0 = scmp.ne.s32.totalorder %s390_s30, %s470_s6  ;;  %p476_p2 = scmp.lt.s32.totalorder %s470_s6, %s470_s6 }
  0x17   :  { %161 = vmatpush1.bf16.msra.mxu0 %v446_v12  ;;  %v608_v38 = vld [vmem:[#allocation2] sm:$0xff]  ;;  %v632_v45 = vld [vmem:[#allocation2 + $0x8] sm:$0xff]  ;;  %p477_p3 = por %p476_p2, %p475_p1 }
  0x18   :  { %162 = vmatprep.subr.bf16.mxu0 %v447_v13  ;;  %v257_v36 = vld [vmem:[#allocation3 + $0x8] sm:$0xff] }
  0x19   :  { %p478_p4 = pnand %p477_p3, %p471_p0 }
  0x1b   :  { %163 = vmatpush1.bf16.msra.mxu0 %v449_v14 }
  0x1c   :  { %164 = vmatprep.subr.bf16.mxu0 %v450_v15 }
  0x1f   :  { %165 = vmatpush1.bf16.msra.mxu0 %v452_v16 }
  0x22   :  { %183 = vmatmul.mubr.bf16.vlgmr.msra.gmra.mxu0 %v453_v17 }
  0xe2   :  { %v184_v25 = vpop.f32.mrf.mxu0 }
  0xe3   :  { %v584_v26 = vadd.f32 %v184_v25, %v57_v23 }
  0xe4   :  { %v186_v27 = vpop.f32.mrf.mxu0 }
  0xe5   :  { %193 = vst [vmem:[#allocation6] sm:$0xff] %v584_v26  ;;  %v587_v28 = vadd.f32 %v186_v27, %v61_v24 }
  0xe6   :  { %v188_v29 = vpop.f32.mrf.mxu0 }
  0xe7   :  { %194 = vst [vmem:[#allocation6 + $0x8] sm:$0xff] %v587_v28  ;;  %v590_v30 = vadd.f32 %v188_v29, %v57_v23  ;;  %v206_v31 = vmax.f32 %v584_v26, %v587_v28 }
  0xe8   :  { %v190_v32 = vpop.f32.mrf.mxu0 }
  0xe9   :  { %195 = vst [vmem:[#allocation6 + $0x10] sm:$0xff] %v590_v30  ;;  %v595_v33 = vadd.f32 %v190_v32, %v61_v24  ;;  %207 = vmax.xlane.f32.xlu0 %v206_v31  ;;  %v256_v31 = vld [vmem:[#allocation3] sm:$0xff] }
  0xeb   :  { %196 = vst [vmem:[#allocation6 + $0x18] sm:$0xff] %v595_v33  ;;  %v209_v34 = vmax.f32 %v590_v30, %v595_v33 }
  0xed   :  { %210 = vmax.xlane.f32.xlu0 %v209_v34 }
 0x172   :  { %v613_v40 = vpop.xlane.xlu0 %207 }
 0x173   :  { %vm212_vm1 = vcmp.ge.f32.partialorder %v584_v26, %v613_v40  ;;  %vm213_vm2 = vcmp.ge.f32.partialorder %v587_v28, %v613_v40  ;;  %vm327_vm3 = vcmp.gt.f32.partialorder %v613_v40, %v608_v38  ;;  %v623_v41 = vmax.f32 %v608_v38, %v613_v40  ;;  %v302_v40 = vld [vmem:[#allocation4 + $0x8] sm:$0xff] }
 0x174   :  { %v216_v42 = vsel %vm212_vm1, %v606_v37, 1073741824  ;;  %v217_v43 = vsel %vm213_vm2, %v611_v39, 1073741824 }
 0x175   :  { %268 = vperm.xlu1 %427, %v623_v41   ;;  %v258_v44 = vsub.f32 %v608_v38, %v623_v41  ;;  %299 = vst.msk [vmem:[#allocation2] sm:$0xff] %vm25_vm0, %v623_v41  ;;  %vm220_vm4 = vcmp.lt.s32.totalorder %v216_v42, %v217_v43 }
 0x176   :  { %v634_v46 = vpop.xlane.xlu0 %210  ;;  %v221_v47 = vsel %vm220_vm4, %v216_v42, %v217_v43 }
 0x177   :  { %v638_v48 = vmax.f32 %v632_v45, %v634_v46  ;;  %v223_v49 = vshra.s32 %v221_v47, 16  ;;  %vm214_vm5 = vcmp.ge.f32.partialorder %v590_v30, %v634_v46  ;;  %vm215_vm6 = vcmp.ge.f32.partialorder %v595_v33, %v634_v46 }
 0x178   :  { %v218_v53 = vsel %vm214_vm5, %v606_v37, 1073741824  ;;  %v219_v54 = vsel %vm215_vm6, %v611_v39, 1073741824  ;;  %v222_v7 = vand.u32 65535, %v221_v47  ;;  %v329_v47 = vld [vmem:[#allocation5] sm:$0xff]  ;;  %vm328_vm14 = vcmp.gt.f32.partialorder %v634_v46, %v632_v45 }
 0x179   :  { %v259_v50 = vsub.f32 %v632_v45, %v638_v48  ;;  %300 = vst.msk [vmem:[#allocation2 + $0x8] sm:$0xff] %vm25_vm0, %v638_v48  ;;  %273 = vperm.xlu1 %427, %v638_v48   ;;  %v225_v51 = vcvt.s32.f32 %v223_v49  ;;  %vm236_vm7 = vcmp.lt.s32.totalorder %v218_v53, %v219_v54 }
 0x17a   :  { %v237_v55 = vsel %vm236_vm7, %v218_v53, %v219_v54  ;;  %v224_v11 = vcvt.s32.f32 %v222_v7 }
 0x17b   :  { %226 = vmin.xlane.f32.xlu0 %v225_v51  ;;  %v239_v56 = vshra.s32 %v237_v55, 16  ;;  %v238_v16 = vand.u32 65535, %v237_v55 }
 0x17c   :  { %v338_v46 = vld [vmem:[#allocation2] sm:$0xff] }
 0x17d   :  { %v241_v57 = vcvt.s32.f32 %v239_v56  ;;  %v240_v18 = vcvt.s32.f32 %v238_v16 }
 0x191   :  { %304 = vperm.xlu0 %428, %v204_v52  }
 0x19d   :  { %242 = vmin.xlane.f32.xlu1 %v241_v57 }
 0x1ae   :  { %307 = vperm.xlu1 %427, %v205_v58  }
 0x1f0   :  { %v269_v59 = vpop.permute.xlu1 %268 }
 0x1f1   :  { %v276_v60 = vsub.f32 %v584_v26, %v269_v59  ;;  %v277_v61 = vsub.f32 %v587_v28, %v269_v59  ;;  %v330_v59 = vld [vmem:[#allocation5 + $0x8] sm:$0xff] }
 0x1f3   :  { %v280_v62 = vmul.f32 1.442695, %v276_v60  ;;  %v282_v63 = vmul.f32 1.442695, %v277_v61  ;;  %v301_v60 = vld [vmem:[#allocation4] sm:$0xff] }
 0x1f4   :  { %v274_v0 = vpop.permute.xlu1 %273 }
 0x1f5   :  { %454 = vpow2.f32 %v280_v62  ;;  %v278_v1 = vsub.f32 %v590_v30, %v274_v0  ;;  %v279_v2 = vsub.f32 %v595_v33, %v274_v0 }
 0x1f6   :  { %456 = vpow2.f32 %v282_v63 }
 0x1f7   :  { %v284_v3 = vmul.f32 1.442695, %v278_v1  ;;  %v286_v4 = vmul.f32 1.442695, %v279_v2 }
 0x1f9   :  { %458 = vpow2.f32 %v284_v3 }
 0x1fa   :  { %460 = vpow2.f32 %v286_v4 }
 0x202   :  { %v455_v5 = vpop.eup %454 }
 0x203   :  { %v457_v6 = vpop.eup %456 }
 0x204   :  { %v288_v8 = vadd.f32 %v457_v6, %v455_v5  ;;  %v227_v9 = vpop.xlane.xlu0 %226 }
 0x205   :  { %vm228_vm8 = vcmp.eq.f32.partialorder %v225_v51, %v227_v9  ;;  %v233_v35 = vcvt.f32.s32 %v227_v9 }
 0x206   :  { %289 = vadd.xlane.f32.xlu0 %v288_v8  ;;  %v459_v10 = vpop.eup %458  ;;  %v229_v13 = vsel %vm228_vm8, %v224_v11, inf  ;;  %v339_v8 = vld [vmem:[#allocation2 + $0x8] sm:$0xff] }
 0x207   :  { %v461_v12 = vpop.eup %460  ;;  %v234_v41 = vshll.u32 %v233_v35, 16 }
 0x208   :  { %v291_v14 = vadd.f32 %v461_v12, %v459_v10 }
 0x20a   :  { %230 = vmin.xlane.f32.xlu0 %v229_v13  ;;  %292 = vadd.xlane.f32.xlu1 %v291_v14 }
 0x20c   :  { %v305_v15 = vpop.permute.xlu0 %304 }
 0x20d   :  { %vm309_vm9 = vcmp.eq.s32.totalorder %v606_v37, %v305_v15  ;;  %vm310_vm10 = vcmp.eq.s32.totalorder %v611_v39, %v305_v15 }
 0x20e   :  { %v313_v20 = vsel %vm309_vm9, %v584_v26, 0.0  ;;  %v314_v21 = vsel %vm310_vm10, %v587_v28, 0.0  ;;  %v260_v26 = vmul.f32 1.442695, %v258_v44  ;;  %v262_v28 = vmul.f32 1.442695, %v259_v50 }
 0x20f   :  { %v317_v23 = vadd.f32 %v314_v21, %v313_v20 }
 0x210   :  { %462 = vpow2.f32 %v260_v26 }
 0x211   :  { %464 = vpow2.f32 %v262_v28 }
 0x21d   :  { %v463_v29 = vpop.eup %462 }
 0x21e   :  { %v264_v32 = vmul.f32 %v463_v29, %v256_v31 }
 0x226   :  { %v243_v17 = vpop.xlane.xlu1 %242 }
 0x227   :  { %vm244_vm11 = vcmp.eq.f32.partialorder %v241_v57, %v243_v17  ;;  %v249_v55 = vcvt.f32.s32 %v243_v17 }
 0x228   :  { %v245_v19 = vsel %vm244_vm11, %v240_v18, inf }
 0x229   :  { %246 = vmin.xlane.f32.xlu0 %v245_v19  ;;  %v250_v57 = vshll.u32 %v249_v55, 16 }
 0x22a   :  { %v308_v22 = vpop.permute.xlu1 %307 }
 0x22b   :  { %vm311_vm12 = vcmp.eq.s32.totalorder %v606_v37, %v308_v22  ;;  %vm312_vm13 = vcmp.eq.s32.totalorder %v611_v39, %v308_v22 }
 0x22c   :  { %v315_v24 = vsel %vm311_vm12, %v590_v30, 0.0  ;;  %v316_v25 = vsel %vm312_vm13, %v595_v33, 0.0  ;;  %v465_v30 = vpop.eup %464 }
 0x22d   :  { %318 = vadd.xlane.f32.xlu0 %v317_v23  ;;  %v320_v27 = vadd.f32 %v316_v25, %v315_v24  ;;  %v265_v42 = vmul.f32 %v465_v30, %v257_v36 }
 0x22f   :  { %321 = vadd.xlane.f32.xlu1 %v320_v27 }
 0x28f   :  { %v290_v34 = vpop.xlane.xlu0 %289 }
 0x290   :  { %v294_v33 = vadd.f32 %v290_v34, %v264_v32 }
 0x292   :  { %297 = vst.msk [vmem:[#allocation3] sm:$0xff] %vm25_vm0, %v294_v33 }
 0x293   :  { %v231_v39 = vpop.xlane.xlu0 %230  ;;  %v293_v44 = vpop.xlane.xlu1 %292 }
 0x294   :  { %v232_v43 = vcvt.f32.s32 %v231_v39  ;;  %v295_v49 = vadd.f32 %v293_v44, %v265_v42 }
 0x296   :  { %v235_v48 = vadd.s32 %v234_v41, %v232_v43  ;;  %298 = vst.msk [vmem:[#allocation3 + $0x8] sm:$0xff] %vm25_vm0, %v295_v49 }
 0x298   :  { %v331_v50 = vsel %vm327_vm3, %v235_v48, %v329_v47 }
 0x299   :  { %333 = vst.msk [vmem:[#allocation5] sm:$0xff] %vm25_vm0, %v331_v50  ;;  %v340_v54 = vld [vmem:[#allocation3] sm:$0xff] }
 0x29d   :  { %v341_v53 = vld [vmem:[#allocation3 + $0x8] sm:$0xff] }
 0x29e   :  { %466 = vlog2.f32 %v341_v53 }
 0x29f   :  { %468 = vlog2.f32 %v340_v54 }
 0x2a0   :  { %v354_v51 = vld [vmem:[#allocation5] sm:$0xff] }
 0x2a1   :  { %v356_v52 = vcvt.s32.f32 %v354_v51 }
 0x2a3   :  { %360 = vperm.xlu0 %428, %v356_v52  }
 0x2ab   :  { %v467_v2 = vpop.eup %466 }
 0x2ac   :  { %v469_v3 = vpop.eup %468  ;;  %v345_v4 = vmul.f32 0.6931472, %v467_v2 }
 0x2ad   :  { %v343_v5 = vmul.f32 0.6931472, %v469_v3 }
 0x2ae   :  { %v347_v45 = vadd.f32 %v345_v4, %v339_v8 }
 0x2af   :  { %v346_v11 = vadd.f32 %v343_v5, %v338_v46 }
 0x2b2   :  { %v247_v56 = vpop.xlane.xlu0 %246 }
 0x2b3   :  { %v248_v58 = vcvt.f32.s32 %v247_v56 }
 0x2b5   :  { %v251_v61 = vadd.s32 %v250_v57, %v248_v58 }
 0x2b6   :  { %v319_v38 = vpop.xlane.xlu0 %318 }
 0x2b7   :  { %v332_v62 = vsel %vm328_vm14, %v251_v61, %v330_v59  ;;  %v323_v63 = vadd.f32 %v319_v38, %v301_v60 }
 0x2b8   :  { %334 = vst.msk [vmem:[#allocation5 + $0x8] sm:$0xff] %vm25_vm0, %v332_v62  ;;  %v322_v0 = vpop.xlane.xlu1 %321 }
 0x2b9   :  { %325 = vst.msk [vmem:[#allocation4] sm:$0xff] %vm25_vm0, %v323_v63  ;;  %v324_v1 = vadd.f32 %v322_v0, %v302_v40 }
 0x2bb   :  { %326 = vst.msk [vmem:[#allocation4 + $0x8] sm:$0xff] %vm25_vm0, %v324_v1 }
 0x2bf   :  { %v355_v6 = vld [vmem:[#allocation5 + $0x8] sm:$0xff] }
 0x2c0   :  { %v357_v7 = vcvt.s32.f32 %v355_v6  ;;  %v348_v9 = vld [vmem:[#allocation4] sm:$0xff] }
 0x2c1   :  { %v350_v13 = vsub.f32 %v346_v11, %v348_v9 }
 0x2c2   :  { %365 = vperm.xlu1 %427, %v357_v7   ;;  %v349_v10 = vld [vmem:[#allocation4 + $0x8] sm:$0xff] }
 0x2c3   :  { %v351_v12 = vsub.f32 %v347_v45, %v349_v10 }
 0x2c5   :  { %377 = vperm.xlu0 %428, %v351_v12  }
 0x2c6   :  { %481 = shalt.err (!%p478_p4)
}
 0x2c7   :  { %s496_s7 = smov 256   ;;  %s497_s8 = smov 16   ;;  %372 = vperm.xlu1 %427, %v350_v13   ;;  %vm353_vm15 = vcmp.eq.s32.totalorder %v606_v37, 1  ;;  %vm352_vm0 = vcmp.eq.s32.totalorder %v606_v37, 0 }
 0x2c8   :  { %395 = dma.vmem_to_hbm [thread:$0]  %s390_s30, 512, %s701_s4, [#allocation7], %s496_s7, %s496_s7, %s497_s8  }
 0x31e   :  { %v361_v14 = vpop.permute.xlu0 %360 }
 0x31f   :  { %v368_v18 = vsel %vm353_vm15, %v361_v14, 0.0 }
 0x33d   :  { %v366_v15 = vpop.permute.xlu1 %365 }
 0x33e   :  { %v369_v16 = vsel %vm353_vm15, %v366_v15, 0.0 }
 0x340   :  { %v378_v17 = vpop.permute.xlu0 %377 }
 0x341   :  { %v381_v19 = vsel %vm352_vm0, %v378_v17, %v369_v16 }
 0x342   :  { %v373_v20 = vpop.permute.xlu1 %372  ;;  %383 = vst [vmem:[%s702_s5 + $0x8] sm:$0xff] %v381_v19 }
 0x343   :  { %v380_v21 = vsel %vm352_vm0, %v373_v20, %v368_v18 }
 0x344   :  { %382 = vst [vmem:[%s702_s5] sm:$0xff] %v380_v21 }
 0x345   :  { %490 = dma.done.wait [#allocation7], 512  }
 0x346   :  { %491 = vsyncadd [#allocation7], 4294966784 }
 0x347   :  { %403 = vsyncpa [#allocation7], 1 }

</bundles_post_ra>
